<compile_context>
chip_gen: v7x
topology: tpu7x:2x2x1
jax: 0.10.0
libtpu: 0.0.40
codegen_flags: <defaults>
</compile_context>

<pallas_src>
import math

import jax
import jax.numpy as jnp
from jax import lax
from jax.experimental import pallas as pl
from jax.experimental.pallas import tpu as pltpu

# Module hyper-parameters (defaults of UNetBlockStyleMLP_backbone_NoFirstNorm)
NDIM = 2
NLAYERS = 5
NHIDDEN = 64
TIME_EMBED = 64
NBLOCKS = NLAYERS - 1          # 4 UNetMLPBlocks, all with in==out==nhidden
EPS = 1e-5                     # LayerNorm eps
HALF_EMB = TIME_EMBED // 2
OUT_PAD = 128                  # lane-padded width of the final projection
TWO_PI = 2.0 * math.pi
HALF_PI = 0.5 * math.pi
AFF_W = 4 * NHIDDEN            # per-block width of the padded affine output


def _round_up(n, m):
    return ((n + m - 1) // m) * m


def _silu(v):
    # sigmoid(v) = 0.5*(tanh(v/2)+1): one EUP transcendental, no overflow case.
    return 0.5 * v * (jnp.tanh(0.5 * v) + 1.0)


def _layernorm(v, w, b):
    # Single-pass statistics: the two cross-lane reduces are independent.
    inv_n = 1.0 / NHIDDEN
    s1 = jnp.sum(v, axis=-1, keepdims=True)
    s2 = jnp.sum(v * v, axis=-1, keepdims=True)
    mu = s1 * inv_n
    var = s2 * inv_n - mu * mu
    return (v - mu) * lax.rsqrt(var + EPS) * w + b


def backbone_kernel(x_ref, t_ref, fw2_ref, phase_ref, pre_w_ref, pre_b_ref,
                    n0w_ref, n0b_ref, f0w_ref, f0b_ref,
                    aw_ref, ab_ref, n1w_ref, n1b_ref,
                    f1w_ref, f1b_ref, lw_ref, lb_ref, out_ref):
    # Load shared (grid-invariant) weights once.
    fw2 = fw2_ref[...]            # (1, TIME_EMBED), 2*pi already folded in
    phase = phase_ref[...]        # (1, TIME_EMBED): [0]*32 ++ [pi/2]*32
    pre_w = pre_w_ref[...]
    pre_b = pre_b_ref[...]
    aw = aw_ref[...]              # (TIME_EMBED, NBLOCKS*256) bf16, vreg-aligned
    ab = ab_ref[...]              # (1, NBLOCKS*256) f32, "+1" folded into scale
    lw = lw_ref[...]              # (NHIDDEN, OUT_PAD) bf16
    lb = lb_ref[...]              # (1, OUT_PAD) f32
    n0w = [n0w_ref[i] for i in range(NBLOCKS)]
    n0b = [n0b_ref[i] for i in range(NBLOCKS)]
    f0w = [f0w_ref[i] for i in range(NBLOCKS)]
    f0b = [f0b_ref[i] for i in range(NBLOCKS)]
    n1w = [n1w_ref[i] for i in range(NBLOCKS)]
    n1b = [n1b_ref[i] for i in range(NBLOCKS)]
    f1w = [f1w_ref[i] for i in range(NBLOCKS)]
    f1b = [f1b_ref[i] for i in range(NBLOCKS)]

    def _rows(x, t):
        # ---- GaussianFourierProjection(scale=1) ----
        # cos(x) = sin(x + pi/2) -> one transcendental per element.
        emb = jnp.sin(t * fw2 + phase)                      # (rows, TIME_EMBED)

        # ---- fused affine for all blocks (loop-invariant emb) ----
        params_all = jnp.dot(emb.astype(jnp.bfloat16), aw,
                             preferred_element_type=jnp.float32) + ab

        # ---- pre-projection Linear(ndim -> nhidden) on the VPU (K=2) ----
        h = jnp.zeros((x.shape[0], NHIDDEN), jnp.float32) + pre_b
        for d in range(NDIM):
            h = h + x[:, d:d + 1] * pre_w[d:d + 1, :]

        # ---- UNetMLPBlock x NBLOCKS (in==out -> identity skip, skip_scale=1)
        for i in range(NBLOCKS):
            orig = h
            a = _silu(_layernorm(h, n0w[i], n0b[i]))
            a = jnp.dot(a.astype(jnp.bfloat16), f0w[i],
                        preferred_element_type=jnp.float32) + f0b[i]

            base = AFF_W * i
            # both slices start on a 128-lane boundary -> free vreg selects
            scale = params_all[:, base:base + NHIDDEN]            # == scale + 1
            shift = params_all[:, base + 2 * NHIDDEN:base + 3 * NHIDDEN]

            a_n = _layernorm(a, n1w[i], n1b[i])
            a = _silu(shift + a_n * scale)       # addcmul(shift, norm1, scale+1)
            # dropout p=0 -> identity
            a = jnp.dot(a.astype(jnp.bfloat16), f1w[i],
                        preferred_element_type=jnp.float32) + f1b[i]
            h = a + orig                                           # skip_scale=1

        # ---- final Linear(nhidden -> ndim): matmul into padded lanes, keep
        # only the real NDIM columns (lane-0-based slice, no rotate).
        out = jnp.dot(h.astype(jnp.bfloat16), lw,
                      preferred_element_type=jnp.float32) + lb
        return out[:, :NDIM]

    x = x_ref[...]
    t = t_ref[...]
    half = x.shape[0] // 2
    # Two independent row-halves in one basic block -> MXU of one half can
    # overlap the other half's LayerNorm/SiLU/modulation (VPU/EUP) work.
    out_a = _rows(x[:half], t[:half])
    out_b = _rows(x[half:], t[half:])
    out_ref[:half, :] = out_a.astype(out_ref.dtype)
    out_ref[half:, :] = out_b.astype(out_ref.dtype)


def build_params(key):
    """Deterministic synthetic parameters (shapes match the PyTorch module)."""
    ks = jax.random.split(key, 12)
    f32 = jnp.float32
    p = {}
    # GaussianFourierProjection.W : (embed_dim//2,), scale=1
    p["fourier_w"] = jax.random.normal(ks[0], (1, HALF_EMB), f32)
    # pre-projection Linear(ndim, nhidden)
    p["pre_w"] = jax.random.normal(ks[1], (NDIM, NHIDDEN), f32) / math.sqrt(NDIM)
    p["pre_b"] = jax.random.normal(ks[2], (1, NHIDDEN), f32) * 0.01
    # Per-block params, stacked along leading axis.
    p["n0w"] = jnp.ones((NBLOCKS, 1, NHIDDEN), f32)
    p["n0b"] = jnp.zeros((NBLOCKS, 1, NHIDDEN), f32)
    p["f0w"] = jax.random.normal(ks[3], (NBLOCKS, NHIDDEN, NHIDDEN), f32) / math.sqrt(NHIDDEN)
    p["f0b"] = jax.random.normal(ks[4], (NBLOCKS, 1, NHIDDEN), f32) * 0.01
    p["aw"] = jax.random.normal(ks[5], (NBLOCKS, TIME_EMBED, 2 * NHIDDEN), f32) / math.sqrt(TIME_EMBED)
    p["ab"] = jax.random.normal(ks[6], (NBLOCKS, 1, 2 * NHIDDEN), f32) * 0.01
    p["n1w"] = jnp.ones((NBLOCKS, 1, NHIDDEN), f32)
    p["n1b"] = jnp.zeros((NBLOCKS, 1, NHIDDEN), f32)
    p["f1w"] = jax.random.normal(ks[7], (NBLOCKS, NHIDDEN, NHIDDEN), f32) / math.sqrt(NHIDDEN)
    p["f1b"] = jax.random.normal(ks[8], (NBLOCKS, 1, NHIDDEN), f32) * 0.01
    # final Linear(nhidden, ndim)
    p["lw"] = jax.random.normal(ks[9], (NHIDDEN, NDIM), f32) / math.sqrt(NHIDDEN)
    p["lb"] = jax.random.normal(ks[10], (1, NDIM), f32) * 0.01
    return p


def forward(x, t, p, *, block_batch=512):
    B = x.shape[0]
    f32 = jnp.float32
    bf16 = jnp.bfloat16

    # ---- adaptive batch tile ----
    # * BT multiple of 16 (two sublane-aligned halves per tile)
    # * >=2 grid steps whenever B allows it, so v7x's two TensorCores both work
    # * BT sized from ceil(B / n_steps), not B rounded up to block_batch,
    #   to keep padding waste small.
    n_steps = max(1, -(-B // block_batch))
    if B >= 32:
        n_steps = max(n_steps, 2)
    BT = _round_up(-(-B // n_steps), 16)
    B_pad = _round_up(B, BT)
    grid = (B_pad // BT,)

    x_pad = jnp.pad(x.astype(f32), ((0, B_pad - B), (0, 0)))
    t_pad = jnp.pad(t.reshape(B, 1).astype(f32), ((0, B_pad - B), (0, 0)))

    # Fourier weights tiled twice along lanes with 2*pi pre-folded; the sin/cos
    # split becomes a per-lane phase offset passed as a tiny input row.
    fw2 = jnp.concatenate([p["fourier_w"], p["fourier_w"]], axis=-1) * TWO_PI
    phase = jnp.concatenate(
        [jnp.zeros((1, HALF_EMB), f32), jnp.full((1, HALF_EMB), HALF_PI, f32)],
        axis=-1)

    # Fused, vreg-aligned affine weights: per block [scale|pad64|shift|pad64]
    # (every in-kernel slice starts on a 128-lane boundary). The "+1" applied
    # to scale in the module is folded into the bias columns here.
    zw = jnp.zeros((TIME_EMBED, NHIDDEN), f32)
    zb = jnp.zeros((1, NHIDDEN), f32)
    aw_chunks, ab_chunks = [], []
    for i in range(NBLOCKS):
        aw_chunks += [p["aw"][i][:, :NHIDDEN], zw, p["aw"][i][:, NHIDDEN:], zw]
        ab_chunks += [p["ab"][i][:, :NHIDDEN] + 1.0, zb, p["ab"][i][:, NHIDDEN:], zb]
    aw_all = jnp.concatenate(aw_chunks, axis=-1)      # (64, NBLOCKS*256)
    ab_all = jnp.concatenate(ab_chunks, axis=-1)      # (1,  NBLOCKS*256)

    # Final projection padded to 128 lanes for the MXU; only the first NDIM
    # columns are stored (output itself is NOT padded -> no write blowup).
    lw_pad = jnp.zeros((NHIDDEN, OUT_PAD), f32).at[:, :NDIM].set(p["lw"])
    lb_pad = jnp.zeros((1, OUT_PAD), f32).at[:, :NDIM].set(p["lb"])

    args = (
        x_pad, t_pad, fw2, phase,
        p["pre_w"], p["pre_b"],
        p["n0w"], p["n0b"], p["f0w"].astype(bf16), p["f0b"],
        aw_all.astype(bf16), ab_all,
        p["n1w"], p["n1b"], p["f1w"].astype(bf16), p["f1b"],
        lw_pad.astype(bf16), lb_pad,
    )

    def const_spec(a):
        nd = a.ndim
        return pl.BlockSpec(a.shape, lambda i, _nd=nd: (0,) * _nd)

    in_specs = [
        pl.BlockSpec((BT, NDIM), lambda i: (i, 0)),   # x tile
        pl.BlockSpec((BT, 1), lambda i: (i, 0)),      # t tile
    ] + [const_spec(a) for a in args[2:]]              # weights: VMEM-resident

    out = pl.pallas_call(
        backbone_kernel,
        out_shape=jax.ShapeDtypeStruct((B_pad, NDIM), jnp.float32),
        grid=grid,
        in_specs=in_specs,
        out_specs=pl.BlockSpec((BT, NDIM), lambda i: (i, 0)),
        compiler_params=pltpu.CompilerParams(
            dimension_semantics=("parallel",)),
    )(*args)
    return out[:B]


def reference(x, t, p):
    """Pure-JAX reference mirroring the PyTorch forward (all f32)."""
    tp = t.reshape(-1, 1) * p["fourier_w"] * (2.0 * math.pi)
    emb = jnp.concatenate([jnp.sin(tp), jnp.cos(tp)], axis=-1)

    def ln(v, w, b):
        mu = v.mean(-1, keepdims=True)
        var = ((v - mu) ** 2).mean(-1, keepdims=True)
        return (v - mu) / jnp.sqrt(var + EPS) * w + b

    silu = lambda v: v * jax.nn.sigmoid(v)

    h = x @ p["pre_w"] + p["pre_b"]
    for i in range(NBLOCKS):
        orig = h
        a = silu(ln(h, p["n0w"][i], p["n0b"][i]))
        a = a @ p["f0w"][i] + p["f0b"][i]
        prm = emb @ p["aw"][i] + p["ab"][i]
        scale, shift = prm[:, :NHIDDEN], prm[:, NHIDDEN:]
        a = silu(shift + ln(a, p["n1w"][i], p["n1b"][i]) * (scale + 1.0))
        a = a @ p["f1w"][i] + p["f1b"][i]
        h = a + orig
    return h @ p["lw"] + p["lb"]


if __name__ == "__main__":
    key = jax.random.PRNGKey(0)
    kx, kt, kp = jax.random.split(key, 3)

    B = 8
    x = jax.random.normal(kx, (B, NDIM), jnp.float32)       # low-dim data points
    t_enc = jax.random.uniform(kt, (B,), jnp.float32)        # scalar diffusion times
    params = build_params(kp)

    out = forward(x, t_enc, params)
    out = jax.block_until_ready(out)

    ref = reference(x, t_enc, params)
    assert out.shape == (B, NDIM), out.shape
    assert jnp.all(jnp.isfinite(out))
    # bf16 MXU operands (f32 accumulation) -> loose tolerance.
    assert jnp.allclose(out, ref, atol=5e-2, rtol=5e-2), (out, ref)

    print("KERNEL_OK")
</pallas_src>

<mosaic_0001>
module attributes {stable_mosaic.version = 11 : i64} {
  func.func @backbone_kernel(%arg0: i32, %arg1: memref<16x2xf32, #tpu.memory_space<vmem>>, %arg2: memref<16x1xf32, #tpu.memory_space<vmem>>, %arg3: memref<1x64xf32, #tpu.memory_space<vmem>>, %arg4: memref<1x64xf32, #tpu.memory_space<vmem>>, %arg5: memref<2x64xf32, #tpu.memory_space<vmem>>, %arg6: memref<1x64xf32, #tpu.memory_space<vmem>>, %arg7: memref<4x1x64xf32, #tpu.memory_space<vmem>>, %arg8: memref<4x1x64xf32, #tpu.memory_space<vmem>>, %arg9: memref<4x64x64xbf16, #tpu.memory_space<vmem>>, %arg10: memref<4x1x64xf32, #tpu.memory_space<vmem>>, %arg11: memref<64x1024xbf16, #tpu.memory_space<vmem>>, %arg12: memref<1x1024xf32, #tpu.memory_space<vmem>>, %arg13: memref<4x1x64xf32, #tpu.memory_space<vmem>>, %arg14: memref<4x1x64xf32, #tpu.memory_space<vmem>>, %arg15: memref<4x64x64xbf16, #tpu.memory_space<vmem>>, %arg16: memref<4x1x64xf32, #tpu.memory_space<vmem>>, %arg17: memref<64x128xbf16, #tpu.memory_space<vmem>>, %arg18: memref<1x128xf32, #tpu.memory_space<vmem>>, %arg19: memref<16x2xf32, #tpu.memory_space<vmem>>) attributes {dimension_semantics = [#tpu.dimension_semantics<parallel>], iteration_bounds = array<i64: 1>, scalar_prefetch = 0 : i64, scratch_operands = 0 : i64, tpu.core_type = #tpu.core_type<tc>, window_params = [{transform_indices = @transform_0, window_bounds = array<i64: 16, 2>}, {transform_indices = @transform_1, window_bounds = array<i64: 16, 1>}, {pipeline_mode = #tpu.pipeline_mode<synchronous>, transform_indices = @transform_2, window_bounds = array<i64: 1, 64>}, {pipeline_mode = #tpu.pipeline_mode<synchronous>, transform_indices = @transform_3, window_bounds = array<i64: 1, 64>}, {pipeline_mode = #tpu.pipeline_mode<synchronous>, transform_indices = @transform_4, window_bounds = array<i64: 2, 64>}, {pipeline_mode = #tpu.pipeline_mode<synchronous>, transform_indices = @transform_5, window_bounds = array<i64: 1, 64>}, {pipeline_mode = #tpu.pipeline_mode<synchronous>, transform_indices = @transform_6, window_bounds = array<i64: 4, 1, 64>}, {pipeline_mode = #tpu.pipeline_mode<synchronous>, transform_indices = @transform_7, window_bounds = array<i64: 4, 1, 64>}, {pipeline_mode = #tpu.pipeline_mode<synchronous>, transform_indices = @transform_8, window_bounds = array<i64: 4, 64, 64>}, {pipeline_mode = #tpu.pipeline_mode<synchronous>, transform_indices = @transform_9, window_bounds = array<i64: 4, 1, 64>}, {pipeline_mode = #tpu.pipeline_mode<synchronous>, transform_indices = @transform_10, window_bounds = array<i64: 64, 1024>}, {pipeline_mode = #tpu.pipeline_mode<synchronous>, transform_indices = @transform_11, window_bounds = array<i64: 1, 1024>}, {pipeline_mode = #tpu.pipeline_mode<synchronous>, transform_indices = @transform_12, window_bounds = array<i64: 4, 1, 64>}, {pipeline_mode = #tpu.pipeline_mode<synchronous>, transform_indices = @transform_13, window_bounds = array<i64: 4, 1, 64>}, {pipeline_mode = #tpu.pipeline_mode<synchronous>, transform_indices = @transform_14, window_bounds = array<i64: 4, 64, 64>}, {pipeline_mode = #tpu.pipeline_mode<synchronous>, transform_indices = @transform_15, window_bounds = array<i64: 4, 1, 64>}, {pipeline_mode = #tpu.pipeline_mode<synchronous>, transform_indices = @transform_16, window_bounds = array<i64: 64, 128>}, {pipeline_mode = #tpu.pipeline_mode<synchronous>, transform_indices = @transform_17, window_bounds = array<i64: 1, 128>}, {transform_indices = @transform_18, window_bounds = array<i64: 16, 2>}]} {
    %c0 = arith.constant 0 : index
    %c0_0 = arith.constant 0 : index
    %0 = vector.load %arg3[%c0, %c0_0] : memref<1x64xf32, #tpu.memory_space<vmem>>, vector<1x64xf32>
    %c0_1 = arith.constant 0 : index
    %c0_2 = arith.constant 0 : index
    %1 = vector.load %arg4[%c0_1, %c0_2] : memref<1x64xf32, #tpu.memory_space<vmem>>, vector<1x64xf32>
    %c0_3 = arith.constant 0 : index
    %c0_4 = arith.constant 0 : index
    %2 = vector.load %arg5[%c0_3, %c0_4] : memref<2x64xf32, #tpu.memory_space<vmem>>, vector<2x64xf32>
    %c0_5 = arith.constant 0 : index
    %c0_6 = arith.constant 0 : index
    %3 = vector.load %arg6[%c0_5, %c0_6] : memref<1x64xf32, #tpu.memory_space<vmem>>, vector<1x64xf32>
    %c0_7 = arith.constant 0 : index
    %c0_8 = arith.constant 0 : index
    %4 = vector.load %arg11[%c0_7, %c0_8] : memref<64x1024xbf16, #tpu.memory_space<vmem>>, vector<64x1024xbf16>
    %c0_9 = arith.constant 0 : index
    %c0_10 = arith.constant 0 : index
    %5 = vector.load %arg12[%c0_9, %c0_10] : memref<1x1024xf32, #tpu.memory_space<vmem>>, vector<1x1024xf32>
    %c0_11 = arith.constant 0 : index
    %c0_12 = arith.constant 0 : index
    %6 = vector.load %arg17[%c0_11, %c0_12] : memref<64x128xbf16, #tpu.memory_space<vmem>>, vector<64x128xbf16>
    %c0_13 = arith.constant 0 : index
    %c0_14 = arith.constant 0 : index
    %7 = vector.load %arg18[%c0_13, %c0_14] : memref<1x128xf32, #tpu.memory_space<vmem>>, vector<1x128xf32>
    %c0_15 = arith.constant 0 : index
    %c0_16 = arith.constant 0 : index
    %c0_17 = arith.constant 0 : index
    %8 = vector.load %arg7[%c0_15, %c0_16, %c0_17] : memref<4x1x64xf32, #tpu.memory_space<vmem>>, vector<1x1x64xf32>
    %9 = vector.shape_cast %8 : vector<1x1x64xf32> to vector<1x64xf32>
    %c1 = arith.constant 1 : index
    %c0_18 = arith.constant 0 : index
    %c0_19 = arith.constant 0 : index
    %10 = vector.load %arg7[%c1, %c0_18, %c0_19] : memref<4x1x64xf32, #tpu.memory_space<vmem>>, vector<1x1x64xf32>
    %11 = vector.shape_cast %10 : vector<1x1x64xf32> to vector<1x64xf32>
    %c2 = arith.constant 2 : index
    %c0_20 = arith.constant 0 : index
    %c0_21 = arith.constant 0 : index
    %12 = vector.load %arg7[%c2, %c0_20, %c0_21] : memref<4x1x64xf32, #tpu.memory_space<vmem>>, vector<1x1x64xf32>
    %13 = vector.shape_cast %12 : vector<1x1x64xf32> to vector<1x64xf32>
    %c3 = arith.constant 3 : index
    %c0_22 = arith.constant 0 : index
    %c0_23 = arith.constant 0 : index
    %14 = vector.load %arg7[%c3, %c0_22, %c0_23] : memref<4x1x64xf32, #tpu.memory_space<vmem>>, vector<1x1x64xf32>
    %15 = vector.shape_cast %14 : vector<1x1x64xf32> to vector<1x64xf32>
    %c0_24 = arith.constant 0 : index
    %c0_25 = arith.constant 0 : index
    %c0_26 = arith.constant 0 : index
    %16 = vector.load %arg8[%c0_24, %c0_25, %c0_26] : memref<4x1x64xf32, #tpu.memory_space<vmem>>, vector<1x1x64xf32>
    %17 = vector.shape_cast %16 : vector<1x1x64xf32> to vector<1x64xf32>
    %c1_27 = arith.constant 1 : index
    %c0_28 = arith.constant 0 : index
    %c0_29 = arith.constant 0 : index
    %18 = vector.load %arg8[%c1_27, %c0_28, %c0_29] : memref<4x1x64xf32, #tpu.memory_space<vmem>>, vector<1x1x64xf32>
    %19 = vector.shape_cast %18 : vector<1x1x64xf32> to vector<1x64xf32>
    %c2_30 = arith.constant 2 : index
    %c0_31 = arith.constant 0 : index
    %c0_32 = arith.constant 0 : index
    %20 = vector.load %arg8[%c2_30, %c0_31, %c0_32] : memref<4x1x64xf32, #tpu.memory_space<vmem>>, vector<1x1x64xf32>
    %21 = vector.shape_cast %20 : vector<1x1x64xf32> to vector<1x64xf32>
    %c3_33 = arith.constant 3 : index
    %c0_34 = arith.constant 0 : index
    %c0_35 = arith.constant 0 : index
    %22 = vector.load %arg8[%c3_33, %c0_34, %c0_35] : memref<4x1x64xf32, #tpu.memory_space<vmem>>, vector<1x1x64xf32>
    %23 = vector.shape_cast %22 : vector<1x1x64xf32> to vector<1x64xf32>
    %c0_36 = arith.constant 0 : index
    %c0_37 = arith.constant 0 : index
    %c0_38 = arith.constant 0 : index
    %24 = vector.load %arg9[%c0_36, %c0_37, %c0_38] : memref<4x64x64xbf16, #tpu.memory_space<vmem>>, vector<1x64x64xbf16>
    %25 = vector.shape_cast %24 : vector<1x64x64xbf16> to vector<64x64xbf16>
    %c1_39 = arith.constant 1 : index
    %c0_40 = arith.constant 0 : index
    %c0_41 = arith.constant 0 : index
    %26 = vector.load %arg9[%c1_39, %c0_40, %c0_41] : memref<4x64x64xbf16, #tpu.memory_space<vmem>>, vector<1x64x64xbf16>
    %27 = vector.shape_cast %26 : vector<1x64x64xbf16> to vector<64x64xbf16>
    %c2_42 = arith.constant 2 : index
    %c0_43 = arith.constant 0 : index
    %c0_44 = arith.constant 0 : index
    %28 = vector.load %arg9[%c2_42, %c0_43, %c0_44] : memref<4x64x64xbf16, #tpu.memory_space<vmem>>, vector<1x64x64xbf16>
    %29 = vector.shape_cast %28 : vector<1x64x64xbf16> to vector<64x64xbf16>
    %c3_45 = arith.constant 3 : index
    %c0_46 = arith.constant 0 : index
    %c0_47 = arith.constant 0 : index
    %30 = vector.load %arg9[%c3_45, %c0_46, %c0_47] : memref<4x64x64xbf16, #tpu.memory_space<vmem>>, vector<1x64x64xbf16>
    %31 = vector.shape_cast %30 : vector<1x64x64xbf16> to vector<64x64xbf16>
    %c0_48 = arith.constant 0 : index
    %c0_49 = arith.constant 0 : index
    %c0_50 = arith.constant 0 : index
    %32 = vector.load %arg10[%c0_48, %c0_49, %c0_50] : memref<4x1x64xf32, #tpu.memory_space<vmem>>, vector<1x1x64xf32>
    %33 = vector.shape_cast %32 : vector<1x1x64xf32> to vector<1x64xf32>
    %c1_51 = arith.constant 1 : index
    %c0_52 = arith.constant 0 : index
    %c0_53 = arith.constant 0 : index
    %34 = vector.load %arg10[%c1_51, %c0_52, %c0_53] : memref<4x1x64xf32, #tpu.memory_space<vmem>>, vector<1x1x64xf32>
    %35 = vector.shape_cast %34 : vector<1x1x64xf32> to vector<1x64xf32>
    %c2_54 = arith.constant 2 : index
    %c0_55 = arith.constant 0 : index
    %c0_56 = arith.constant 0 : index
    %36 = vector.load %arg10[%c2_54, %c0_55, %c0_56] : memref<4x1x64xf32, #tpu.memory_space<vmem>>, vector<1x1x64xf32>
    %37 = vector.shape_cast %36 : vector<1x1x64xf32> to vector<1x64xf32>
    %c3_57 = arith.constant 3 : index
    %c0_58 = arith.constant 0 : index
    %c0_59 = arith.constant 0 : index
    %38 = vector.load %arg10[%c3_57, %c0_58, %c0_59] : memref<4x1x64xf32, #tpu.memory_space<vmem>>, vector<1x1x64xf32>
    %39 = vector.shape_cast %38 : vector<1x1x64xf32> to vector<1x64xf32>
    %c0_60 = arith.constant 0 : index
    %c0_61 = arith.constant 0 : index
    %c0_62 = arith.constant 0 : index
    %40 = vector.load %arg13[%c0_60, %c0_61, %c0_62] : memref<4x1x64xf32, #tpu.memory_space<vmem>>, vector<1x1x64xf32>
    %41 = vector.shape_cast %40 : vector<1x1x64xf32> to vector<1x64xf32>
    %c1_63 = arith.constant 1 : index
    %c0_64 = arith.constant 0 : index
    %c0_65 = arith.constant 0 : index
    %42 = vector.load %arg13[%c1_63, %c0_64, %c0_65] : memref<4x1x64xf32, #tpu.memory_space<vmem>>, vector<1x1x64xf32>
    %43 = vector.shape_cast %42 : vector<1x1x64xf32> to vector<1x64xf32>
    %c2_66 = arith.constant 2 : index
    %c0_67 = arith.constant 0 : index
    %c0_68 = arith.constant 0 : index
    %44 = vector.load %arg13[%c2_66, %c0_67, %c0_68] : memref<4x1x64xf32, #tpu.memory_space<vmem>>, vector<1x1x64xf32>
    %45 = vector.shape_cast %44 : vector<1x1x64xf32> to vector<1x64xf32>
    %c3_69 = arith.constant 3 : index
    %c0_70 = arith.constant 0 : index
    %c0_71 = arith.constant 0 : index
    %46 = vector.load %arg13[%c3_69, %c0_70, %c0_71] : memref<4x1x64xf32, #tpu.memory_space<vmem>>, vector<1x1x64xf32>
    %47 = vector.shape_cast %46 : vector<1x1x64xf32> to vector<1x64xf32>
    %c0_72 = arith.constant 0 : index
    %c0_73 = arith.constant 0 : index
    %c0_74 = arith.constant 0 : index
    %48 = vector.load %arg14[%c0_72, %c0_73, %c0_74] : memref<4x1x64xf32, #tpu.memory_space<vmem>>, vector<1x1x64xf32>
    %49 = vector.shape_cast %48 : vector<1x1x64xf32> to vector<1x64xf32>
    %c1_75 = arith.constant 1 : index
    %c0_76 = arith.constant 0 : index
    %c0_77 = arith.constant 0 : index
    %50 = vector.load %arg14[%c1_75, %c0_76, %c0_77] : memref<4x1x64xf32, #tpu.memory_space<vmem>>, vector<1x1x64xf32>
    %51 = vector.shape_cast %50 : vector<1x1x64xf32> to vector<1x64xf32>
    %c2_78 = arith.constant 2 : index
    %c0_79 = arith.constant 0 : index
    %c0_80 = arith.constant 0 : index
    %52 = vector.load %arg14[%c2_78, %c0_79, %c0_80] : memref<4x1x64xf32, #tpu.memory_space<vmem>>, vector<1x1x64xf32>
    %53 = vector.shape_cast %52 : vector<1x1x64xf32> to vector<1x64xf32>
    %c3_81 = arith.constant 3 : index
    %c0_82 = arith.constant 0 : index
    %c0_83 = arith.constant 0 : index
    %54 = vector.load %arg14[%c3_81, %c0_82, %c0_83] : memref<4x1x64xf32, #tpu.memory_space<vmem>>, vector<1x1x64xf32>
    %55 = vector.shape_cast %54 : vector<1x1x64xf32> to vector<1x64xf32>
    %c0_84 = arith.constant 0 : index
    %c0_85 = arith.constant 0 : index
    %c0_86 = arith.constant 0 : index
    %56 = vector.load %arg15[%c0_84, %c0_85, %c0_86] : memref<4x64x64xbf16, #tpu.memory_space<vmem>>, vector<1x64x64xbf16>
    %57 = vector.shape_cast %56 : vector<1x64x64xbf16> to vector<64x64xbf16>
    %c1_87 = arith.constant 1 : index
    %c0_88 = arith.constant 0 : index
    %c0_89 = arith.constant 0 : index
    %58 = vector.load %arg15[%c1_87, %c0_88, %c0_89] : memref<4x64x64xbf16, #tpu.memory_space<vmem>>, vector<1x64x64xbf16>
    %59 = vector.shape_cast %58 : vector<1x64x64xbf16> to vector<64x64xbf16>
    %c2_90 = arith.constant 2 : index
    %c0_91 = arith.constant 0 : index
    %c0_92 = arith.constant 0 : index
    %60 = vector.load %arg15[%c2_90, %c0_91, %c0_92] : memref<4x64x64xbf16, #tpu.memory_space<vmem>>, vector<1x64x64xbf16>
    %61 = vector.shape_cast %60 : vector<1x64x64xbf16> to vector<64x64xbf16>
    %c3_93 = arith.constant 3 : index
    %c0_94 = arith.constant 0 : index
    %c0_95 = arith.constant 0 : index
    %62 = vector.load %arg15[%c3_93, %c0_94, %c0_95] : memref<4x64x64xbf16, #tpu.memory_space<vmem>>, vector<1x64x64xbf16>
    %63 = vector.shape_cast %62 : vector<1x64x64xbf16> to vector<64x64xbf16>
    %c0_96 = arith.constant 0 : index
    %c0_97 = arith.constant 0 : index
    %c0_98 = arith.constant 0 : index
    %64 = vector.load %arg16[%c0_96, %c0_97, %c0_98] : memref<4x1x64xf32, #tpu.memory_space<vmem>>, vector<1x1x64xf32>
    %65 = vector.shape_cast %64 : vector<1x1x64xf32> to vector<1x64xf32>
    %c1_99 = arith.constant 1 : index
    %c0_100 = arith.constant 0 : index
    %c0_101 = arith.constant 0 : index
    %66 = vector.load %arg16[%c1_99, %c0_100, %c0_101] : memref<4x1x64xf32, #tpu.memory_space<vmem>>, vector<1x1x64xf32>
    %67 = vector.shape_cast %66 : vector<1x1x64xf32> to vector<1x64xf32>
    %c2_102 = arith.constant 2 : index
    %c0_103 = arith.constant 0 : index
    %c0_104 = arith.constant 0 : index
    %68 = vector.load %arg16[%c2_102, %c0_103, %c0_104] : memref<4x1x64xf32, #tpu.memory_space<vmem>>, vector<1x1x64xf32>
    %69 = vector.shape_cast %68 : vector<1x1x64xf32> to vector<1x64xf32>
    %c3_105 = arith.constant 3 : index
    %c0_106 = arith.constant 0 : index
    %c0_107 = arith.constant 0 : index
    %70 = vector.load %arg16[%c3_105, %c0_106, %c0_107] : memref<4x1x64xf32, #tpu.memory_space<vmem>>, vector<1x1x64xf32>
    %71 = vector.shape_cast %70 : vector<1x1x64xf32> to vector<1x64xf32>
    %c0_108 = arith.constant 0 : index
    %c0_109 = arith.constant 0 : index
    %72 = vector.load %arg1[%c0_108, %c0_109] : memref<16x2xf32, #tpu.memory_space<vmem>>, vector<16x2xf32>
    %c0_110 = arith.constant 0 : index
    %c0_111 = arith.constant 0 : index
    %73 = vector.load %arg2[%c0_110, %c0_111] : memref<16x1xf32, #tpu.memory_space<vmem>>, vector<16x1xf32>
    %74 = vector.extract_strided_slice %72 {offsets = [0, 0], sizes = [8, 2], strides = [1, 1]} : vector<16x2xf32> to vector<8x2xf32>
    %75 = vector.extract_strided_slice %73 {offsets = [0, 0], sizes = [8, 1], strides = [1, 1]} : vector<16x1xf32> to vector<8x1xf32>
    %76 = vector.broadcast %75 : vector<8x1xf32> to vector<8x64xf32>
    %77 = vector.broadcast %0 : vector<1x64xf32> to vector<8x64xf32>
    %78 = arith.mulf %76, %77 : vector<8x64xf32>
    %79 = vector.broadcast %1 : vector<1x64xf32> to vector<8x64xf32>
    %80 = arith.addf %78, %79 : vector<8x64xf32>
    %81 = math.sin %80 : vector<8x64xf32>
    %82 = arith.truncf %81 : vector<8x64xf32> to vector<8x64xbf16>
    %cst = arith.constant dense<0.000000e+00> : vector<8x1024xf32>
    %83 = tpu.matmul %82, %4, %cst {dimension_numbers = #tpu.dot_dimension_numbers<[1], [0], [0], [1], [0, 0, 1, 1], [], []>} : vector<8x64xbf16>, vector<64x1024xbf16>, vector<8x1024xf32> -> vector<8x1024xf32>
    %84 = vector.broadcast %5 : vector<1x1024xf32> to vector<8x1024xf32>
    %85 = arith.addf %83, %84 : vector<8x1024xf32>
    %cst_112 = arith.constant 0.000000e+00 : f32
    %86 = vector.broadcast %cst_112 : f32 to vector<8x64xf32>
    %87 = vector.broadcast %3 : vector<1x64xf32> to vector<8x64xf32>
    %88 = arith.addf %86, %87 : vector<8x64xf32>
    %89 = vector.extract_strided_slice %74 {offsets = [0, 0], sizes = [8, 1], strides = [1, 1]} : vector<8x2xf32> to vector<8x1xf32>
    %90 = vector.extract_strided_slice %2 {offsets = [0, 0], sizes = [1, 64], strides = [1, 1]} : vector<2x64xf32> to vector<1x64xf32>
    %91 = vector.broadcast %89 : vector<8x1xf32> to vector<8x64xf32>
    %92 = vector.broadcast %90 : vector<1x64xf32> to vector<8x64xf32>
    %93 = arith.mulf %91, %92 : vector<8x64xf32>
    %94 = arith.addf %88, %93 : vector<8x64xf32>
    %95 = vector.extract_strided_slice %74 {offsets = [0, 1], sizes = [8, 1], strides = [1, 1]} : vector<8x2xf32> to vector<8x1xf32>
    %96 = vector.extract_strided_slice %2 {offsets = [1, 0], sizes = [1, 64], strides = [1, 1]} : vector<2x64xf32> to vector<1x64xf32>
    %97 = vector.broadcast %95 : vector<8x1xf32> to vector<8x64xf32>
    %98 = vector.broadcast %96 : vector<1x64xf32> to vector<8x64xf32>
    %99 = arith.mulf %97, %98 : vector<8x64xf32>
    %100 = arith.addf %94, %99 : vector<8x64xf32>
    %cst_113 = arith.constant dense<0.000000e+00> : vector<8xf32>
    %101 = vector.multi_reduction <add>, %100, %cst_113 [1] : vector<8x64xf32> to vector<8xf32>
    %102 = vector.shape_cast %101 : vector<8xf32> to vector<8x1xf32>
    %103 = arith.mulf %100, %100 : vector<8x64xf32>
    %cst_114 = arith.constant dense<0.000000e+00> : vector<8xf32>
    %104 = vector.multi_reduction <add>, %103, %cst_114 [1] : vector<8x64xf32> to vector<8xf32>
    %105 = vector.shape_cast %104 : vector<8xf32> to vector<8x1xf32>
    %cst_115 = arith.constant 1.562500e-02 : f32
    %106 = vector.broadcast %cst_115 : f32 to vector<8x1xf32>
    %107 = arith.mulf %102, %106 : vector<8x1xf32>
    %cst_116 = arith.constant 1.562500e-02 : f32
    %108 = vector.broadcast %cst_116 : f32 to vector<8x1xf32>
    %109 = arith.mulf %105, %108 : vector<8x1xf32>
    %110 = arith.mulf %107, %107 : vector<8x1xf32>
    %111 = arith.subf %109, %110 : vector<8x1xf32>
    %112 = vector.broadcast %107 : vector<8x1xf32> to vector<8x64xf32>
    %113 = arith.subf %100, %112 : vector<8x64xf32>
    %cst_117 = arith.constant 9.99999974E-6 : f32
    %114 = vector.broadcast %cst_117 : f32 to vector<8x1xf32>
    %115 = arith.addf %111, %114 : vector<8x1xf32>
    %116 = math.rsqrt %115 : vector<8x1xf32>
    %117 = vector.broadcast %116 : vector<8x1xf32> to vector<8x64xf32>
    %118 = arith.mulf %113, %117 : vector<8x64xf32>
    %119 = vector.broadcast %9 : vector<1x64xf32> to vector<8x64xf32>
    %120 = arith.mulf %118, %119 : vector<8x64xf32>
    %121 = vector.broadcast %17 : vector<1x64xf32> to vector<8x64xf32>
    %122 = arith.addf %120, %121 : vector<8x64xf32>
    %cst_118 = arith.constant 5.000000e-01 : f32
    %123 = vector.broadcast %cst_118 : f32 to vector<8x64xf32>
    %124 = arith.mulf %123, %122 : vector<8x64xf32>
    %cst_119 = arith.constant 5.000000e-01 : f32
    %125 = vector.broadcast %cst_119 : f32 to vector<8x64xf32>
    %126 = arith.mulf %125, %122 : vector<8x64xf32>
    %127 = math.tanh %126 : vector<8x64xf32>
    %cst_120 = arith.constant 1.000000e+00 : f32
    %128 = vector.broadcast %cst_120 : f32 to vector<8x64xf32>
    %129 = arith.addf %127, %128 : vector<8x64xf32>
    %130 = arith.mulf %124, %129 : vector<8x64xf32>
    %131 = arith.truncf %130 : vector<8x64xf32> to vector<8x64xbf16>
    %cst_121 = arith.constant dense<0.000000e+00> : vector<8x64xf32>
    %132 = tpu.matmul %131, %25, %cst_121 {dimension_numbers = #tpu.dot_dimension_numbers<[1], [0], [0], [1], [0, 0, 1, 1], [], []>} : vector<8x64xbf16>, vector<64x64xbf16>, vector<8x64xf32> -> vector<8x64xf32>
    %133 = vector.broadcast %33 : vector<1x64xf32> to vector<8x64xf32>
    %134 = arith.addf %132, %133 : vector<8x64xf32>
    %135 = vector.extract_strided_slice %85 {offsets = [0, 0], sizes = [8, 64], strides = [1, 1]} : vector<8x1024xf32> to vector<8x64xf32>
    %136 = vector.extract_strided_slice %85 {offsets = [0, 128], sizes = [8, 64], strides = [1, 1]} : vector<8x1024xf32> to vector<8x64xf32>
    %cst_122 = arith.constant dense<0.000000e+00> : vector<8xf32>
    %137 = vector.multi_reduction <add>, %134, %cst_122 [1] : vector<8x64xf32> to vector<8xf32>
    %138 = vector.shape_cast %137 : vector<8xf32> to vector<8x1xf32>
    %139 = arith.mulf %134, %134 : vector<8x64xf32>
    %cst_123 = arith.constant dense<0.000000e+00> : vector<8xf32>
    %140 = vector.multi_reduction <add>, %139, %cst_123 [1] : vector<8x64xf32> to vector<8xf32>
    %141 = vector.shape_cast %140 : vector<8xf32> to vector<8x1xf32>
    %cst_124 = arith.constant 1.562500e-02 : f32
    %142 = vector.broadcast %cst_124 : f32 to vector<8x1xf32>
    %143 = arith.mulf %138, %142 : vector<8x1xf32>
    %cst_125 = arith.constant 1.562500e-02 : f32
    %144 = vector.broadcast %cst_125 : f32 to vector<8x1xf32>
    %145 = arith.mulf %141, %144 : vector<8x1xf32>
    %146 = arith.mulf %143, %143 : vector<8x1xf32>
    %147 = arith.subf %145, %146 : vector<8x1xf32>
    %148 = vector.broadcast %143 : vector<8x1xf32> to vector<8x64xf32>
    %149 = arith.subf %134, %148 : vector<8x64xf32>
    %cst_126 = arith.constant 9.99999974E-6 : f32
    %150 = vector.broadcast %cst_126 : f32 to vector<8x1xf32>
    %151 = arith.addf %147, %150 : vector<8x1xf32>
    %152 = math.rsqrt %151 : vector<8x1xf32>
    %153 = vector.broadcast %152 : vector<8x1xf32> to vector<8x64xf32>
    %154 = arith.mulf %149, %153 : vector<8x64xf32>
    %155 = vector.broadcast %41 : vector<1x64xf32> to vector<8x64xf32>
    %156 = arith.mulf %154, %155 : vector<8x64xf32>
    %157 = vector.broadcast %49 : vector<1x64xf32> to vector<8x64xf32>
    %158 = arith.addf %156, %157 : vector<8x64xf32>
    %159 = arith.mulf %158, %135 : vector<8x64xf32>
    %160 = arith.addf %136, %159 : vector<8x64xf32>
    %cst_127 = arith.constant 5.000000e-01 : f32
    %161 = vector.broadcast %cst_127 : f32 to vector<8x64xf32>
    %162 = arith.mulf %161, %160 : vector<8x64xf32>
    %cst_128 = arith.constant 5.000000e-01 : f32
    %163 = vector.broadcast %cst_128 : f32 to vector<8x64xf32>
    %164 = arith.mulf %163, %160 : vector<8x64xf32>
    %165 = math.tanh %164 : vector<8x64xf32>
    %cst_129 = arith.constant 1.000000e+00 : f32
    %166 = vector.broadcast %cst_129 : f32 to vector<8x64xf32>
    %167 = arith.addf %165, %166 : vector<8x64xf32>
    %168 = arith.mulf %162, %167 : vector<8x64xf32>
    %169 = arith.truncf %168 : vector<8x64xf32> to vector<8x64xbf16>
    %cst_130 = arith.constant dense<0.000000e+00> : vector<8x64xf32>
    %170 = tpu.matmul %169, %57, %cst_130 {dimension_numbers = #tpu.dot_dimension_numbers<[1], [0], [0], [1], [0, 0, 1, 1], [], []>} : vector<8x64xbf16>, vector<64x64xbf16>, vector<8x64xf32> -> vector<8x64xf32>
    %171 = vector.broadcast %65 : vector<1x64xf32> to vector<8x64xf32>
    %172 = arith.addf %170, %171 : vector<8x64xf32>
    %173 = arith.addf %172, %100 : vector<8x64xf32>
    %cst_131 = arith.constant dense<0.000000e+00> : vector<8xf32>
    %174 = vector.multi_reduction <add>, %173, %cst_131 [1] : vector<8x64xf32> to vector<8xf32>
    %175 = vector.shape_cast %174 : vector<8xf32> to vector<8x1xf32>
    %176 = arith.mulf %173, %173 : vector<8x64xf32>
    %cst_132 = arith.constant dense<0.000000e+00> : vector<8xf32>
    %177 = vector.multi_reduction <add>, %176, %cst_132 [1] : vector<8x64xf32> to vector<8xf32>
    %178 = vector.shape_cast %177 : vector<8xf32> to vector<8x1xf32>
    %cst_133 = arith.constant 1.562500e-02 : f32
    %179 = vector.broadcast %cst_133 : f32 to vector<8x1xf32>
    %180 = arith.mulf %175, %179 : vector<8x1xf32>
    %cst_134 = arith.constant 1.562500e-02 : f32
    %181 = vector.broadcast %cst_134 : f32 to vector<8x1xf32>
    %182 = arith.mulf %178, %181 : vector<8x1xf32>
    %183 = arith.mulf %180, %180 : vector<8x1xf32>
    %184 = arith.subf %182, %183 : vector<8x1xf32>
    %185 = vector.broadcast %180 : vector<8x1xf32> to vector<8x64xf32>
    %186 = arith.subf %173, %185 : vector<8x64xf32>
    %cst_135 = arith.constant 9.99999974E-6 : f32
    %187 = vector.broadcast %cst_135 : f32 to vector<8x1xf32>
    %188 = arith.addf %184, %187 : vector<8x1xf32>
    %189 = math.rsqrt %188 : vector<8x1xf32>
    %190 = vector.broadcast %189 : vector<8x1xf32> to vector<8x64xf32>
    %191 = arith.mulf %186, %190 : vector<8x64xf32>
    %192 = vector.broadcast %11 : vector<1x64xf32> to vector<8x64xf32>
    %193 = arith.mulf %191, %192 : vector<8x64xf32>
    %194 = vector.broadcast %19 : vector<1x64xf32> to vector<8x64xf32>
    %195 = arith.addf %193, %194 : vector<8x64xf32>
    %cst_136 = arith.constant 5.000000e-01 : f32
    %196 = vector.broadcast %cst_136 : f32 to vector<8x64xf32>
    %197 = arith.mulf %196, %195 : vector<8x64xf32>
    %cst_137 = arith.constant 5.000000e-01 : f32
    %198 = vector.broadcast %cst_137 : f32 to vector<8x64xf32>
    %199 = arith.mulf %198, %195 : vector<8x64xf32>
    %200 = math.tanh %199 : vector<8x64xf32>
    %cst_138 = arith.constant 1.000000e+00 : f32
    %201 = vector.broadcast %cst_138 : f32 to vector<8x64xf32>
    %202 = arith.addf %200, %201 : vector<8x64xf32>
    %203 = arith.mulf %197, %202 : vector<8x64xf32>
    %204 = arith.truncf %203 : vector<8x64xf32> to vector<8x64xbf16>
    %cst_139 = arith.constant dense<0.000000e+00> : vector<8x64xf32>
    %205 = tpu.matmul %204, %27, %cst_139 {dimension_numbers = #tpu.dot_dimension_numbers<[1], [0], [0], [1], [0, 0, 1, 1], [], []>} : vector<8x64xbf16>, vector<64x64xbf16>, vector<8x64xf32> -> vector<8x64xf32>
    %206 = vector.broadcast %35 : vector<1x64xf32> to vector<8x64xf32>
    %207 = arith.addf %205, %206 : vector<8x64xf32>
    %208 = vector.extract_strided_slice %85 {offsets = [0, 256], sizes = [8, 64], strides = [1, 1]} : vector<8x1024xf32> to vector<8x64xf32>
    %209 = vector.extract_strided_slice %85 {offsets = [0, 384], sizes = [8, 64], strides = [1, 1]} : vector<8x1024xf32> to vector<8x64xf32>
    %cst_140 = arith.constant dense<0.000000e+00> : vector<8xf32>
    %210 = vector.multi_reduction <add>, %207, %cst_140 [1] : vector<8x64xf32> to vector<8xf32>
    %211 = vector.shape_cast %210 : vector<8xf32> to vector<8x1xf32>
    %212 = arith.mulf %207, %207 : vector<8x64xf32>
    %cst_141 = arith.constant dense<0.000000e+00> : vector<8xf32>
    %213 = vector.multi_reduction <add>, %212, %cst_141 [1] : vector<8x64xf32> to vector<8xf32>
    %214 = vector.shape_cast %213 : vector<8xf32> to vector<8x1xf32>
    %cst_142 = arith.constant 1.562500e-02 : f32
    %215 = vector.broadcast %cst_142 : f32 to vector<8x1xf32>
    %216 = arith.mulf %211, %215 : vector<8x1xf32>
    %cst_143 = arith.constant 1.562500e-02 : f32
    %217 = vector.broadcast %cst_143 : f32 to vector<8x1xf32>
    %218 = arith.mulf %214, %217 : vector<8x1xf32>
    %219 = arith.mulf %216, %216 : vector<8x1xf32>
    %220 = arith.subf %218, %219 : vector<8x1xf32>
    %221 = vector.broadcast %216 : vector<8x1xf32> to vector<8x64xf32>
    %222 = arith.subf %207, %221 : vector<8x64xf32>
    %cst_144 = arith.constant 9.99999974E-6 : f32
    %223 = vector.broadcast %cst_144 : f32 to vector<8x1xf32>
    %224 = arith.addf %220, %223 : vector<8x1xf32>
    %225 = math.rsqrt %224 : vector<8x1xf32>
    %226 = vector.broadcast %225 : vector<8x1xf32> to vector<8x64xf32>
    %227 = arith.mulf %222, %226 : vector<8x64xf32>
    %228 = vector.broadcast %43 : vector<1x64xf32> to vector<8x64xf32>
    %229 = arith.mulf %227, %228 : vector<8x64xf32>
    %230 = vector.broadcast %51 : vector<1x64xf32> to vector<8x64xf32>
    %231 = arith.addf %229, %230 : vector<8x64xf32>
    %232 = arith.mulf %231, %208 : vector<8x64xf32>
    %233 = arith.addf %209, %232 : vector<8x64xf32>
    %cst_145 = arith.constant 5.000000e-01 : f32
    %234 = vector.broadcast %cst_145 : f32 to vector<8x64xf32>
    %235 = arith.mulf %234, %233 : vector<8x64xf32>
    %cst_146 = arith.constant 5.000000e-01 : f32
    %236 = vector.broadcast %cst_146 : f32 to vector<8x64xf32>
    %237 = arith.mulf %236, %233 : vector<8x64xf32>
    %238 = math.tanh %237 : vector<8x64xf32>
    %cst_147 = arith.constant 1.000000e+00 : f32
    %239 = vector.broadcast %cst_147 : f32 to vector<8x64xf32>
    %240 = arith.addf %238, %239 : vector<8x64xf32>
    %241 = arith.mulf %235, %240 : vector<8x64xf32>
    %242 = arith.truncf %241 : vector<8x64xf32> to vector<8x64xbf16>
    %cst_148 = arith.constant dense<0.000000e+00> : vector<8x64xf32>
    %243 = tpu.matmul %242, %59, %cst_148 {dimension_numbers = #tpu.dot_dimension_numbers<[1], [0], [0], [1], [0, 0, 1, 1], [], []>} : vector<8x64xbf16>, vector<64x64xbf16>, vector<8x64xf32> -> vector<8x64xf32>
    %244 = vector.broadcast %67 : vector<1x64xf32> to vector<8x64xf32>
    %245 = arith.addf %243, %244 : vector<8x64xf32>
    %246 = arith.addf %245, %173 : vector<8x64xf32>
    %cst_149 = arith.constant dense<0.000000e+00> : vector<8xf32>
    %247 = vector.multi_reduction <add>, %246, %cst_149 [1] : vector<8x64xf32> to vector<8xf32>
    %248 = vector.shape_cast %247 : vector<8xf32> to vector<8x1xf32>
    %249 = arith.mulf %246, %246 : vector<8x64xf32>
    %cst_150 = arith.constant dense<0.000000e+00> : vector<8xf32>
    %250 = vector.multi_reduction <add>, %249, %cst_150 [1] : vector<8x64xf32> to vector<8xf32>
    %251 = vector.shape_cast %250 : vector<8xf32> to vector<8x1xf32>
    %cst_151 = arith.constant 1.562500e-02 : f32
    %252 = vector.broadcast %cst_151 : f32 to vector<8x1xf32>
    %253 = arith.mulf %248, %252 : vector<8x1xf32>
    %cst_152 = arith.constant 1.562500e-02 : f32
    %254 = vector.broadcast %cst_152 : f32 to vector<8x1xf32>
    %255 = arith.mulf %251, %254 : vector<8x1xf32>
    %256 = arith.mulf %253, %253 : vector<8x1xf32>
    %257 = arith.subf %255, %256 : vector<8x1xf32>
    %258 = vector.broadcast %253 : vector<8x1xf32> to vector<8x64xf32>
    %259 = arith.subf %246, %258 : vector<8x64xf32>
    %cst_153 = arith.constant 9.99999974E-6 : f32
    %260 = vector.broadcast %cst_153 : f32 to vector<8x1xf32>
    %261 = arith.addf %257, %260 : vector<8x1xf32>
    %262 = math.rsqrt %261 : vector<8x1xf32>
    %263 = vector.broadcast %262 : vector<8x1xf32> to vector<8x64xf32>
    %264 = arith.mulf %259, %263 : vector<8x64xf32>
    %265 = vector.broadcast %13 : vector<1x64xf32> to vector<8x64xf32>
    %266 = arith.mulf %264, %265 : vector<8x64xf32>
    %267 = vector.broadcast %21 : vector<1x64xf32> to vector<8x64xf32>
    %268 = arith.addf %266, %267 : vector<8x64xf32>
    %cst_154 = arith.constant 5.000000e-01 : f32
    %269 = vector.broadcast %cst_154 : f32 to vector<8x64xf32>
    %270 = arith.mulf %269, %268 : vector<8x64xf32>
    %cst_155 = arith.constant 5.000000e-01 : f32
    %271 = vector.broadcast %cst_155 : f32 to vector<8x64xf32>
    %272 = arith.mulf %271, %268 : vector<8x64xf32>
    %273 = math.tanh %272 : vector<8x64xf32>
    %cst_156 = arith.constant 1.000000e+00 : f32
    %274 = vector.broadcast %cst_156 : f32 to vector<8x64xf32>
    %275 = arith.addf %273, %274 : vector<8x64xf32>
    %276 = arith.mulf %270, %275 : vector<8x64xf32>
    %277 = arith.truncf %276 : vector<8x64xf32> to vector<8x64xbf16>
    %cst_157 = arith.constant dense<0.000000e+00> : vector<8x64xf32>
    %278 = tpu.matmul %277, %29, %cst_157 {dimension_numbers = #tpu.dot_dimension_numbers<[1], [0], [0], [1], [0, 0, 1, 1], [], []>} : vector<8x64xbf16>, vector<64x64xbf16>, vector<8x64xf32> -> vector<8x64xf32>
    %279 = vector.broadcast %37 : vector<1x64xf32> to vector<8x64xf32>
    %280 = arith.addf %278, %279 : vector<8x64xf32>
    %281 = vector.extract_strided_slice %85 {offsets = [0, 512], sizes = [8, 64], strides = [1, 1]} : vector<8x1024xf32> to vector<8x64xf32>
    %282 = vector.extract_strided_slice %85 {offsets = [0, 640], sizes = [8, 64], strides = [1, 1]} : vector<8x1024xf32> to vector<8x64xf32>
    %cst_158 = arith.constant dense<0.000000e+00> : vector<8xf32>
    %283 = vector.multi_reduction <add>, %280, %cst_158 [1] : vector<8x64xf32> to vector<8xf32>
    %284 = vector.shape_cast %283 : vector<8xf32> to vector<8x1xf32>
    %285 = arith.mulf %280, %280 : vector<8x64xf32>
    %cst_159 = arith.constant dense<0.000000e+00> : vector<8xf32>
    %286 = vector.multi_reduction <add>, %285, %cst_159 [1] : vector<8x64xf32> to vector<8xf32>
    %287 = vector.shape_cast %286 : vector<8xf32> to vector<8x1xf32>
    %cst_160 = arith.constant 1.562500e-02 : f32
    %288 = vector.broadcast %cst_160 : f32 to vector<8x1xf32>
    %289 = arith.mulf %284, %288 : vector<8x1xf32>
    %cst_161 = arith.constant 1.562500e-02 : f32
    %290 = vector.broadcast %cst_161 : f32 to vector<8x1xf32>
    %291 = arith.mulf %287, %290 : vector<8x1xf32>
    %292 = arith.mulf %289, %289 : vector<8x1xf32>
    %293 = arith.subf %291, %292 : vector<8x1xf32>
    %294 = vector.broadcast %289 : vector<8x1xf32> to vector<8x64xf32>
    %295 = arith.subf %280, %294 : vector<8x64xf32>
    %cst_162 = arith.constant 9.99999974E-6 : f32
    %296 = vector.broadcast %cst_162 : f32 to vector<8x1xf32>
    %297 = arith.addf %293, %296 : vector<8x1xf32>
    %298 = math.rsqrt %297 : vector<8x1xf32>
    %299 = vector.broadcast %298 : vector<8x1xf32> to vector<8x64xf32>
    %300 = arith.mulf %295, %299 : vector<8x64xf32>
    %301 = vector.broadcast %45 : vector<1x64xf32> to vector<8x64xf32>
    %302 = arith.mulf %300, %301 : vector<8x64xf32>
    %303 = vector.broadcast %53 : vector<1x64xf32> to vector<8x64xf32>
    %304 = arith.addf %302, %303 : vector<8x64xf32>
    %305 = arith.mulf %304, %281 : vector<8x64xf32>
    %306 = arith.addf %282, %305 : vector<8x64xf32>
    %cst_163 = arith.constant 5.000000e-01 : f32
    %307 = vector.broadcast %cst_163 : f32 to vector<8x64xf32>
    %308 = arith.mulf %307, %306 : vector<8x64xf32>
    %cst_164 = arith.constant 5.000000e-01 : f32
    %309 = vector.broadcast %cst_164 : f32 to vector<8x64xf32>
    %310 = arith.mulf %309, %306 : vector<8x64xf32>
    %311 = math.tanh %310 : vector<8x64xf32>
    %cst_165 = arith.constant 1.000000e+00 : f32
    %312 = vector.broadcast %cst_165 : f32 to vector<8x64xf32>
    %313 = arith.addf %311, %312 : vector<8x64xf32>
    %314 = arith.mulf %308, %313 : vector<8x64xf32>
    %315 = arith.truncf %314 : vector<8x64xf32> to vector<8x64xbf16>
    %cst_166 = arith.constant dense<0.000000e+00> : vector<8x64xf32>
    %316 = tpu.matmul %315, %61, %cst_166 {dimension_numbers = #tpu.dot_dimension_numbers<[1], [0], [0], [1], [0, 0, 1, 1], [], []>} : vector<8x64xbf16>, vector<64x64xbf16>, vector<8x64xf32> -> vector<8x64xf32>
    %317 = vector.broadcast %69 : vector<1x64xf32> to vector<8x64xf32>
    %318 = arith.addf %316, %317 : vector<8x64xf32>
    %319 = arith.addf %318, %246 : vector<8x64xf32>
    %cst_167 = arith.constant dense<0.000000e+00> : vector<8xf32>
    %320 = vector.multi_reduction <add>, %319, %cst_167 [1] : vector<8x64xf32> to vector<8xf32>
    %321 = vector.shape_cast %320 : vector<8xf32> to vector<8x1xf32>
    %322 = arith.mulf %319, %319 : vector<8x64xf32>
    %cst_168 = arith.constant dense<0.000000e+00> : vector<8xf32>
    %323 = vector.multi_reduction <add>, %322, %cst_168 [1] : vector<8x64xf32> to vector<8xf32>
    %324 = vector.shape_cast %323 : vector<8xf32> to vector<8x1xf32>
    %cst_169 = arith.constant 1.562500e-02 : f32
    %325 = vector.broadcast %cst_169 : f32 to vector<8x1xf32>
    %326 = arith.mulf %321, %325 : vector<8x1xf32>
    %cst_170 = arith.constant 1.562500e-02 : f32
    %327 = vector.broadcast %cst_170 : f32 to vector<8x1xf32>
    %328 = arith.mulf %324, %327 : vector<8x1xf32>
    %329 = arith.mulf %326, %326 : vector<8x1xf32>
    %330 = arith.subf %328, %329 : vector<8x1xf32>
    %331 = vector.broadcast %326 : vector<8x1xf32> to vector<8x64xf32>
    %332 = arith.subf %319, %331 : vector<8x64xf32>
    %cst_171 = arith.constant 9.99999974E-6 : f32
    %333 = vector.broadcast %cst_171 : f32 to vector<8x1xf32>
    %334 = arith.addf %330, %333 : vector<8x1xf32>
    %335 = math.rsqrt %334 : vector<8x1xf32>
    %336 = vector.broadcast %335 : vector<8x1xf32> to vector<8x64xf32>
    %337 = arith.mulf %332, %336 : vector<8x64xf32>
    %338 = vector.broadcast %15 : vector<1x64xf32> to vector<8x64xf32>
    %339 = arith.mulf %337, %338 : vector<8x64xf32>
    %340 = vector.broadcast %23 : vector<1x64xf32> to vector<8x64xf32>
    %341 = arith.addf %339, %340 : vector<8x64xf32>
    %cst_172 = arith.constant 5.000000e-01 : f32
    %342 = vector.broadcast %cst_172 : f32 to vector<8x64xf32>
    %343 = arith.mulf %342, %341 : vector<8x64xf32>
    %cst_173 = arith.constant 5.000000e-01 : f32
    %344 = vector.broadcast %cst_173 : f32 to vector<8x64xf32>
    %345 = arith.mulf %344, %341 : vector<8x64xf32>
    %346 = math.tanh %345 : vector<8x64xf32>
    %cst_174 = arith.constant 1.000000e+00 : f32
    %347 = vector.broadcast %cst_174 : f32 to vector<8x64xf32>
    %348 = arith.addf %346, %347 : vector<8x64xf32>
    %349 = arith.mulf %343, %348 : vector<8x64xf32>
    %350 = arith.truncf %349 : vector<8x64xf32> to vector<8x64xbf16>
    %cst_175 = arith.constant dense<0.000000e+00> : vector<8x64xf32>
    %351 = tpu.matmul %350, %31, %cst_175 {dimension_numbers = #tpu.dot_dimension_numbers<[1], [0], [0], [1], [0, 0, 1, 1], [], []>} : vector<8x64xbf16>, vector<64x64xbf16>, vector<8x64xf32> -> vector<8x64xf32>
    %352 = vector.broadcast %39 : vector<1x64xf32> to vector<8x64xf32>
    %353 = arith.addf %351, %352 : vector<8x64xf32>
    %354 = vector.extract_strided_slice %85 {offsets = [0, 768], sizes = [8, 64], strides = [1, 1]} : vector<8x1024xf32> to vector<8x64xf32>
    %355 = vector.extract_strided_slice %85 {offsets = [0, 896], sizes = [8, 64], strides = [1, 1]} : vector<8x1024xf32> to vector<8x64xf32>
    %cst_176 = arith.constant dense<0.000000e+00> : vector<8xf32>
    %356 = vector.multi_reduction <add>, %353, %cst_176 [1] : vector<8x64xf32> to vector<8xf32>
    %357 = vector.shape_cast %356 : vector<8xf32> to vector<8x1xf32>
    %358 = arith.mulf %353, %353 : vector<8x64xf32>
    %cst_177 = arith.constant dense<0.000000e+00> : vector<8xf32>
    %359 = vector.multi_reduction <add>, %358, %cst_177 [1] : vector<8x64xf32> to vector<8xf32>
    %360 = vector.shape_cast %359 : vector<8xf32> to vector<8x1xf32>
    %cst_178 = arith.constant 1.562500e-02 : f32
    %361 = vector.broadcast %cst_178 : f32 to vector<8x1xf32>
    %362 = arith.mulf %357, %361 : vector<8x1xf32>
    %cst_179 = arith.constant 1.562500e-02 : f32
    %363 = vector.broadcast %cst_179 : f32 to vector<8x1xf32>
    %364 = arith.mulf %360, %363 : vector<8x1xf32>
    %365 = arith.mulf %362, %362 : vector<8x1xf32>
    %366 = arith.subf %364, %365 : vector<8x1xf32>
    %367 = vector.broadcast %362 : vector<8x1xf32> to vector<8x64xf32>
    %368 = arith.subf %353, %367 : vector<8x64xf32>
    %cst_180 = arith.constant 9.99999974E-6 : f32
    %369 = vector.broadcast %cst_180 : f32 to vector<8x1xf32>
    %370 = arith.addf %366, %369 : vector<8x1xf32>
    %371 = math.rsqrt %370 : vector<8x1xf32>
    %372 = vector.broadcast %371 : vector<8x1xf32> to vector<8x64xf32>
    %373 = arith.mulf %368, %372 : vector<8x64xf32>
    %374 = vector.broadcast %47 : vector<1x64xf32> to vector<8x64xf32>
    %375 = arith.mulf %373, %374 : vector<8x64xf32>
    %376 = vector.broadcast %55 : vector<1x64xf32> to vector<8x64xf32>
    %377 = arith.addf %375, %376 : vector<8x64xf32>
    %378 = arith.mulf %377, %354 : vector<8x64xf32>
    %379 = arith.addf %355, %378 : vector<8x64xf32>
    %cst_181 = arith.constant 5.000000e-01 : f32
    %380 = vector.broadcast %cst_181 : f32 to vector<8x64xf32>
    %381 = arith.mulf %380, %379 : vector<8x64xf32>
    %cst_182 = arith.constant 5.000000e-01 : f32
    %382 = vector.broadcast %cst_182 : f32 to vector<8x64xf32>
    %383 = arith.mulf %382, %379 : vector<8x64xf32>
    %384 = math.tanh %383 : vector<8x64xf32>
    %cst_183 = arith.constant 1.000000e+00 : f32
    %385 = vector.broadcast %cst_183 : f32 to vector<8x64xf32>
    %386 = arith.addf %384, %385 : vector<8x64xf32>
    %387 = arith.mulf %381, %386 : vector<8x64xf32>
    %388 = arith.truncf %387 : vector<8x64xf32> to vector<8x64xbf16>
    %cst_184 = arith.constant dense<0.000000e+00> : vector<8x64xf32>
    %389 = tpu.matmul %388, %63, %cst_184 {dimension_numbers = #tpu.dot_dimension_numbers<[1], [0], [0], [1], [0, 0, 1, 1], [], []>} : vector<8x64xbf16>, vector<64x64xbf16>, vector<8x64xf32> -> vector<8x64xf32>
    %390 = vector.broadcast %71 : vector<1x64xf32> to vector<8x64xf32>
    %391 = arith.addf %389, %390 : vector<8x64xf32>
    %392 = arith.addf %391, %319 : vector<8x64xf32>
    %393 = arith.truncf %392 : vector<8x64xf32> to vector<8x64xbf16>
    %cst_185 = arith.constant dense<0.000000e+00> : vector<8x128xf32>
    %394 = tpu.matmul %393, %6, %cst_185 {dimension_numbers = #tpu.dot_dimension_numbers<[1], [0], [0], [1], [0, 0, 1, 1], [], []>} : vector<8x64xbf16>, vector<64x128xbf16>, vector<8x128xf32> -> vector<8x128xf32>
    %395 = vector.broadcast %7 : vector<1x128xf32> to vector<8x128xf32>
    %396 = arith.addf %394, %395 : vector<8x128xf32>
    %397 = vector.extract_strided_slice %396 {offsets = [0, 0], sizes = [8, 2], strides = [1, 1]} : vector<8x128xf32> to vector<8x2xf32>
    %398 = vector.extract_strided_slice %72 {offsets = [8, 0], sizes = [8, 2], strides = [1, 1]} : vector<16x2xf32> to vector<8x2xf32>
    %399 = vector.extract_strided_slice %73 {offsets = [8, 0], sizes = [8, 1], strides = [1, 1]} : vector<16x1xf32> to vector<8x1xf32>
    %400 = vector.broadcast %399 : vector<8x1xf32> to vector<8x64xf32>
    %401 = vector.broadcast %0 : vector<1x64xf32> to vector<8x64xf32>
    %402 = arith.mulf %400, %401 : vector<8x64xf32>
    %403 = vector.broadcast %1 : vector<1x64xf32> to vector<8x64xf32>
    %404 = arith.addf %402, %403 : vector<8x64xf32>
    %405 = math.sin %404 : vector<8x64xf32>
    %406 = arith.truncf %405 : vector<8x64xf32> to vector<8x64xbf16>
    %cst_186 = arith.constant dense<0.000000e+00> : vector<8x1024xf32>
    %407 = tpu.matmul %406, %4, %cst_186 {dimension_numbers = #tpu.dot_dimension_numbers<[1], [0], [0], [1], [0, 0, 1, 1], [], []>} : vector<8x64xbf16>, vector<64x1024xbf16>, vector<8x1024xf32> -> vector<8x1024xf32>
    %408 = vector.broadcast %5 : vector<1x1024xf32> to vector<8x1024xf32>
    %409 = arith.addf %407, %408 : vector<8x1024xf32>
    %cst_187 = arith.constant 0.000000e+00 : f32
    %410 = vector.broadcast %cst_187 : f32 to vector<8x64xf32>
    %411 = vector.broadcast %3 : vector<1x64xf32> to vector<8x64xf32>
    %412 = arith.addf %410, %411 : vector<8x64xf32>
    %413 = vector.extract_strided_slice %398 {offsets = [0, 0], sizes = [8, 1], strides = [1, 1]} : vector<8x2xf32> to vector<8x1xf32>
    %414 = vector.extract_strided_slice %2 {offsets = [0, 0], sizes = [1, 64], strides = [1, 1]} : vector<2x64xf32> to vector<1x64xf32>
    %415 = vector.broadcast %413 : vector<8x1xf32> to vector<8x64xf32>
    %416 = vector.broadcast %414 : vector<1x64xf32> to vector<8x64xf32>
    %417 = arith.mulf %415, %416 : vector<8x64xf32>
    %418 = arith.addf %412, %417 : vector<8x64xf32>
    %419 = vector.extract_strided_slice %398 {offsets = [0, 1], sizes = [8, 1], strides = [1, 1]} : vector<8x2xf32> to vector<8x1xf32>
    %420 = vector.extract_strided_slice %2 {offsets = [1, 0], sizes = [1, 64], strides = [1, 1]} : vector<2x64xf32> to vector<1x64xf32>
    %421 = vector.broadcast %419 : vector<8x1xf32> to vector<8x64xf32>
    %422 = vector.broadcast %420 : vector<1x64xf32> to vector<8x64xf32>
    %423 = arith.mulf %421, %422 : vector<8x64xf32>
    %424 = arith.addf %418, %423 : vector<8x64xf32>
    %cst_188 = arith.constant dense<0.000000e+00> : vector<8xf32>
    %425 = vector.multi_reduction <add>, %424, %cst_188 [1] : vector<8x64xf32> to vector<8xf32>
    %426 = vector.shape_cast %425 : vector<8xf32> to vector<8x1xf32>
    %427 = arith.mulf %424, %424 : vector<8x64xf32>
    %cst_189 = arith.constant dense<0.000000e+00> : vector<8xf32>
    %428 = vector.multi_reduction <add>, %427, %cst_189 [1] : vector<8x64xf32> to vector<8xf32>
    %429 = vector.shape_cast %428 : vector<8xf32> to vector<8x1xf32>
    %cst_190 = arith.constant 1.562500e-02 : f32
    %430 = vector.broadcast %cst_190 : f32 to vector<8x1xf32>
    %431 = arith.mulf %426, %430 : vector<8x1xf32>
    %cst_191 = arith.constant 1.562500e-02 : f32
    %432 = vector.broadcast %cst_191 : f32 to vector<8x1xf32>
    %433 = arith.mulf %429, %432 : vector<8x1xf32>
    %434 = arith.mulf %431, %431 : vector<8x1xf32>
    %435 = arith.subf %433, %434 : vector<8x1xf32>
    %436 = vector.broadcast %431 : vector<8x1xf32> to vector<8x64xf32>
    %437 = arith.subf %424, %436 : vector<8x64xf32>
    %cst_192 = arith.constant 9.99999974E-6 : f32
    %438 = vector.broadcast %cst_192 : f32 to vector<8x1xf32>
    %439 = arith.addf %435, %438 : vector<8x1xf32>
    %440 = math.rsqrt %439 : vector<8x1xf32>
    %441 = vector.broadcast %440 : vector<8x1xf32> to vector<8x64xf32>
    %442 = arith.mulf %437, %441 : vector<8x64xf32>
    %443 = vector.broadcast %9 : vector<1x64xf32> to vector<8x64xf32>
    %444 = arith.mulf %442, %443 : vector<8x64xf32>
    %445 = vector.broadcast %17 : vector<1x64xf32> to vector<8x64xf32>
    %446 = arith.addf %444, %445 : vector<8x64xf32>
    %cst_193 = arith.constant 5.000000e-01 : f32
    %447 = vector.broadcast %cst_193 : f32 to vector<8x64xf32>
    %448 = arith.mulf %447, %446 : vector<8x64xf32>
    %cst_194 = arith.constant 5.000000e-01 : f32
    %449 = vector.broadcast %cst_194 : f32 to vector<8x64xf32>
    %450 = arith.mulf %449, %446 : vector<8x64xf32>
    %451 = math.tanh %450 : vector<8x64xf32>
    %cst_195 = arith.constant 1.000000e+00 : f32
    %452 = vector.broadcast %cst_195 : f32 to vector<8x64xf32>
    %453 = arith.addf %451, %452 : vector<8x64xf32>
    %454 = arith.mulf %448, %453 : vector<8x64xf32>
    %455 = arith.truncf %454 : vector<8x64xf32> to vector<8x64xbf16>
    %cst_196 = arith.constant dense<0.000000e+00> : vector<8x64xf32>
    %456 = tpu.matmul %455, %25, %cst_196 {dimension_numbers = #tpu.dot_dimension_numbers<[1], [0], [0], [1], [0, 0, 1, 1], [], []>} : vector<8x64xbf16>, vector<64x64xbf16>, vector<8x64xf32> -> vector<8x64xf32>
    %457 = vector.broadcast %33 : vector<1x64xf32> to vector<8x64xf32>
    %458 = arith.addf %456, %457 : vector<8x64xf32>
    %459 = vector.extract_strided_slice %409 {offsets = [0, 0], sizes = [8, 64], strides = [1, 1]} : vector<8x1024xf32> to vector<8x64xf32>
    %460 = vector.extract_strided_slice %409 {offsets = [0, 128], sizes = [8, 64], strides = [1, 1]} : vector<8x1024xf32> to vector<8x64xf32>
    %cst_197 = arith.constant dense<0.000000e+00> : vector<8xf32>
    %461 = vector.multi_reduction <add>, %458, %cst_197 [1] : vector<8x64xf32> to vector<8xf32>
    %462 = vector.shape_cast %461 : vector<8xf32> to vector<8x1xf32>
    %463 = arith.mulf %458, %458 : vector<8x64xf32>
    %cst_198 = arith.constant dense<0.000000e+00> : vector<8xf32>
    %464 = vector.multi_reduction <add>, %463, %cst_198 [1] : vector<8x64xf32> to vector<8xf32>
    %465 = vector.shape_cast %464 : vector<8xf32> to vector<8x1xf32>
    %cst_199 = arith.constant 1.562500e-02 : f32
    %466 = vector.broadcast %cst_199 : f32 to vector<8x1xf32>
    %467 = arith.mulf %462, %466 : vector<8x1xf32>
    %cst_200 = arith.constant 1.562500e-02 : f32
    %468 = vector.broadcast %cst_200 : f32 to vector<8x1xf32>
    %469 = arith.mulf %465, %468 : vector<8x1xf32>
    %470 = arith.mulf %467, %467 : vector<8x1xf32>
    %471 = arith.subf %469, %470 : vector<8x1xf32>
    %472 = vector.broadcast %467 : vector<8x1xf32> to vector<8x64xf32>
    %473 = arith.subf %458, %472 : vector<8x64xf32>
    %cst_201 = arith.constant 9.99999974E-6 : f32
    %474 = vector.broadcast %cst_201 : f32 to vector<8x1xf32>
    %475 = arith.addf %471, %474 : vector<8x1xf32>
    %476 = math.rsqrt %475 : vector<8x1xf32>
    %477 = vector.broadcast %476 : vector<8x1xf32> to vector<8x64xf32>
    %478 = arith.mulf %473, %477 : vector<8x64xf32>
    %479 = vector.broadcast %41 : vector<1x64xf32> to vector<8x64xf32>
    %480 = arith.mulf %478, %479 : vector<8x64xf32>
    %481 = vector.broadcast %49 : vector<1x64xf32> to vector<8x64xf32>
    %482 = arith.addf %480, %481 : vector<8x64xf32>
    %483 = arith.mulf %482, %459 : vector<8x64xf32>
    %484 = arith.addf %460, %483 : vector<8x64xf32>
    %cst_202 = arith.constant 5.000000e-01 : f32
    %485 = vector.broadcast %cst_202 : f32 to vector<8x64xf32>
    %486 = arith.mulf %485, %484 : vector<8x64xf32>
    %cst_203 = arith.constant 5.000000e-01 : f32
    %487 = vector.broadcast %cst_203 : f32 to vector<8x64xf32>
    %488 = arith.mulf %487, %484 : vector<8x64xf32>
    %489 = math.tanh %488 : vector<8x64xf32>
    %cst_204 = arith.constant 1.000000e+00 : f32
    %490 = vector.broadcast %cst_204 : f32 to vector<8x64xf32>
    %491 = arith.addf %489, %490 : vector<8x64xf32>
    %492 = arith.mulf %486, %491 : vector<8x64xf32>
    %493 = arith.truncf %492 : vector<8x64xf32> to vector<8x64xbf16>
    %cst_205 = arith.constant dense<0.000000e+00> : vector<8x64xf32>
    %494 = tpu.matmul %493, %57, %cst_205 {dimension_numbers = #tpu.dot_dimension_numbers<[1], [0], [0], [1], [0, 0, 1, 1], [], []>} : vector<8x64xbf16>, vector<64x64xbf16>, vector<8x64xf32> -> vector<8x64xf32>
    %495 = vector.broadcast %65 : vector<1x64xf32> to vector<8x64xf32>
    %496 = arith.addf %494, %495 : vector<8x64xf32>
    %497 = arith.addf %496, %424 : vector<8x64xf32>
    %cst_206 = arith.constant dense<0.000000e+00> : vector<8xf32>
    %498 = vector.multi_reduction <add>, %497, %cst_206 [1] : vector<8x64xf32> to vector<8xf32>
    %499 = vector.shape_cast %498 : vector<8xf32> to vector<8x1xf32>
    %500 = arith.mulf %497, %497 : vector<8x64xf32>
    %cst_207 = arith.constant dense<0.000000e+00> : vector<8xf32>
    %501 = vector.multi_reduction <add>, %500, %cst_207 [1] : vector<8x64xf32> to vector<8xf32>
    %502 = vector.shape_cast %501 : vector<8xf32> to vector<8x1xf32>
    %cst_208 = arith.constant 1.562500e-02 : f32
    %503 = vector.broadcast %cst_208 : f32 to vector<8x1xf32>
    %504 = arith.mulf %499, %503 : vector<8x1xf32>
    %cst_209 = arith.constant 1.562500e-02 : f32
    %505 = vector.broadcast %cst_209 : f32 to vector<8x1xf32>
    %506 = arith.mulf %502, %505 : vector<8x1xf32>
    %507 = arith.mulf %504, %504 : vector<8x1xf32>
    %508 = arith.subf %506, %507 : vector<8x1xf32>
    %509 = vector.broadcast %504 : vector<8x1xf32> to vector<8x64xf32>
    %510 = arith.subf %497, %509 : vector<8x64xf32>
    %cst_210 = arith.constant 9.99999974E-6 : f32
    %511 = vector.broadcast %cst_210 : f32 to vector<8x1xf32>
    %512 = arith.addf %508, %511 : vector<8x1xf32>
    %513 = math.rsqrt %512 : vector<8x1xf32>
    %514 = vector.broadcast %513 : vector<8x1xf32> to vector<8x64xf32>
    %515 = arith.mulf %510, %514 : vector<8x64xf32>
    %516 = vector.broadcast %11 : vector<1x64xf32> to vector<8x64xf32>
    %517 = arith.mulf %515, %516 : vector<8x64xf32>
    %518 = vector.broadcast %19 : vector<1x64xf32> to vector<8x64xf32>
    %519 = arith.addf %517, %518 : vector<8x64xf32>
    %cst_211 = arith.constant 5.000000e-01 : f32
    %520 = vector.broadcast %cst_211 : f32 to vector<8x64xf32>
    %521 = arith.mulf %520, %519 : vector<8x64xf32>
    %cst_212 = arith.constant 5.000000e-01 : f32
    %522 = vector.broadcast %cst_212 : f32 to vector<8x64xf32>
    %523 = arith.mulf %522, %519 : vector<8x64xf32>
    %524 = math.tanh %523 : vector<8x64xf32>
    %cst_213 = arith.constant 1.000000e+00 : f32
    %525 = vector.broadcast %cst_213 : f32 to vector<8x64xf32>
    %526 = arith.addf %524, %525 : vector<8x64xf32>
    %527 = arith.mulf %521, %526 : vector<8x64xf32>
    %528 = arith.truncf %527 : vector<8x64xf32> to vector<8x64xbf16>
    %cst_214 = arith.constant dense<0.000000e+00> : vector<8x64xf32>
    %529 = tpu.matmul %528, %27, %cst_214 {dimension_numbers = #tpu.dot_dimension_numbers<[1], [0], [0], [1], [0, 0, 1, 1], [], []>} : vector<8x64xbf16>, vector<64x64xbf16>, vector<8x64xf32> -> vector<8x64xf32>
    %530 = vector.broadcast %35 : vector<1x64xf32> to vector<8x64xf32>
    %531 = arith.addf %529, %530 : vector<8x64xf32>
    %532 = vector.extract_strided_slice %409 {offsets = [0, 256], sizes = [8, 64], strides = [1, 1]} : vector<8x1024xf32> to vector<8x64xf32>
    %533 = vector.extract_strided_slice %409 {offsets = [0, 384], sizes = [8, 64], strides = [1, 1]} : vector<8x1024xf32> to vector<8x64xf32>
    %cst_215 = arith.constant dense<0.000000e+00> : vector<8xf32>
    %534 = vector.multi_reduction <add>, %531, %cst_215 [1] : vector<8x64xf32> to vector<8xf32>
    %535 = vector.shape_cast %534 : vector<8xf32> to vector<8x1xf32>
    %536 = arith.mulf %531, %531 : vector<8x64xf32>
    %cst_216 = arith.constant dense<0.000000e+00> : vector<8xf32>
    %537 = vector.multi_reduction <add>, %536, %cst_216 [1] : vector<8x64xf32> to vector<8xf32>
    %538 = vector.shape_cast %537 : vector<8xf32> to vector<8x1xf32>
    %cst_217 = arith.constant 1.562500e-02 : f32
    %539 = vector.broadcast %cst_217 : f32 to vector<8x1xf32>
    %540 = arith.mulf %535, %539 : vector<8x1xf32>
    %cst_218 = arith.constant 1.562500e-02 : f32
    %541 = vector.broadcast %cst_218 : f32 to vector<8x1xf32>
    %542 = arith.mulf %538, %541 : vector<8x1xf32>
    %543 = arith.mulf %540, %540 : vector<8x1xf32>
    %544 = arith.subf %542, %543 : vector<8x1xf32>
    %545 = vector.broadcast %540 : vector<8x1xf32> to vector<8x64xf32>
    %546 = arith.subf %531, %545 : vector<8x64xf32>
    %cst_219 = arith.constant 9.99999974E-6 : f32
    %547 = vector.broadcast %cst_219 : f32 to vector<8x1xf32>
    %548 = arith.addf %544, %547 : vector<8x1xf32>
    %549 = math.rsqrt %548 : vector<8x1xf32>
    %550 = vector.broadcast %549 : vector<8x1xf32> to vector<8x64xf32>
    %551 = arith.mulf %546, %550 : vector<8x64xf32>
    %552 = vector.broadcast %43 : vector<1x64xf32> to vector<8x64xf32>
    %553 = arith.mulf %551, %552 : vector<8x64xf32>
    %554 = vector.broadcast %51 : vector<1x64xf32> to vector<8x64xf32>
    %555 = arith.addf %553, %554 : vector<8x64xf32>
    %556 = arith.mulf %555, %532 : vector<8x64xf32>
    %557 = arith.addf %533, %556 : vector<8x64xf32>
    %cst_220 = arith.constant 5.000000e-01 : f32
    %558 = vector.broadcast %cst_220 : f32 to vector<8x64xf32>
    %559 = arith.mulf %558, %557 : vector<8x64xf32>
    %cst_221 = arith.constant 5.000000e-01 : f32
    %560 = vector.broadcast %cst_221 : f32 to vector<8x64xf32>
    %561 = arith.mulf %560, %557 : vector<8x64xf32>
    %562 = math.tanh %561 : vector<8x64xf32>
    %cst_222 = arith.constant 1.000000e+00 : f32
    %563 = vector.broadcast %cst_222 : f32 to vector<8x64xf32>
    %564 = arith.addf %562, %563 : vector<8x64xf32>
    %565 = arith.mulf %559, %564 : vector<8x64xf32>
    %566 = arith.truncf %565 : vector<8x64xf32> to vector<8x64xbf16>
    %cst_223 = arith.constant dense<0.000000e+00> : vector<8x64xf32>
    %567 = tpu.matmul %566, %59, %cst_223 {dimension_numbers = #tpu.dot_dimension_numbers<[1], [0], [0], [1], [0, 0, 1, 1], [], []>} : vector<8x64xbf16>, vector<64x64xbf16>, vector<8x64xf32> -> vector<8x64xf32>
    %568 = vector.broadcast %67 : vector<1x64xf32> to vector<8x64xf32>
    %569 = arith.addf %567, %568 : vector<8x64xf32>
    %570 = arith.addf %569, %497 : vector<8x64xf32>
    %cst_224 = arith.constant dense<0.000000e+00> : vector<8xf32>
    %571 = vector.multi_reduction <add>, %570, %cst_224 [1] : vector<8x64xf32> to vector<8xf32>
    %572 = vector.shape_cast %571 : vector<8xf32> to vector<8x1xf32>
    %573 = arith.mulf %570, %570 : vector<8x64xf32>
    %cst_225 = arith.constant dense<0.000000e+00> : vector<8xf32>
    %574 = vector.multi_reduction <add>, %573, %cst_225 [1] : vector<8x64xf32> to vector<8xf32>
    %575 = vector.shape_cast %574 : vector<8xf32> to vector<8x1xf32>
    %cst_226 = arith.constant 1.562500e-02 : f32
    %576 = vector.broadcast %cst_226 : f32 to vector<8x1xf32>
    %577 = arith.mulf %572, %576 : vector<8x1xf32>
    %cst_227 = arith.constant 1.562500e-02 : f32
    %578 = vector.broadcast %cst_227 : f32 to vector<8x1xf32>
    %579 = arith.mulf %575, %578 : vector<8x1xf32>
    %580 = arith.mulf %577, %577 : vector<8x1xf32>
    %581 = arith.subf %579, %580 : vector<8x1xf32>
    %582 = vector.broadcast %577 : vector<8x1xf32> to vector<8x64xf32>
    %583 = arith.subf %570, %582 : vector<8x64xf32>
    %cst_228 = arith.constant 9.99999974E-6 : f32
    %584 = vector.broadcast %cst_228 : f32 to vector<8x1xf32>
    %585 = arith.addf %581, %584 : vector<8x1xf32>
    %586 = math.rsqrt %585 : vector<8x1xf32>
    %587 = vector.broadcast %586 : vector<8x1xf32> to vector<8x64xf32>
    %588 = arith.mulf %583, %587 : vector<8x64xf32>
    %589 = vector.broadcast %13 : vector<1x64xf32> to vector<8x64xf32>
    %590 = arith.mulf %588, %589 : vector<8x64xf32>
    %591 = vector.broadcast %21 : vector<1x64xf32> to vector<8x64xf32>
    %592 = arith.addf %590, %591 : vector<8x64xf32>
    %cst_229 = arith.constant 5.000000e-01 : f32
    %593 = vector.broadcast %cst_229 : f32 to vector<8x64xf32>
    %594 = arith.mulf %593, %592 : vector<8x64xf32>
    %cst_230 = arith.constant 5.000000e-01 : f32
    %595 = vector.broadcast %cst_230 : f32 to vector<8x64xf32>
    %596 = arith.mulf %595, %592 : vector<8x64xf32>
    %597 = math.tanh %596 : vector<8x64xf32>
    %cst_231 = arith.constant 1.000000e+00 : f32
    %598 = vector.broadcast %cst_231 : f32 to vector<8x64xf32>
    %599 = arith.addf %597, %598 : vector<8x64xf32>
    %600 = arith.mulf %594, %599 : vector<8x64xf32>
    %601 = arith.truncf %600 : vector<8x64xf32> to vector<8x64xbf16>
    %cst_232 = arith.constant dense<0.000000e+00> : vector<8x64xf32>
    %602 = tpu.matmul %601, %29, %cst_232 {dimension_numbers = #tpu.dot_dimension_numbers<[1], [0], [0], [1], [0, 0, 1, 1], [], []>} : vector<8x64xbf16>, vector<64x64xbf16>, vector<8x64xf32> -> vector<8x64xf32>
    %603 = vector.broadcast %37 : vector<1x64xf32> to vector<8x64xf32>
    %604 = arith.addf %602, %603 : vector<8x64xf32>
    %605 = vector.extract_strided_slice %409 {offsets = [0, 512], sizes = [8, 64], strides = [1, 1]} : vector<8x1024xf32> to vector<8x64xf32>
    %606 = vector.extract_strided_slice %409 {offsets = [0, 640], sizes = [8, 64], strides = [1, 1]} : vector<8x1024xf32> to vector<8x64xf32>
    %cst_233 = arith.constant dense<0.000000e+00> : vector<8xf32>
    %607 = vector.multi_reduction <add>, %604, %cst_233 [1] : vector<8x64xf32> to vector<8xf32>
    %608 = vector.shape_cast %607 : vector<8xf32> to vector<8x1xf32>
    %609 = arith.mulf %604, %604 : vector<8x64xf32>
    %cst_234 = arith.constant dense<0.000000e+00> : vector<8xf32>
    %610 = vector.multi_reduction <add>, %609, %cst_234 [1] : vector<8x64xf32> to vector<8xf32>
    %611 = vector.shape_cast %610 : vector<8xf32> to vector<8x1xf32>
    %cst_235 = arith.constant 1.562500e-02 : f32
    %612 = vector.broadcast %cst_235 : f32 to vector<8x1xf32>
    %613 = arith.mulf %608, %612 : vector<8x1xf32>
    %cst_236 = arith.constant 1.562500e-02 : f32
    %614 = vector.broadcast %cst_236 : f32 to vector<8x1xf32>
    %615 = arith.mulf %611, %614 : vector<8x1xf32>
    %616 = arith.mulf %613, %613 : vector<8x1xf32>
    %617 = arith.subf %615, %616 : vector<8x1xf32>
    %618 = vector.broadcast %613 : vector<8x1xf32> to vector<8x64xf32>
    %619 = arith.subf %604, %618 : vector<8x64xf32>
    %cst_237 = arith.constant 9.99999974E-6 : f32
    %620 = vector.broadcast %cst_237 : f32 to vector<8x1xf32>
    %621 = arith.addf %617, %620 : vector<8x1xf32>
    %622 = math.rsqrt %621 : vector<8x1xf32>
    %623 = vector.broadcast %622 : vector<8x1xf32> to vector<8x64xf32>
    %624 = arith.mulf %619, %623 : vector<8x64xf32>
    %625 = vector.broadcast %45 : vector<1x64xf32> to vector<8x64xf32>
    %626 = arith.mulf %624, %625 : vector<8x64xf32>
    %627 = vector.broadcast %53 : vector<1x64xf32> to vector<8x64xf32>
    %628 = arith.addf %626, %627 : vector<8x64xf32>
    %629 = arith.mulf %628, %605 : vector<8x64xf32>
    %630 = arith.addf %606, %629 : vector<8x64xf32>
    %cst_238 = arith.constant 5.000000e-01 : f32
    %631 = vector.broadcast %cst_238 : f32 to vector<8x64xf32>
    %632 = arith.mulf %631, %630 : vector<8x64xf32>
    %cst_239 = arith.constant 5.000000e-01 : f32
    %633 = vector.broadcast %cst_239 : f32 to vector<8x64xf32>
    %634 = arith.mulf %633, %630 : vector<8x64xf32>
    %635 = math.tanh %634 : vector<8x64xf32>
    %cst_240 = arith.constant 1.000000e+00 : f32
    %636 = vector.broadcast %cst_240 : f32 to vector<8x64xf32>
    %637 = arith.addf %635, %636 : vector<8x64xf32>
    %638 = arith.mulf %632, %637 : vector<8x64xf32>
    %639 = arith.truncf %638 : vector<8x64xf32> to vector<8x64xbf16>
    %cst_241 = arith.constant dense<0.000000e+00> : vector<8x64xf32>
    %640 = tpu.matmul %639, %61, %cst_241 {dimension_numbers = #tpu.dot_dimension_numbers<[1], [0], [0], [1], [0, 0, 1, 1], [], []>} : vector<8x64xbf16>, vector<64x64xbf16>, vector<8x64xf32> -> vector<8x64xf32>
    %641 = vector.broadcast %69 : vector<1x64xf32> to vector<8x64xf32>
    %642 = arith.addf %640, %641 : vector<8x64xf32>
    %643 = arith.addf %642, %570 : vector<8x64xf32>
    %cst_242 = arith.constant dense<0.000000e+00> : vector<8xf32>
    %644 = vector.multi_reduction <add>, %643, %cst_242 [1] : vector<8x64xf32> to vector<8xf32>
    %645 = vector.shape_cast %644 : vector<8xf32> to vector<8x1xf32>
    %646 = arith.mulf %643, %643 : vector<8x64xf32>
    %cst_243 = arith.constant dense<0.000000e+00> : vector<8xf32>
    %647 = vector.multi_reduction <add>, %646, %cst_243 [1] : vector<8x64xf32> to vector<8xf32>
    %648 = vector.shape_cast %647 : vector<8xf32> to vector<8x1xf32>
    %cst_244 = arith.constant 1.562500e-02 : f32
    %649 = vector.broadcast %cst_244 : f32 to vector<8x1xf32>
    %650 = arith.mulf %645, %649 : vector<8x1xf32>
    %cst_245 = arith.constant 1.562500e-02 : f32
    %651 = vector.broadcast %cst_245 : f32 to vector<8x1xf32>
    %652 = arith.mulf %648, %651 : vector<8x1xf32>
    %653 = arith.mulf %650, %650 : vector<8x1xf32>
    %654 = arith.subf %652, %653 : vector<8x1xf32>
    %655 = vector.broadcast %650 : vector<8x1xf32> to vector<8x64xf32>
    %656 = arith.subf %643, %655 : vector<8x64xf32>
    %cst_246 = arith.constant 9.99999974E-6 : f32
    %657 = vector.broadcast %cst_246 : f32 to vector<8x1xf32>
    %658 = arith.addf %654, %657 : vector<8x1xf32>
    %659 = math.rsqrt %658 : vector<8x1xf32>
    %660 = vector.broadcast %659 : vector<8x1xf32> to vector<8x64xf32>
    %661 = arith.mulf %656, %660 : vector<8x64xf32>
    %662 = vector.broadcast %15 : vector<1x64xf32> to vector<8x64xf32>
    %663 = arith.mulf %661, %662 : vector<8x64xf32>
    %664 = vector.broadcast %23 : vector<1x64xf32> to vector<8x64xf32>
    %665 = arith.addf %663, %664 : vector<8x64xf32>
    %cst_247 = arith.constant 5.000000e-01 : f32
    %666 = vector.broadcast %cst_247 : f32 to vector<8x64xf32>
    %667 = arith.mulf %666, %665 : vector<8x64xf32>
    %cst_248 = arith.constant 5.000000e-01 : f32
    %668 = vector.broadcast %cst_248 : f32 to vector<8x64xf32>
    %669 = arith.mulf %668, %665 : vector<8x64xf32>
    %670 = math.tanh %669 : vector<8x64xf32>
    %cst_249 = arith.constant 1.000000e+00 : f32
    %671 = vector.broadcast %cst_249 : f32 to vector<8x64xf32>
    %672 = arith.addf %670, %671 : vector<8x64xf32>
    %673 = arith.mulf %667, %672 : vector<8x64xf32>
    %674 = arith.truncf %673 : vector<8x64xf32> to vector<8x64xbf16>
    %cst_250 = arith.constant dense<0.000000e+00> : vector<8x64xf32>
    %675 = tpu.matmul %674, %31, %cst_250 {dimension_numbers = #tpu.dot_dimension_numbers<[1], [0], [0], [1], [0, 0, 1, 1], [], []>} : vector<8x64xbf16>, vector<64x64xbf16>, vector<8x64xf32> -> vector<8x64xf32>
    %676 = vector.broadcast %39 : vector<1x64xf32> to vector<8x64xf32>
    %677 = arith.addf %675, %676 : vector<8x64xf32>
    %678 = vector.extract_strided_slice %409 {offsets = [0, 768], sizes = [8, 64], strides = [1, 1]} : vector<8x1024xf32> to vector<8x64xf32>
    %679 = vector.extract_strided_slice %409 {offsets = [0, 896], sizes = [8, 64], strides = [1, 1]} : vector<8x1024xf32> to vector<8x64xf32>
    %cst_251 = arith.constant dense<0.000000e+00> : vector<8xf32>
    %680 = vector.multi_reduction <add>, %677, %cst_251 [1] : vector<8x64xf32> to vector<8xf32>
    %681 = vector.shape_cast %680 : vector<8xf32> to vector<8x1xf32>
    %682 = arith.mulf %677, %677 : vector<8x64xf32>
    %cst_252 = arith.constant dense<0.000000e+00> : vector<8xf32>
    %683 = vector.multi_reduction <add>, %682, %cst_252 [1] : vector<8x64xf32> to vector<8xf32>
    %684 = vector.shape_cast %683 : vector<8xf32> to vector<8x1xf32>
    %cst_253 = arith.constant 1.562500e-02 : f32
    %685 = vector.broadcast %cst_253 : f32 to vector<8x1xf32>
    %686 = arith.mulf %681, %685 : vector<8x1xf32>
    %cst_254 = arith.constant 1.562500e-02 : f32
    %687 = vector.broadcast %cst_254 : f32 to vector<8x1xf32>
    %688 = arith.mulf %684, %687 : vector<8x1xf32>
    %689 = arith.mulf %686, %686 : vector<8x1xf32>
    %690 = arith.subf %688, %689 : vector<8x1xf32>
    %691 = vector.broadcast %686 : vector<8x1xf32> to vector<8x64xf32>
    %692 = arith.subf %677, %691 : vector<8x64xf32>
    %cst_255 = arith.constant 9.99999974E-6 : f32
    %693 = vector.broadcast %cst_255 : f32 to vector<8x1xf32>
    %694 = arith.addf %690, %693 : vector<8x1xf32>
    %695 = math.rsqrt %694 : vector<8x1xf32>
    %696 = vector.broadcast %695 : vector<8x1xf32> to vector<8x64xf32>
    %697 = arith.mulf %692, %696 : vector<8x64xf32>
    %698 = vector.broadcast %47 : vector<1x64xf32> to vector<8x64xf32>
    %699 = arith.mulf %697, %698 : vector<8x64xf32>
    %700 = vector.broadcast %55 : vector<1x64xf32> to vector<8x64xf32>
    %701 = arith.addf %699, %700 : vector<8x64xf32>
    %702 = arith.mulf %701, %678 : vector<8x64xf32>
    %703 = arith.addf %679, %702 : vector<8x64xf32>
    %cst_256 = arith.constant 5.000000e-01 : f32
    %704 = vector.broadcast %cst_256 : f32 to vector<8x64xf32>
    %705 = arith.mulf %704, %703 : vector<8x64xf32>
    %cst_257 = arith.constant 5.000000e-01 : f32
    %706 = vector.broadcast %cst_257 : f32 to vector<8x64xf32>
    %707 = arith.mulf %706, %703 : vector<8x64xf32>
    %708 = math.tanh %707 : vector<8x64xf32>
    %cst_258 = arith.constant 1.000000e+00 : f32
    %709 = vector.broadcast %cst_258 : f32 to vector<8x64xf32>
    %710 = arith.addf %708, %709 : vector<8x64xf32>
    %711 = arith.mulf %705, %710 : vector<8x64xf32>
    %712 = arith.truncf %711 : vector<8x64xf32> to vector<8x64xbf16>
    %cst_259 = arith.constant dense<0.000000e+00> : vector<8x64xf32>
    %713 = tpu.matmul %712, %63, %cst_259 {dimension_numbers = #tpu.dot_dimension_numbers<[1], [0], [0], [1], [0, 0, 1, 1], [], []>} : vector<8x64xbf16>, vector<64x64xbf16>, vector<8x64xf32> -> vector<8x64xf32>
    %714 = vector.broadcast %71 : vector<1x64xf32> to vector<8x64xf32>
    %715 = arith.addf %713, %714 : vector<8x64xf32>
    %716 = arith.addf %715, %643 : vector<8x64xf32>
    %717 = arith.truncf %716 : vector<8x64xf32> to vector<8x64xbf16>
    %cst_260 = arith.constant dense<0.000000e+00> : vector<8x128xf32>
    %718 = tpu.matmul %717, %6, %cst_260 {dimension_numbers = #tpu.dot_dimension_numbers<[1], [0], [0], [1], [0, 0, 1, 1], [], []>} : vector<8x64xbf16>, vector<64x128xbf16>, vector<8x128xf32> -> vector<8x128xf32>
    %719 = vector.broadcast %7 : vector<1x128xf32> to vector<8x128xf32>
    %720 = arith.addf %718, %719 : vector<8x128xf32>
    %721 = vector.extract_strided_slice %720 {offsets = [0, 0], sizes = [8, 2], strides = [1, 1]} : vector<8x128xf32> to vector<8x2xf32>
    %c0_261 = arith.constant 0 : index
    %c0_262 = arith.constant 0 : index
    %722 = vector.load %arg19[%c0_261, %c0_262] : memref<16x2xf32, #tpu.memory_space<vmem>>, vector<8x2xf32>
    tpu.vector_store %arg19[%c0_261, %c0_262], %397 {strides = array<i32>} : memref<16x2xf32, #tpu.memory_space<vmem>>, vector<8x2xf32>,
    %c8 = arith.constant 8 : index
    %c0_263 = arith.constant 0 : index
    %723 = vector.load %arg19[%c8, %c0_263] : memref<16x2xf32, #tpu.memory_space<vmem>>, vector<8x2xf32>
    tpu.vector_store %arg19[%c8, %c0_263], %721 {strides = array<i32>} : memref<16x2xf32, #tpu.memory_space<vmem>>, vector<8x2xf32>,
    return
  }
  func.func @transform_0(%arg0: i32) -> (i32, i32) {
    %c0_i32 = arith.constant 0 : i32
    %c0_i32_0 = arith.constant 0 : i32
    return %arg0, %c0_i32 : i32, i32
  }
  func.func @transform_1(%arg0: i32) -> (i32, i32) {
    %c0_i32 = arith.constant 0 : i32
    %c0_i32_0 = arith.constant 0 : i32
    return %arg0, %c0_i32 : i32, i32
  }
  func.func @transform_2(%arg0: i32) -> (i32, i32) {
    %c0_i32 = arith.constant 0 : i32
    %c0_i32_0 = arith.constant 0 : i32
    %c0_i32_1 = arith.constant 0 : i32
    return %c0_i32, %c0_i32_0 : i32, i32
  }
  func.func @transform_3(%arg0: i32) -> (i32, i32) {
    %c0_i32 = arith.constant 0 : i32
    %c0_i32_0 = arith.constant 0 : i32
    %c0_i32_1 = arith.constant 0 : i32
    return %c0_i32, %c0_i32_0 : i32, i32
  }
  func.func @transform_4(%arg0: i32) -> (i32, i32) {
    %c0_i32 = arith.constant 0 : i32
    %c0_i32_0 = arith.constant 0 : i32
    %c0_i32_1 = arith.constant 0 : i32
    return %c0_i32, %c0_i32_0 : i32, i32
  }
  func.func @transform_5(%arg0: i32) -> (i32, i32) {
    %c0_i32 = arith.constant 0 : i32
    %c0_i32_0 = arith.constant 0 : i32
    %c0_i32_1 = arith.constant 0 : i32
    return %c0_i32, %c0_i32_0 : i32, i32
  }
  func.func @transform_6(%arg0: i32) -> (i32, i32, i32) {
    %c0_i32 = arith.constant 0 : i32
    %c0_i32_0 = arith.constant 0 : i32
    %c0_i32_1 = arith.constant 0 : i32
    %c0_i32_2 = arith.constant 0 : i32
    return %c0_i32, %c0_i32_0, %c0_i32_1 : i32, i32, i32
  }
  func.func @transform_7(%arg0: i32) -> (i32, i32, i32) {
    %c0_i32 = arith.constant 0 : i32
    %c0_i32_0 = arith.constant 0 : i32
    %c0_i32_1 = arith.constant 0 : i32
    %c0_i32_2 = arith.constant 0 : i32
    return %c0_i32, %c0_i32_0, %c0_i32_1 : i32, i32, i32
  }
  func.func @transform_8(%arg0: i32) -> (i32, i32, i32) {
    %c0_i32 = arith.constant 0 : i32
    %c0_i32_0 = arith.constant 0 : i32
    %c0_i32_1 = arith.constant 0 : i32
    %c0_i32_2 = arith.constant 0 : i32
    return %c0_i32, %c0_i32_0, %c0_i32_1 : i32, i32, i32
  }
  func.func @transform_9(%arg0: i32) -> (i32, i32, i32) {
    %c0_i32 = arith.constant 0 : i32
    %c0_i32_0 = arith.constant 0 : i32
    %c0_i32_1 = arith.constant 0 : i32
    %c0_i32_2 = arith.constant 0 : i32
    return %c0_i32, %c0_i32_0, %c0_i32_1 : i32, i32, i32
  }
  func.func @transform_10(%arg0: i32) -> (i32, i32) {
    %c0_i32 = arith.constant 0 : i32
    %c0_i32_0 = arith.constant 0 : i32
    %c0_i32_1 = arith.constant 0 : i32
    return %c0_i32, %c0_i32_0 : i32, i32
  }
  func.func @transform_11(%arg0: i32) -> (i32, i32) {
    %c0_i32 = arith.constant 0 : i32
    %c0_i32_0 = arith.constant 0 : i32
    %c0_i32_1 = arith.constant 0 : i32
    return %c0_i32, %c0_i32_0 : i32, i32
  }
  func.func @transform_12(%arg0: i32) -> (i32, i32, i32) {
    %c0_i32 = arith.constant 0 : i32
    %c0_i32_0 = arith.constant 0 : i32
    %c0_i32_1 = arith.constant 0 : i32
    %c0_i32_2 = arith.constant 0 : i32
    return %c0_i32, %c0_i32_0, %c0_i32_1 : i32, i32, i32
  }
  func.func @transform_13(%arg0: i32) -> (i32, i32, i32) {
    %c0_i32 = arith.constant 0 : i32
    %c0_i32_0 = arith.constant 0 : i32
    %c0_i32_1 = arith.constant 0 : i32
    %c0_i32_2 = arith.constant 0 : i32
    return %c0_i32, %c0_i32_0, %c0_i32_1 : i32, i32, i32
  }
  func.func @transform_14(%arg0: i32) -> (i32, i32, i32) {
    %c0_i32 = arith.constant 0 : i32
    %c0_i32_0 = arith.constant 0 : i32
    %c0_i32_1 = arith.constant 0 : i32
    %c0_i32_2 = arith.constant 0 : i32
    return %c0_i32, %c0_i32_0, %c0_i32_1 : i32, i32, i32
  }
  func.func @transform_15(%arg0: i32) -> (i32, i32, i32) {
    %c0_i32 = arith.constant 0 : i32
    %c0_i32_0 = arith.constant 0 : i32
    %c0_i32_1 = arith.constant 0 : i32
    %c0_i32_2 = arith.constant 0 : i32
    return %c0_i32, %c0_i32_0, %c0_i32_1 : i32, i32, i32
  }
  func.func @transform_16(%arg0: i32) -> (i32, i32) {
    %c0_i32 = arith.constant 0 : i32
    %c0_i32_0 = arith.constant 0 : i32
    %c0_i32_1 = arith.constant 0 : i32
    return %c0_i32, %c0_i32_0 : i32, i32
  }
  func.func @transform_17(%arg0: i32) -> (i32, i32) {
    %c0_i32 = arith.constant 0 : i32
    %c0_i32_0 = arith.constant 0 : i32
    %c0_i32_1 = arith.constant 0 : i32
    return %c0_i32, %c0_i32_0 : i32, i32
  }
  func.func @transform_18(%arg0: i32) -> (i32, i32) {
    %c0_i32 = arith.constant 0 : i32
    %c0_i32_0 = arith.constant 0 : i32
    return %arg0, %c0_i32 : i32, i32
  }
}

</mosaic_0001>

<bundles_post_ra>
// kernel: tpu_custom_call.1
= control target key start
LH: loop header
LB: loop body
LE: loop exit
PB: predicated region body
PF: predicated region fallthrough
CT: control target
= control target key end

     0   :  { %s4436_s0 = inlined_call_operand.vmem [shape: f32[16,2], index: 0, kind: input, shape index: {}]   ;;  %s4437_s1 = inlined_call_operand.vmem [shape: f32[16,1], index: 1, kind: input, shape index: {}]   ;;  %s4438_s2 = inlined_call_operand.vmem [shape: f32[1,64], index: 2, kind: input, shape index: {}]   ;;  %s4439_s3 = inlined_call_operand.hbm [shape: f32[1,64], index: 3, kind: input, shape index: {}]   ;;  %s4440_s4 = inlined_call_operand.hbm [shape: f32[2,64], index: 4, kind: input, shape index: {}]   ;;  %s4441_s5 = inlined_call_operand.hbm [shape: f32[1,64], index: 5, kind: input, shape index: {}]   ;;  %s4442_s6 = inlined_call_operand.vmem [shape: f32[4,1,64], index: 6, kind: input, shape index: {}]   ;;  %s4443_s7 = inlined_call_operand.vmem [shape: f32[4,1,64], index: 7, kind: input, shape index: {}]   ;;  %s4444_s8 = inlined_call_operand.hbm [shape: bf16[4,64,64], index: 8, kind: input, shape index: {}]   ;;  %s4445_s9 = inlined_call_operand.vmem [shape: f32[4,1,64], index: 9, kind: input, shape index: {}]   ;;  %s4446_s10 = inlined_call_operand.hbm [shape: bf16[64,1024], index: 10, kind: input, shape index: {}]   ;;  %s4447_s11 = inlined_call_operand.vmem [shape: f32[1,1024], index: 11, kind: input, shape index: {}]   ;;  %s4448_s12 = inlined_call_operand.vmem [shape: f32[4,1,64], index: 12, kind: input, shape index: {}]   ;;  %s4449_s13 = inlined_call_operand.vmem [shape: f32[4,1,64], index: 13, kind: input, shape index: {}]   ;;  %s4450_s14 = inlined_call_operand.hbm [shape: bf16[4,64,64], index: 14, kind: input, shape index: {}]   ;;  %s4451_s15 = inlined_call_operand.vmem [shape: f32[4,1,64], index: 15, kind: input, shape index: {}]   ;;  %s4452_s16 = inlined_call_operand.vmem [shape: bf16[64,128], index: 16, kind: input, shape index: {}]   ;;  %s4453_s17 = inlined_call_operand.vmem [shape: f32[1,128], index: 17, kind: input, shape index: {}]   ;;  %s4454_s18 = inlined_call_operand.vmem [shape: f32[16,2], index: 18, kind: output, shape index: {}]  }
   0x1   :  { %4496 = sst [smem:[#allocation38_spill]] %s4436_s0 }
   0x2   :  { %4497 = sst [smem:[#allocation39_spill]] %s4437_s1 }
   0x3   :  { %4498 = sst [smem:[#allocation40_spill]] %s4438_s2 }
   0x4   :  { %23 = vsyncpa [#allocation3], 0 }
   0x5   :  { %24 = vsyncpa [#allocation5], 0 }
   0x6   :  { %25 = vsyncpa [#allocation8], 0 }
   0x7   :  { %26 = vsyncpa [#allocation11], 0  ;;  %s3416_s27 = smov [#allocation4]   ;;  %s3417_s29 = smov [#allocation7]  }
   0x8   :  { %s49_s28 = sshll.u32 %s3416_s27, 4  ;;  %s72_s30 = sshll.u32 %s3417_s29, 4  ;;  %s50_s28 = int_to_ptr.vmem [resolvable:$true] %s49_s28  ;;  %s3531_s30 = int_to_ptr.vmem [resolvable:$true] %s72_s30 }
   0x9   :  { %s3276_s1 = scalar_lea.hbm %s4440_s4, 32 }
   0xa   :  { %p3277_p0 = scmp.ne.s32.totalorder %s4440_s4, %s3276_s1  ;;  %p3280_p1 = scmp.lt.u32.totalorder %s3276_s1, %s4440_s4 }
   0xc   :  { %p3282_p2 = pnand %p3280_p1, %p3277_p0 }
   0xe   :  { %3285 = shalt.err (!%p3282_p2)
}
   0xf   :  { %s3286_s23 = scalar_lea.vmem %s50_s28, 32  ;;  %p3291_p4 = scmp.lt.s32.totalorder %s50_s28, %s50_s28 }
  0x10   :  { %p3287_p3 = scmp.ne.s32.totalorder %s50_s28, %s3286_s23  ;;  %p3292_p5 = scmp.lt.s32.totalorder %s3286_s23, %s3286_s23 }
  0x12   :  { %p3293_p6 = por %p3292_p5, %p3291_p4 }
  0x14   :  { %p3294_p7 = pnand %p3293_p6, %p3287_p3 }
  0x16   :  { %3297 = shalt.err (!%p3294_p7)
}
  0x17   :  { %52 = dma.hbm_to_vmem [thread:$0]  %s4440_s4, 32, %s50_s28, [#allocation5]  }
  0x18   :  { %s3298_s29 = scalar_lea.hbm %s4444_s8, 2048 }
  0x19   :  { %p3299_p8 = scmp.ne.s32.totalorder %s4444_s8, %s3298_s29  ;;  %p3302_p9 = scmp.lt.u32.totalorder %s3298_s29, %s4444_s8 }
  0x1b   :  { %p3304_p10 = pnand %p3302_p9, %p3299_p8 }
  0x1d   :  { %3307 = shalt.err (!%p3304_p10)
}
  0x1e   :  { %s3308_s21 = scalar_lea.vmem %s3531_s30, 2048  ;;  %p3313_p12 = scmp.lt.s32.totalorder %s3531_s30, %s3531_s30 }
  0x1f   :  { %p3309_p11 = scmp.ne.s32.totalorder %s3531_s30, %s3308_s21  ;;  %p3314_p13 = scmp.lt.s32.totalorder %s3308_s21, %s3308_s21 }
  0x21   :  { %p3315_p0 = por %p3314_p13, %p3313_p12 }
  0x23   :  { %p3316_p1 = pnand %p3315_p0, %p3309_p11 }
  0x25   :  { %3319 = shalt.err (!%p3316_p1)
}
  0x26   :  { %s3418_s4 = smov 64   ;;  %s3419_s28 = smov 4  }
  0x27   :  { %78 = dma.hbm_to_vmem [thread:$0]  %s4444_s8, 2048, %s3531_s30, [#allocation8], %s3418_s4, %s3418_s4, %s3419_s28  }
  0x28   :  { %s3420_s23 = smov [#allocation2]   ;;  %s3421_s25 = smov [#allocation6]  }
  0x29   :  { %s39_s24 = sshll.u32 %s3420_s23, 4  ;;  %s59_s26 = sshll.u32 %s3421_s25, 4  ;;  %s40_s24 = int_to_ptr.vmem [resolvable:$true] %s39_s24  ;;  %s60_s26 = int_to_ptr.vmem [resolvable:$true] %s59_s26 }
  0x2a   :  { %s3320_s0 = scalar_lea.hbm %s4439_s3, 16 }
  0x2b   :  { %p3321_p2 = scmp.ne.s32.totalorder %s4439_s3, %s3320_s0  ;;  %p3324_p3 = scmp.lt.u32.totalorder %s3320_s0, %s4439_s3 }
  0x2d   :  { %p3326_p4 = pnand %p3324_p3, %p3321_p2 }
  0x2f   :  { %3329 = shalt.err (!%p3326_p4)
}
  0x30   :  { %s3330_s8 = scalar_lea.vmem %s40_s24, 16  ;;  %s3334_s30 = scalar_lea.vmem %s40_s24, 32 }
  0x31   :  { %p3331_p5 = scmp.ne.s32.totalorder %s40_s24, %s3330_s8  ;;  %p3335_p6 = scmp.lt.s32.totalorder %s40_s24, %s40_s24 }
  0x32   :  { %p3336_p7 = scmp.lt.s32.totalorder %s3334_s30, %s3330_s8 }
  0x34   :  { %p3337_p8 = por %p3336_p7, %p3335_p6 }
  0x36   :  { %p3338_p9 = pnand %p3337_p8, %p3331_p5 }
  0x38   :  { %3341 = shalt.err (!%p3338_p9)
}
  0x39   :  { %42 = dma.hbm_to_vmem [thread:$0]  %s4439_s3, 16, %s40_s24, [#allocation3]  }
  0x3a   :  { %s3342_s27 = scalar_lea.hbm %s4441_s5, 16 }
  0x3b   :  { %p3343_p10 = scmp.ne.s32.totalorder %s4441_s5, %s3342_s27  ;;  %p3346_p11 = scmp.lt.u32.totalorder %s3342_s27, %s4441_s5 }
  0x3d   :  { %p3348_p12 = pnand %p3346_p11, %p3343_p10 }
  0x3f   :  { %3351 = shalt.err (!%p3348_p12)
}
  0x40   :  { %s3352_s20 = scalar_lea.vmem %s60_s26, 16  ;;  %s3356_s21 = scalar_lea.vmem %s60_s26, 32 }
  0x41   :  { %p3353_p13 = scmp.ne.s32.totalorder %s60_s26, %s3352_s20  ;;  %p3357_p0 = scmp.lt.s32.totalorder %s60_s26, %s60_s26 }
  0x42   :  { %p3358_p1 = scmp.lt.s32.totalorder %s3356_s21, %s3352_s20 }
  0x44   :  { %p3359_p2 = por %p3358_p1, %p3357_p0 }
  0x46   :  { %p3360_p3 = pnand %p3359_p2, %p3353_p13 }
  0x48   :  { %3363 = shalt.err (!%p3360_p3)
}
  0x49   :  { %62 = dma.hbm_to_vmem [thread:$0]  %s4441_s5, 16, %s60_s26, [#allocation5]  }
  0x4a   :  { %s3422_s8 = smov [#allocation9]   ;;  %s3364_s23 = scalar_lea.hbm %s4446_s10, 4096 }
  0x4b   :  { %s86_s30 = sshll.u32 %s3422_s8, 4  ;;  %p3365_p4 = scmp.ne.s32.totalorder %s4446_s10, %s3364_s23  ;;  %s87_s30 = int_to_ptr.vmem [resolvable:$true] %s86_s30 }
  0x4c   :  { %p3368_p5 = scmp.lt.u32.totalorder %s3364_s23, %s4446_s10 }
  0x4e   :  { %p3370_p6 = pnand %p3368_p5, %p3365_p4 }
  0x50   :  { %3373 = shalt.err (!%p3370_p6)
}
  0x51   :  { %s3374_s19 = scalar_lea.vmem %s87_s30, 4096  ;;  %p3379_p8 = scmp.lt.s32.totalorder %s87_s30, %s87_s30 }
  0x52   :  { %p3375_p7 = scmp.ne.s32.totalorder %s87_s30, %s3374_s19  ;;  %p3380_p9 = scmp.lt.s32.totalorder %s3374_s19, %s3374_s19 }
  0x54   :  { %p3381_p10 = por %p3380_p9, %p3379_p8 }
  0x56   :  { %p3382_p11 = pnand %p3381_p10, %p3375_p7 }
  0x58   :  { %3385 = shalt.err (!%p3382_p11)
}
  0x59   :  { %s3423_s5 = smov 512   ;;  %s3424_s26 = smov 32  }
  0x5a   :  { %92 = dma.hbm_to_vmem [thread:$0]  %s4446_s10, 4096, %s87_s30, [#allocation8], %s3423_s5, %s3423_s5, %s3424_s26  }
  0x5b   :  { %s3425_s21 = smov [#allocation10]   ;;  %s3386_s22 = scalar_lea.hbm %s4450_s14, 2048 }
  0x5c   :  { %s104_s3 = sshll.u32 %s3425_s21, 4  ;;  %p3387_p12 = scmp.ne.s32.totalorder %s4450_s14, %s3386_s22  ;;  %s105_s3 = int_to_ptr.vmem [resolvable:$true] %s104_s3 }
  0x5d   :  { %p3390_p13 = scmp.lt.u32.totalorder %s3386_s22, %s4450_s14 }
  0x5f   :  { %p3392_p0 = pnand %p3390_p13, %p3387_p12 }
  0x61   :  { %3395 = shalt.err (!%p3392_p0)
}
  0x62   :  { %s3396_s29 = scalar_lea.vmem %s105_s3, 2048  ;;  %p3401_p2 = scmp.lt.s32.totalorder %s105_s3, %s105_s3 }
  0x63   :  { %p3397_p1 = scmp.ne.s32.totalorder %s105_s3, %s3396_s29  ;;  %p3402_p3 = scmp.lt.s32.totalorder %s3396_s29, %s3396_s29 }
  0x65   :  { %p3403_p4 = por %p3402_p3, %p3401_p2 }
  0x67   :  { %p3404_p5 = pnand %p3403_p4, %p3397_p1 }
  0x69   :  { %3407 = shalt.err (!%p3404_p5)
}
  0x6a   :  { %110 = dma.hbm_to_vmem [thread:$0]  %s4450_s14, 2048, %s105_s3, [#allocation11], %s3418_s4, %s3418_s4, %s3419_s28  }
  0x6b   :  { %3408 = dma.done.wait [#allocation3], 16  }
  0x6c   :  { %3409 = vsyncadd [#allocation3], 4294967280 }
  0x6d   :  { %3410 = dma.done.wait [#allocation5], 48  }
  0x6e   :  { %3411 = vsyncadd [#allocation5], 4294967248 }
  0x6f   :  { %3412 = dma.done.wait [#allocation8], 6144  }
  0x70   :  { %3413 = vsyncadd [#allocation8], 4294961152 }
  0x71   :  { %3414 = dma.done.wait [#allocation11], 2048  }
  0x72   :  { %3415 = vsyncadd [#allocation11], 4294965248  ;;  %v4460_v0 = vmov 0   ;;  %s4499_s14 = sld [smem:[#allocation39_spill]]  ;;  %s4500_s5 = sld [smem:[#allocation38_spill]]  ;;  %v3427_v3 = vmov 1   ;;  %v423_v44 = vlaneseq }
  0x73   :  { %3124 = vset.pattern.permute.xlu1 %v4460_v0  ;;  %3122 = vset.pattern.permute.xlu0 %v4460_v0  ;;  %v140_v4 = vld [vmem:[#allocation9] sm:$0xff]  ;;  %v141_v6 = vld [vmem:[#allocation9 + $0x8] sm:$0xff]  ;;  %v142_v28 = vld [vmem:[#allocation9 + $0x10] sm:$0xff]  ;;  %s4501_s20 = sld [smem:[#allocation40_spill]]  ;;  %vm623_vm0 = vcmask 523264   ;;  %vm3435_vm14 = vmmov 0  }
  0x74   :  { %659 = vmatprep.mubr.bf16.mxu0 %v4460_v0  ;;  %700 = vmatprep.mubr.bf16.mxu1 %v4460_v0  ;;  %v144_v5 = vld [vmem:[#allocation9 + $0x20] sm:$0xff]  ;;  %v145_v8 = vld [vmem:[#allocation9 + $0x28] sm:$0xff]  ;;  %v146_v29 = vld [vmem:[#allocation9 + $0x30] sm:$0xff]  ;;  %v3684_v45 = vshrl.u32 %v423_v44, 7 }
  0x75   :  { %v3626_v7 = vcombine.high %v140_v4, %v144_v5  ;;  %v3628_v9 = vcombine.high %v141_v6, %v145_v8  ;;  %v3630_v10 = vcombine.low %v140_v4, %v144_v5  ;;  %v3632_v11 = vcombine.low %v141_v6, %v145_v8  ;;  %v148_v12 = vld [vmem:[#allocation9 + $0x40] sm:$0xff]  ;;  %v149_v14 = vld [vmem:[#allocation9 + $0x48] sm:$0xff]  ;;  %v143_v30 = vld [vmem:[#allocation9 + $0x18] sm:$0xff] }
  0x76   :  { %v152_v13 = vld [vmem:[#allocation9 + $0x60] sm:$0xff]  ;;  %v153_v16 = vld [vmem:[#allocation9 + $0x68] sm:$0xff]  ;;  %v3652_v33 = vcombine.low %v142_v28, %v146_v29  ;;  %v147_v34 = vld [vmem:[#allocation9 + $0x38] sm:$0xff]  ;;  %v3675_v42 = vcombine.high %v142_v28, %v146_v29  ;;  %v425_v46 = vsub.s32 0, %v3684_v45  ;;  %v429_v50 = vsub.s32 1, %v3684_v45 }
  0x77   :  { %627 = vmatprep.subr.bf16.mxu0 %v3626_v7  ;;  %v3635_v15 = vcombine.high %v148_v12, %v152_v13  ;;  %v156_v17 = vld [vmem:[#allocation9 + $0x80] sm:$0xff]  ;;  %668 = vmatprep.subr.bf16.mxu1 %v3628_v9  ;;  %v3639_v19 = vcombine.high %v149_v14, %v153_v16  ;;  %v3641_v20 = vcombine.low %v148_v12, %v152_v13  ;;  %v157_v21 = vld [vmem:[#allocation9 + $0x88] sm:$0xff]  ;;  %v138_v47 = vld [vmem:[#allocation4] sm:$0x3]  ;;  %v4462_v28 = vmov 2131351028  }
  0x78   :  { %v296_v1 = vld [vmem:[%s4499_s14] sm:$0xff]  ;;  %v160_v18 = vld [vmem:[#allocation9 + $0xa0] sm:$0xff]  ;;  %628 = vmatpush1.bf16.msra.mxu0 %v3630_v10  ;;  %669 = vmatpush1.bf16.msra.mxu1 %v3632_v11  ;;  %v3645_v23 = vcombine.low %v149_v14, %v153_v16  ;;  %v3657_v36 = vcombine.low %v143_v30, %v147_v34  ;;  %v3678_v43 = vcombine.high %v143_v30, %v147_v34  ;;  %v2659_v52 = vld [vmem:[#allocation2] ss:$0 sm:$0xff]  ;;  %v4466_v30 = vmov 2102212464  }
  0x79   :  { %v294_v2 = vld [vmem:[%s4500_s5] sm:$0xff]  ;;  %300 = vperm.xlu1 %3124, %v296_v1   ;;  %629 = vmatprep.subr.bf16.mxu0 %v3635_v15  ;;  %v3647_v24 = vcombine.high %v156_v17, %v160_v18  ;;  %v164_v25 = vld [vmem:[#allocation9 + $0xc0] sm:$0xff]  ;;  %v3655_v35 = vcombine.low %v156_v17, %v160_v18  ;;  %v3692_v49 = vrot.slane %v138_v47, %v425_v46  ;;  %v2700_v58 = vld [vmem:[#allocation6] ss:$0 sm:$0xff] }
  0x7a   :  { %800 = vperm.xlu0 %3122, %v294_v2   ;;  %v161_v22 = vld [vmem:[#allocation9 + $0xa8] sm:$0xff]  ;;  %v168_v26 = vld [vmem:[#allocation9 + $0xe0] sm:$0xff]  ;;  %670 = vmatprep.subr.bf16.mxu1 %v3639_v19  ;;  %v3698_v56 = vrot.slane %v138_v47, %v429_v50 }
  0x7b   :  { %v3650_v27 = vcombine.high %v157_v21, %v161_v22  ;;  %v165_v31 = vld [vmem:[#allocation9 + $0xc8] sm:$0xff]  ;;  %v3661_v37 = vcombine.low %v157_v21, %v161_v22  ;;  %v3663_v38 = vcombine.high %v164_v25, %v168_v26  ;;  %v3669_v40 = vcombine.low %v164_v25, %v168_v26 }
  0x7c   :  { %v169_v32 = vld [vmem:[#allocation9 + $0xe8] sm:$0xff]  ;;  %630 = vmatpush1.bf16.msra.mxu0 %v3641_v20  ;;  %671 = vmatpush1.bf16.msra.mxu1 %v3645_v23  ;;  %v4458_v21 = vmov 683565275   ;;  %v4464_v25 = vmov 2475754826  }
  0x7d   :  { %631 = vmatprep.subr.bf16.mxu0 %v3647_v24  ;;  %672 = vmatprep.subr.bf16.mxu1 %v3650_v27  ;;  %v3666_v39 = vcombine.high %v165_v31, %v169_v32  ;;  %v3673_v41 = vcombine.low %v165_v31, %v169_v32  ;;  %v2658_v48 = vld [vmem:[%s4501_s20] ss:$0 sm:$0xff]  ;;  %v4469_v32 = vmov 920167782  }
  0x7e   :  { %3123 = vset.pattern.permute.xlu0 %v3427_v3 }
  0x7f   :  { %810 = vperm.xlu0 %3123, %v294_v2  }
  0x80   :  { %632 = vmatpush1.bf16.msra.mxu0 %v3655_v35  ;;  %673 = vmatpush1.bf16.msra.mxu1 %v3661_v37 }
  0x81   :  { %633 = vmatprep.subr.bf16.mxu0 %v3663_v38  ;;  %674 = vmatprep.subr.bf16.mxu1 %v3666_v39 }
  0x84   :  { %634 = vmatpush1.bf16.msra.mxu0 %v3669_v40  ;;  %675 = vmatpush1.bf16.msra.mxu1 %v3673_v41 }
  0x85   :  { %709 = vmatprep.subr.bf16.mxu0 %v3675_v42  ;;  %750 = vmatprep.subr.bf16.mxu1 %v3678_v43 }
  0xf8   :  { %v301_v51 = vpop.permute.xlu1 %300 }
  0xf9   :  { %v801_v53 = vpop.permute.xlu0 %800  ;;  %v309_v54 = vmul.f32 %v2658_v48, %v301_v51 }
  0xfa   :  { %v807_v55 = vmul.f32 %v3692_v49, %v801_v53  ;;  %v4468_v53 = vmov 1326507024  }
  0xfb   :  { %v3700_v57 = vadd.f32 %v2659_v52, %v309_v54 }
  0xfc   :  { %v808_v61 = vadd.f32 %v2700_v58, %v807_v55 }
  0xfd   :  { %v320_v59 = vand.u32 2139095040, %v3700_v57  ;;  %v317_v1 = vand.u32 2147483647, %v3700_v57  ;;  %vm319_vm8 = vcmp.lt.s32.totalorder %v3700_v57, 0  ;;  %vm409_vm13 = vweird.f32 %v3700_v57 }
  0xfe   :  { %v811_v60 = vpop.permute.xlu0 %810 }
  0xff   :  { %v817_v62 = vmul.f32 %v3698_v56, %v811_v60  ;;  %v321_v63 = vshrl.u32 %v320_v59, 23  ;;  %v324_v8 = vand.u32 8388607, %v317_v1  ;;  %vm318_vm9 = vcmp.le.f32.partialorder %v317_v1, 0.7853982 }
 0x101   :  { %v3705_v2 = vadd.f32 %v817_v62, %v808_v61  ;;  %v2660_v3 = vadd.s32 4294967169, %v321_v63  ;;  %v325_v16 = vor.u32 8388608, %v324_v8 }
 0x103   :  { %v819_v4 = vsel %vm623_vm0, %v3705_v2, 0.0  ;;  %v822_v5 = vmul.f32 %v3705_v2, %v3705_v2  ;;  %v327_v6 = vadd.s32 1, %v2660_v3  ;;  %v365_v55 = vshll.u32 %v325_v16, 8 }
 0x104   :  { %820 = vadd.xlane.f32.xlu1 %v819_v4 }
 0x105   :  { %v823_v12 = vsel %vm623_vm0, %v822_v5, 0.0  ;;  %vm328_vm1 = vcmp.gt.s32.totalorder %v327_v6, 0 }
 0x106   :  { %824 = vadd.xlane.f32.xlu0 %v823_v12  ;;  %v329_v13 = vsel %vm328_vm1, %v327_v6, 0 }
 0x107   :  { %v331_v14 = vand.u32 31, %v329_v13  ;;  %v330_v17 = vshrl.u32 %v329_v13, 5 }
 0x109   :  { %v332_v18 = vsub.s32 32, %v331_v14  ;;  %v334_v22 = vshll.u32 %v4458_v21, %v331_v14  ;;  %v337_v26 = vshll.u32 %v4464_v25, %v331_v14  ;;  %v340_v29 = vshll.u32 %v4462_v28, %v331_v14 }
 0x10a   :  { %v343_v31 = vshll.u32 %v4466_v30, %v331_v14  ;;  %v346_v34 = vshll.u32 %v4469_v32, %v331_v14  ;;  %vm349_vm2 = vcmp.lt.s32.totalorder %v330_v17, 1  ;;  %vm352_vm3 = vcmp.lt.s32.totalorder %v330_v17, 4 }
 0x10b   :  { %v333_v44 = vshrl.u32 %v4458_v21, %v332_v18  ;;  %v335_v47 = vshrl.u32 %v4464_v25, %v332_v18  ;;  %v338_v48 = vshrl.u32 %v4462_v28, %v332_v18  ;;  %v341_v51 = vshrl.u32 %v4466_v30, %v332_v18 }
 0x10c   :  { %v344_v52 = vshrl.u32 %v4469_v32, %v332_v18  ;;  %v347_v54 = vshrl.u32 %v4468_v53, %v332_v18  ;;  %vm350_vm4 = vcmp.lt.s32.totalorder %v330_v17, 2  ;;  %vm351_vm5 = vcmp.lt.s32.totalorder %v330_v17, 3 }
 0x10d   :  { %v336_v58 = vor.u32 %v335_v47, %v334_v22  ;;  %v339_v59 = vor.u32 %v338_v48, %v337_v26  ;;  %v342_v60 = vor.u32 %v341_v51, %v340_v29 }
 0x10e   :  { %v345_v61 = vor.u32 %v344_v52, %v343_v31  ;;  %v348_v62 = vor.u32 %v347_v54, %v346_v34 }
 0x10f   :  { %v353_v63 = vsel %vm349_vm2, %v333_v44, %v336_v58  ;;  %v354_v3 = vsel %vm352_vm3, %v342_v60, 2102212464  ;;  %v357_v4 = vsel %vm349_vm2, %v336_v58, %v339_v59  ;;  %v361_v5 = vsel %vm349_vm2, %v339_v59, %v342_v60 }
 0x110   :  { %v355_v6 = vsel %vm351_vm5, %v339_v59, %v354_v3  ;;  %v358_v8 = vsel %vm352_vm3, %v345_v61, 920167782  ;;  %v362_v12 = vsel %vm352_vm3, %v348_v62, 1326507024 }
 0x111   :  { %v359_v13 = vsel %vm351_vm5, %v342_v60, %v358_v8  ;;  %v363_v14 = vsel %vm351_vm5, %v345_v61, %v362_v12  ;;  %v356_v18 = vsel %vm350_vm4, %v353_v63, %v355_v6 }
 0x112   :  { %v360_v21 = vsel %vm350_vm4, %v357_v4, %v359_v13  ;;  %v364_v16 = vsel %vm350_vm4, %v361_v5, %v363_v14  ;;  %v372_v34 = vmul.u32 %v365_v55, %v356_v18 }
 0x113   :  { %v3725_v22 = vmul.u32.u64.low %v365_v55, %v364_v16  ;;  %v3726_v26 = vmul.u32.u64.high %v365_v55, %v364_v16, %v3725_v22  ;;  %v3728_v29 = vmul.u32.u64.low %v365_v55, %v360_v21  ;;  %v3729_v31 = vmul.u32.u64.high %v365_v55, %v360_v21, %v3728_v29 }
 0x115   :  { %vm374_vm6 = vc.u32 %v3726_v26, %v3728_v29  ;;  %v375_v17 = vadd.s32 1, %v3729_v31  ;;  %v373_v62 = vadd.s32 %v3728_v29, %v3726_v26 }
 0x117   :  { %v376_v44 = vsel %vm374_vm6, %v375_v17, %v3729_v31 }
 0x118   :  { %v377_v47 = vadd.s32 %v376_v44, %v372_v34 }
 0x11a   :  { %v378_v48 = vadd.s32 536870912, %v377_v47 }
 0x11c   :  { %v379_v51 = vshrl.u32 %v378_v48, 30 }
 0x11e   :  { %v380_v52 = vshll.u32 %v379_v51, 30  ;;  %v403_v18 = vsub.s32 4, %v379_v51 }
 0x120   :  { %v381_v54 = vsub.s32 %v377_v47, %v380_v52  ;;  %v404_v26 = vsel %vm319_vm8, %v403_v18, %v379_v51  ;;  %v166_v18 = vld [vmem:[#allocation9 + $0xd0] sm:$0xff] }
 0x121   :  { %v406_v34 = vsel %vm318_vm9, 0, %v404_v26  ;;  %v171_v26 = vld [vmem:[#allocation9 + $0xf8] sm:$0xff] }
 0x122   :  { %v383_v58 = vsub.s32 0, %v381_v54  ;;  %v410_v17 = vadd.s32 3, %v406_v34 }
 0x124   :  { %v2661_v59 = vmin.u32 %v383_v58, %v381_v54  ;;  %v411_v44 = vand.u32 3, %v410_v17  ;;  %v150_v58 = vld [vmem:[#allocation9 + $0x50] sm:$0xff] }
 0x126   :  { %v385_v60 = vclz %v2661_v59  ;;  %vm416_vm10 = vcmp.eq.s32.totalorder %v411_v44, 2  ;;  %vm413_vm11 = vcmp.eq.s32.totalorder %v411_v44, 0  ;;  %vm412_vm12 = vcmp.lt.s32.totalorder %v411_v44, 2  ;;  %v154_v59 = vld [vmem:[#allocation9 + $0x70] sm:$0xff] }
 0x128   :  { %v2662_v61 = vadd.s32 4294967294, %v385_v60  ;;  %v151_v60 = vld [vmem:[#allocation9 + $0x58] sm:$0xff] }
 0x12a   :  { %vm2663_vm7 = vcmp.lt.s32.totalorder %v2662_v61, 0 }
 0x12b   :  { %v388_v21 = vsel %vm2663_vm7, 0, %v2662_v61  ;;  %v155_v61 = vld [vmem:[#allocation9 + $0x78] sm:$0xff] }
 0x12c   :  { %v389_v55 = vsub.s32 32, %v388_v21  ;;  %v390_v63 = vshll.u32 %v381_v54, %v388_v21  ;;  %v393_v3 = vsub.s32 4294967266, %v388_v21 }
 0x12e   :  { %v391_v4 = vshrl.u32 %v373_v62, %v389_v55  ;;  %v394_v5 = vadd.s32 127, %v393_v3  ;;  %v3742_v3 = vcombine.high %v151_v60, %v155_v61 }
 0x130   :  { %v392_v6 = vor.u32 %v391_v4, %v390_v63  ;;  %v395_v8 = vshll.u32 %v394_v5, 23  ;;  %v3740_v63 = vcombine.high %v150_v58, %v154_v59  ;;  %4502 = vst [vmem:[#allocation16_spill] sm:$0xff] %v3742_v3  ;;  %v158_v4 = vld [vmem:[#allocation9 + $0x90] sm:$0xff] }
 0x131   :  { %v162_v5 = vld [vmem:[#allocation9 + $0xb0] sm:$0xff] }
 0x132   :  { %v396_v12 = vor.u32 4788187, %v395_v8  ;;  %v399_v13 = vcvt.s32.f32 %v392_v6  ;;  %v159_v6 = vld [vmem:[#allocation9 + $0x98] sm:$0xff] }
 0x133   :  { %v163_v8 = vld [vmem:[#allocation9 + $0xb8] sm:$0xff] }
 0x134   :  { %v397_v14 = vand.u32 2147483647, %v396_v12  ;;  %v3750_v12 = vcombine.low %v151_v60, %v155_v61 }
 0x136   :  { %v400_v16 = vmul.f32 %v399_v13, %v397_v14  ;;  %4503 = vst [vmem:[#allocation17_spill] sm:$0xff] %v3750_v12  ;;  %v3754_v13 = vcombine.high %v158_v4, %v162_v5  ;;  %v3756_v14 = vcombine.high %v159_v6, %v163_v8 }
 0x138   :  { %v401_v22 = vxor.u32 2147483648, %v400_v16  ;;  %4504 = vst [vmem:[#allocation18_spill] sm:$0xff] %v3756_v14 }
 0x13a   :  { %v402_v29 = vsel %vm319_vm8, %v401_v22, %v400_v16  ;;  %v170_v16 = vld [vmem:[#allocation9 + $0xf0] sm:$0xff]  ;;  %v167_v22 = vld [vmem:[#allocation9 + $0xd8] sm:$0xff] }
 0x13b   :  { %v405_v31 = vsel %vm318_vm9, %v3700_v57, %v402_v29  ;;  %v3748_v57 = vcombine.low %v150_v58, %v154_v59  ;;  %v3762_v29 = vcombine.low %v158_v4, %v162_v5  ;;  %v3768_v34 = vcombine.high %v166_v18, %v170_v16  ;;  %v3128_v58 = vld [vmem:[#allocation7 + $0x18] sm:$0xff]  }
 0x13c   :  { %3161 = vcosq.f32 %v405_v31  ;;  %v3770_v17 = vcombine.high %v167_v22, %v171_v26  ;;  %v3774_v44 = vcombine.low %v166_v18, %v170_v16  ;;  %v2702_v18 = vld [vmem:[%s4443_s7] ss:$0 sm:$0xff] }
 0x13d   :  { %3163 = vsinq.f32 %v405_v31  ;;  %v3764_v31 = vcombine.low %v159_v6, %v163_v8  ;;  %v2701_v6 = vld [vmem:[%s4442_s6] ss:$0 sm:$0xff] }
 0x13e   :  { %4506 = vst [vmem:[#allocation20_spill] sm:$0xff] %v3770_v17 }
 0x13f   :  { %4505 = vst [vmem:[#allocation19_spill] sm:$0xff] %v3764_v31 }
 0x146   :  { %v3162_v47 = vpop.eup %3161 }
 0x147   :  { %v3164_v48 = vpop.eup %3163  ;;  %v417_v52 = vxor.u32 2147483648, %v3162_v47 }
 0x148   :  { %v414_v54 = vxor.u32 2147483648, %v3164_v48 }
 0x149   :  { %v418_v1 = vsel %vm416_vm10, %v417_v52, %v3164_v48  ;;  %v3125_v48 = vld [vmem:[#allocation7] sm:$0xff]   ;;  %v4471_v52 = vmov 0.0  }
 0x14a   :  { %v415_v51 = vsel %vm413_vm11, %v3162_v47, %v414_v54  ;;  %v3776_v47 = vcombine.low %v167_v22, %v171_v26  ;;  %v3126_v54 = vld [vmem:[#allocation7 + $0x8] sm:$0xff]  }
 0x14b   :  { %v419_v62 = vsel %vm412_vm12, %v415_v51, %v418_v1  ;;  %v3127_v1 = vld [vmem:[#allocation7 + $0x10] sm:$0xff]  }
 0x14c   :  { %v420_v21 = vsel %vm409_vm13, nan, %v419_v62  ;;  %4507 = vst [vmem:[#allocation21_spill] sm:$0xff] %v3776_v47  ;;  %vm2629_vm13 = vcmask 15360  }
 0x14d   :  { %v421_v55 = vpack.c.bf16 %v420_v21, %v420_v21 }
 0x14f   :  { %2696 = vmatmul.mubr.msk.bf16.vlgmr.msra.gmra.mrb[0].mxu0 %vm623_vm0, %v421_v55  ;;  %2697 = vmatmul.mubr.msk.bf16.vlgmr.msra.gmra.mrb[0].mxu1 %vm623_vm0, %v421_v55 }
 0x150   :  { %710 = vmatpush1.bf16.msra.mxu0 %v3652_v33  ;;  %751 = vmatpush1.bf16.msra.mxu1 %v3657_v36 }
 0x151   :  { %711 = vmatprep.subr.bf16.mxu0 %v3740_v63  ;;  %752 = vmatprep.subr.bf16.mxu1 %v3742_v3 }
 0x152   :  { %741 = vmatprep.mubr.bf16.mxu0 %v4460_v0  ;;  %782 = vmatprep.mubr.bf16.mxu1 %v4460_v0 }
 0x154   :  { %712 = vmatpush1.bf16.msra.mxu0 %v3748_v57  ;;  %753 = vmatpush1.bf16.msra.mxu1 %v3750_v12 }
 0x155   :  { %713 = vmatprep.subr.bf16.mxu0 %v3754_v13  ;;  %754 = vmatprep.subr.bf16.mxu1 %v3756_v14 }
 0x158   :  { %714 = vmatpush1.bf16.msra.mxu0 %v3762_v29  ;;  %755 = vmatpush1.bf16.msra.mxu1 %v3764_v31 }
 0x159   :  { %715 = vmatprep.subr.bf16.mxu0 %v3768_v34  ;;  %756 = vmatprep.subr.bf16.mxu1 %v3770_v17 }
 0x15c   :  { %716 = vmatpush1.bf16.msra.mxu0 %v3774_v44  ;;  %757 = vmatpush1.bf16.msra.mxu1 %v3776_v47 }
 0x15d   :  { %2878 = vmatprep.subr.bf16.mxu0 %v4471_v52  ;;  %2890 = vmatprep.subr.bf16.mxu1 %v4471_v52 }
 0x15f   :  { %2698 = vmatmul.mubr.msk.bf16.vlgmr.msra.gmra.mrb[4].mxu0 %vm623_vm0, %v421_v55  ;;  %2699 = vmatmul.mubr.msk.bf16.vlgmr.msra.gmra.mrb[4].mxu1 %vm623_vm0, %v421_v55 }
 0x160   :  { %2879 = vmatpush3.bf16.msra.mxu0 %v3125_v48  ;;  %2886 = vmatprep.mubr.msk.bf16.mxu0 %vm3435_vm14, %v4471_v52 }
 0x161   :  { %2880 = vmatprep.subr.bf16.mxu0 %v4471_v52  ;;  %2898 = vmatprep.mubr.msk.bf16.mxu1 %vm3435_vm14, %v4471_v52 }
 0x164   :  { %2881 = vmatpush3.bf16.msra.mxu0 %v3126_v54 }
 0x165   :  { %2882 = vmatprep.subr.bf16.mxu0 %v4471_v52 }
 0x168   :  { %2883 = vmatpush3.bf16.msra.mxu0 %v3127_v1 }
 0x169   :  { %2884 = vmatprep.subr.bf16.mxu0 %v4471_v52 }
 0x16c   :  { %2885 = vmatpush3.bf16.msra.mxu0 %v3128_v58 }
 0x16d   :  { %2902 = vmatprep.subr.bf16.mxu0 %v4471_v52 }
 0x191   :  { %v821_v51 = vpop.xlane.xlu1 %820 }
 0x192   :  { %v826_v59 = vmul.f32 0.015625, %v821_v51 }
 0x193   :  { %v825_v60 = vpop.xlane.xlu0 %824 }
 0x194   :  { %v828_v61 = vmul.f32 %v826_v59, %v826_v59  ;;  %v827_v62 = vmul.f32 0.015625, %v825_v60  ;;  %v830_v4 = vsub.f32 %v3705_v2, %v826_v59 }
 0x196   :  { %v829_v21 = vsub.f32 %v827_v62, %v828_v61 }
 0x198   :  { %v831_v55 = vadd.f32 1e-05, %v829_v21 }
 0x19a   :  { %3165 = vrsqrt.f32 %v831_v55 }
 0x1a4   :  { %v3166_v5 = vpop.eup %3165 }
 0x1a5   :  { %v833_v8 = vmul.f32 %v3166_v5, %v830_v4 }
 0x1a7   :  { %v840_v16 = vmul.f32 %v2701_v6, %v833_v8 }
 0x1a9   :  { %v847_v22 = vadd.f32 %v2702_v18, %v840_v16 }
 0x1ab   :  { %v848_v26 = vmul.f32 0.5, %v847_v22 }
 0x1ad   :  { %3167 = vtanh.f32 %v848_v26 }
 0x1b7   :  { %v3168_v48 = vpop.eup %3167 }
 0x1b8   :  { %v850_v54 = vadd.f32 1.0, %v3168_v48 }
 0x1ba   :  { %v851_v1 = vmul.f32 %v850_v54, %v848_v26  ;;  %v2703_v54 = vld [vmem:[%s4445_s9] ss:$0 sm:$0xff] }
 0x1bc   :  { %v852_v58 = vpack.c.bf16 %v851_v1, %v851_v1 }
 0x1be   :  { %2887 = vmatmul.mubr.msk.bf16.vlgmr.msra.gmra.mrb[8].mxu0 %vm623_vm0, %v852_v58 }
 0x1bf   :  { %2910 = vmatprep.mubr.msk.bf16.mxu0 %vm3435_vm14, %v4471_v52 }
 0x222   :  { %v661_v51 = vpop.f32.mrb[0].mxu0  ;;  %v3804_v59 = vpop.f32.mrb[0].mxu1 }
 0x223   :  { %v663_v60 = vpop.f32.mrb[1].mxu0  ;;  %v3806_v61 = vpop.f32.mrb[1].mxu1 }
 0x224   :  { %v665_v62 = vpop.f32.mrb[2].mxu0  ;;  %v706_v21 = vpop.f32.mrb[2].mxu1 }
 0x225   :  { %v666_v55 = vpop.f32.mrb[3].mxu0  ;;  %v707_v4 = vpop.f32.mrb[3].mxu1 }
 0x232   :  { %v3808_v5 = vpop.f32.mrb[4].mxu0  ;;  %v3810_v6 = vpop.f32.mrb[4].mxu1 }
 0x233   :  { %v3812_v8 = vpop.f32.mrb[5].mxu0  ;;  %v3814_v18 = vpop.f32.mrb[5].mxu1 }
 0x234   :  { %v747_v16 = vpop.f32.mrb[6].mxu0  ;;  %v788_v22 = vpop.f32.mrb[6].mxu1 }
 0x235   :  { %v748_v26 = vpop.f32.mrb[7].mxu0  ;;  %v789_v48 = vpop.f32.mrb[7].mxu1  ;;  %v3129_v16 = vld [vmem:[#allocation10] sm:$0xff]   ;;  %v3130_v22 = vld [vmem:[#allocation10 + $0x8] sm:$0xff]  }
 0x236   :  { %2891 = vmatpush3.bf16.msra.mxu1 %v3129_v16  ;;  %v3131_v26 = vld [vmem:[#allocation10 + $0x10] sm:$0xff]   ;;  %v3132_v48 = vld [vmem:[#allocation10 + $0x18] sm:$0xff]  }
 0x237   :  { %2892 = vmatprep.subr.bf16.mxu1 %v4471_v52 }
 0x23a   :  { %2893 = vmatpush3.bf16.msra.mxu1 %v3130_v22 }
 0x23b   :  { %2894 = vmatprep.subr.bf16.mxu1 %v4471_v52 }
 0x23e   :  { %2895 = vmatpush3.bf16.msra.mxu1 %v3131_v26  ;;  %v2709_v26 = vld [vmem:[%s4448_s12] ss:$0 sm:$0xff] }
 0x23f   :  { %2896 = vmatprep.subr.bf16.mxu1 %v4471_v52 }
 0x242   :  { %2897 = vmatpush3.bf16.msra.mxu1 %v3132_v48 }
 0x243   :  { %2914 = vmatprep.subr.bf16.mxu1 %v4471_v52 }
 0x291   :  { %v920_v1 = vpop.f32.mrb[8].mxu0 }
 0x292   :  { %v921_v58 = vadd.f32 %v2703_v54, %v920_v1  ;;  %v2888_v62 = vpop.f32.mrb[9].mxu0 }
 0x293   :  { %v923_v21 = vpop.f32.mrb[10].mxu0 }
 0x294   :  { %v2889_v55 = vpop.f32.mrb[11].mxu0  ;;  %v926_v4 = vsel %vm623_vm0, %v921_v58, 0.0  ;;  %v929_v0 = vmul.f32 %v921_v58, %v921_v58 }
 0x295   :  { %927 = vadd.xlane.f32.xlu1 %v926_v4  ;;  %v3828_v4 = vld [vmem:[%s4447_s11] sm:$0xff] }
 0x296   :  { %v930_v28 = vsel %vm623_vm0, %v929_v0, 0.0  ;;  %v3836_v48 = vrot.slane %v3828_v4, %v425_v46 }
 0x297   :  { %931 = vadd.xlane.f32.xlu0 %v930_v28 }
 0x298   :  { %4508 = vst [vmem:[#allocation22_spill] sm:$0xff] %v3836_v48 }
 0x322   :  { %v928_v54 = vpop.xlane.xlu1 %927 }
 0x323   :  { %v933_v1 = vmul.f32 0.015625, %v928_v54 }
 0x324   :  { %v932_v0 = vpop.xlane.xlu0 %931 }
 0x325   :  { %v935_v28 = vmul.f32 %v933_v1, %v933_v1  ;;  %v934_v62 = vmul.f32 0.015625, %v932_v0  ;;  %v937_v16 = vsub.f32 %v921_v58, %v933_v1  ;;  %v2710_v0 = vld [vmem:[%s4449_s13] ss:$0 sm:$0xff]  ;;  %v662_v1 = vadd.f32 %v661_v51, %v3836_v48 }
 0x327   :  { %v936_v21 = vsub.f32 %v934_v62, %v935_v28  ;;  %v3844_v28 = vrot.slane %v3828_v4, %v429_v50  ;;  %v2711_v50 = vld [vmem:[%s4451_s15] ss:$0 sm:$0xff] }
 0x329   :  { %v938_v55 = vadd.f32 1e-05, %v936_v21  ;;  %4509 = vst [vmem:[#allocation23_spill] sm:$0xff] %v3844_v28  ;;  %v664_v21 = vadd.f32 %v663_v60, %v3844_v28 }
 0x32b   :  { %3169 = vrsqrt.f32 %v938_v55 }
 0x335   :  { %v3170_v22 = vpop.eup %3169 }
 0x336   :  { %v940_v54 = vmul.f32 %v3170_v22, %v937_v16 }
 0x338   :  { %v947_v58 = vmul.f32 %v2709_v26, %v940_v54 }
 0x33a   :  { %v954_v62 = vadd.f32 %v2710_v0, %v947_v58 }
 0x33c   :  { %v955_v55 = vmul.f32 %v954_v62, %v662_v1  ;;  %v3862_v1 = vld [vmem:[#allocation7 + $0x20] sm:$0xff]   ;;  %v3865_v62 = vld [vmem:[#allocation7 + $0x28] sm:$0xff]  }
 0x33d   :  { %2903 = vmatpush3.bf16.msra.mxu0 %v3862_v1 }
 0x33e   :  { %v956_v25 = vadd.f32 %v955_v55, %v664_v21  ;;  %2904 = vmatprep.subr.bf16.mxu0 %v4471_v52  ;;  %v3873_v21 = vld [vmem:[#allocation7 + $0x38] sm:$0xff]  }
 0x340   :  { %v957_v46 = vmul.f32 0.5, %v956_v25 }
 0x341   :  { %2905 = vmatpush3.bf16.msra.mxu0 %v3865_v62 }
 0x342   :  { %3171 = vtanh.f32 %v957_v46  ;;  %2906 = vmatprep.subr.bf16.mxu0 %v4471_v52 }
 0x34c   :  { %v3172_v16 = vpop.eup %3171 }
 0x34d   :  { %v959_v22 = vadd.f32 1.0, %v3172_v16 }
 0x34f   :  { %v960_v30 = vmul.f32 %v959_v22, %v957_v46 }
 0x351   :  { %v961_v53 = vpack.c.bf16 %v960_v30, %v960_v30 }
 0x353   :  { %2899 = vmatmul.mubr.msk.bf16.vlgmr.msra.gmra.mrb[8].mxu1 %vm623_vm0, %v961_v53 }
 0x354   :  { %2922 = vmatprep.mubr.msk.bf16.mxu1 %vm3435_vm14, %v4471_v52 }
 0x426   :  { %v1029_v51 = vpop.f32.mrb[8].mxu1 }
 0x427   :  { %v1030_v26 = vadd.f32 %v2711_v50, %v1029_v51  ;;  %v2900_v60 = vpop.f32.mrb[9].mxu1 }
 0x428   :  { %v1032_v54 = vpop.f32.mrb[10].mxu1 }
 0x429   :  { %v3855_v25 = vadd.f32 %v1030_v26, %v3705_v2  ;;  %v2901_v0 = vpop.f32.mrb[11].mxu1  ;;  %v3869_v2 = vld [vmem:[#allocation7 + $0x30] sm:$0xff]  }
 0x42a   :  { %2907 = vmatpush3.bf16.msra.mxu0 %v3869_v2  ;;  %v2717_v0 = vld [vmem:[%s4442_s6 + $0x1] ss:$0 sm:$0xff] }
 0x42b   :  { %v1036_v30 = vsel %vm623_vm0, %v3855_v25, 0.0  ;;  %v1039_v53 = vmul.f32 %v3855_v25, %v3855_v25  ;;  %2908 = vmatprep.subr.bf16.mxu0 %v4471_v52 }
 0x42c   :  { %1037 = vadd.xlane.f32.xlu1 %v1036_v30 }
 0x42d   :  { %v1040_v58 = vsel %vm623_vm0, %v1039_v53, 0.0  ;;  %v2718_v53 = vld [vmem:[%s4443_s7 + $0x1] ss:$0 sm:$0xff] }
 0x42e   :  { %1041 = vadd.xlane.f32.xlu0 %v1040_v58  ;;  %2909 = vmatpush3.bf16.msra.mxu0 %v3873_v21 }
 0x42f   :  { %2926 = vmatprep.subr.bf16.mxu0 %v4471_v52 }
 0x4b9   :  { %v1038_v55 = vpop.xlane.xlu1 %1037 }
 0x4ba   :  { %v1043_v46 = vmul.f32 0.015625, %v1038_v55 }
 0x4bb   :  { %v1042_v16 = vpop.xlane.xlu0 %1041 }
 0x4bc   :  { %v1045_v22 = vmul.f32 %v1043_v46, %v1043_v46  ;;  %v1044_v50 = vmul.f32 0.015625, %v1042_v16  ;;  %v1047_v60 = vsub.f32 %v3855_v25, %v1043_v46  ;;  %v2719_v46 = vld [vmem:[%s4445_s9 + $0x1] ss:$0 sm:$0xff] }
 0x4be   :  { %v1046_v51 = vsub.f32 %v1044_v50, %v1045_v22 }
 0x4c0   :  { %v1048_v26 = vadd.f32 1e-05, %v1046_v51 }
 0x4c2   :  { %3173 = vrsqrt.f32 %v1048_v26 }
 0x4cc   :  { %v3174_v54 = vpop.eup %3173 }
 0x4cd   :  { %v1050_v30 = vmul.f32 %v3174_v54, %v1047_v60 }
 0x4cf   :  { %v1057_v58 = vmul.f32 %v2717_v0, %v1050_v30 }
 0x4d1   :  { %v1064_v55 = vadd.f32 %v2718_v53, %v1057_v58 }
 0x4d3   :  { %v1065_v32 = vmul.f32 0.5, %v1064_v55  ;;  %v3137_v55 = vld [vmem:[#allocation10 + $0x20] sm:$0xff]  }
 0x4d4   :  { %2915 = vmatpush3.bf16.msra.mxu1 %v3137_v55 }
 0x4d5   :  { %3175 = vtanh.f32 %v1065_v32  ;;  %2916 = vmatprep.subr.bf16.mxu1 %v4471_v52 }
 0x4df   :  { %v3176_v16 = vpop.eup %3175 }
 0x4e0   :  { %v1067_v22 = vadd.f32 1.0, %v3176_v16  ;;  %v3138_v16 = vld [vmem:[#allocation10 + $0x28] sm:$0xff]  }
 0x4e1   :  { %2917 = vmatpush3.bf16.msra.mxu1 %v3138_v16 }
 0x4e2   :  { %v1068_v50 = vmul.f32 %v1067_v22, %v1065_v32  ;;  %v3139_v22 = vld [vmem:[#allocation10 + $0x30] sm:$0xff]   ;;  %2918 = vmatprep.subr.bf16.mxu1 %v4471_v52 }
 0x4e4   :  { %v1069_v51 = vpack.c.bf16 %v1068_v50, %v1068_v50  ;;  %v3140_v50 = vld [vmem:[#allocation10 + $0x38] sm:$0xff]  }
 0x4e5   :  { %2919 = vmatpush3.bf16.msra.mxu1 %v3139_v22  ;;  %v2725_v22 = vld [vmem:[%s4448_s12 + $0x1] ss:$0 sm:$0xff] }
 0x4e6   :  { %2911 = vmatmul.mubr.msk.bf16.vlgmr.msra.gmra.mrb[12].mxu0 %vm623_vm0, %v1069_v51  ;;  %2920 = vmatprep.subr.bf16.mxu1 %v4471_v52 }
 0x4e7   :  { %2934 = vmatprep.mubr.msk.bf16.mxu0 %vm3435_vm14, %v4471_v52 }
 0x4e9   :  { %2921 = vmatpush3.bf16.msra.mxu1 %v3140_v50 }
 0x4ea   :  { %2938 = vmatprep.subr.bf16.mxu1 %v4471_v52 }
 0x5b9   :  { %v1137_v26 = vpop.f32.mrb[12].mxu0 }
 0x5ba   :  { %v1138_v60 = vadd.f32 %v2719_v46, %v1137_v26  ;;  %v2912_v54 = vpop.f32.mrb[13].mxu0 }
 0x5bb   :  { %v1140_v0 = vpop.f32.mrb[14].mxu0 }
 0x5bc   :  { %v2913_v30 = vpop.f32.mrb[15].mxu0  ;;  %v1143_v53 = vsel %vm623_vm0, %v1138_v60, 0.0  ;;  %v1146_v58 = vmul.f32 %v1138_v60, %v1138_v60 }
 0x5bd   :  { %1144 = vadd.xlane.f32.xlu1 %v1143_v53 }
 0x5be   :  { %v1147_v32 = vsel %vm623_vm0, %v1146_v58, 0.0  ;;  %v433_v58 = vsub.s32 2, %v3684_v45 }
 0x5bf   :  { %1148 = vadd.xlane.f32.xlu0 %v1147_v32  ;;  %v437_v32 = vsub.s32 3, %v3684_v45 }
 0x5c0   :  { %v3903_v50 = vrot.slane %v3828_v4, %v433_v58 }
 0x5c2   :  { %4510 = vst [vmem:[#allocation24_spill] sm:$0xff] %v3903_v50 }
 0x64a   :  { %v1145_v51 = vpop.xlane.xlu1 %1144 }
 0x64b   :  { %v1150_v46 = vmul.f32 0.015625, %v1145_v51 }
 0x64c   :  { %v1149_v26 = vpop.xlane.xlu0 %1148 }
 0x64d   :  { %v1152_v54 = vmul.f32 %v1150_v46, %v1150_v46  ;;  %v1151_v0 = vmul.f32 0.015625, %v1149_v26  ;;  %v1154_v55 = vsub.f32 %v1138_v60, %v1150_v46  ;;  %v2726_v26 = vld [vmem:[%s4449_s13 + $0x1] ss:$0 sm:$0xff]  ;;  %v703_v60 = vadd.f32 %v3804_v59, %v3903_v50 }
 0x64e   :  { %v2727_v59 = vld [vmem:[%s4451_s15 + $0x1] ss:$0 sm:$0xff] }
 0x64f   :  { %v1153_v30 = vsub.f32 %v1151_v0, %v1152_v54  ;;  %v3909_v54 = vrot.slane %v3828_v4, %v437_v32  ;;  %v4512_v32 = vmov 0.0  }
 0x651   :  { %v1155_v53 = vadd.f32 1e-05, %v1153_v30  ;;  %4511 = vst [vmem:[#allocation25_spill] sm:$0xff] %v3909_v54  ;;  %v705_v30 = vadd.f32 %v3806_v61, %v3909_v54 }
 0x653   :  { %3177 = vrsqrt.f32 %v1155_v53 }
 0x65d   :  { %v3178_v16 = vpop.eup %3177 }
 0x65e   :  { %v1157_v51 = vmul.f32 %v3178_v16, %v1154_v55 }
 0x660   :  { %v1164_v0 = vmul.f32 %v2725_v22, %v1157_v51 }
 0x662   :  { %v1171_v46 = vadd.f32 %v2726_v26, %v1164_v0 }
 0x664   :  { %v1172_v53 = vmul.f32 %v1171_v46, %v703_v60  ;;  %v3141_v46 = vld [vmem:[#allocation7 + $0x40] sm:$0xff]  }
 0x665   :  { %2927 = vmatpush3.bf16.msra.mxu0 %v3141_v46 }
 0x666   :  { %v1173_v52 = vadd.f32 %v1172_v53, %v705_v30  ;;  %v3142_v30 = vld [vmem:[#allocation7 + $0x48] sm:$0xff]   ;;  %2928 = vmatprep.subr.bf16.mxu0 %v4512_v32  ;;  %v3143_v53 = vld [vmem:[#allocation7 + $0x50] sm:$0xff]  }
 0x668   :  { %v1174_v58 = vmul.f32 0.5, %v1173_v52 }
 0x669   :  { %2929 = vmatpush3.bf16.msra.mxu0 %v3142_v30 }
 0x66a   :  { %3179 = vtanh.f32 %v1174_v58  ;;  %2930 = vmatprep.subr.bf16.mxu0 %v4512_v32 }
 0x66d   :  { %2931 = vmatpush3.bf16.msra.mxu0 %v3143_v53 }
 0x66e   :  { %2932 = vmatprep.subr.bf16.mxu0 %v4512_v32 }
 0x674   :  { %v3180_v55 = vpop.eup %3179 }
 0x675   :  { %v1176_v16 = vadd.f32 1.0, %v3180_v55 }
 0x677   :  { %v1177_v28 = vmul.f32 %v1176_v16, %v1174_v58 }
 0x679   :  { %v1178_v48 = vpack.c.bf16 %v1177_v28, %v1177_v28 }
 0x67b   :  { %2923 = vmatmul.mubr.msk.bf16.vlgmr.msra.gmra.mrb[12].mxu1 %vm623_vm0, %v1178_v48 }
 0x67c   :  { %2946 = vmatprep.mubr.msk.bf16.mxu1 %vm3435_vm14, %v4512_v32 }
 0x74e   :  { %v1246_v22 = vpop.f32.mrb[12].mxu1 }
 0x74f   :  { %v1247_v51 = vadd.f32 %v2727_v59, %v1246_v22  ;;  %v2924_v61 = vpop.f32.mrb[13].mxu1 }
 0x750   :  { %v1249_v26 = vpop.f32.mrb[14].mxu1 }
 0x751   :  { %v3922_v52 = vadd.f32 %v1247_v51, %v3855_v25  ;;  %v2925_v0 = vpop.f32.mrb[15].mxu1  ;;  %v3144_v25 = vld [vmem:[#allocation7 + $0x58] sm:$0xff]  }
 0x752   :  { %2933 = vmatpush3.bf16.msra.mxu0 %v3144_v25 }
 0x753   :  { %v1253_v28 = vsel %vm623_vm0, %v3922_v52, 0.0  ;;  %v1256_v48 = vmul.f32 %v3922_v52, %v3922_v52  ;;  %2950 = vmatprep.subr.bf16.mxu0 %v4512_v32 }
 0x754   :  { %1254 = vadd.xlane.f32.xlu1 %v1253_v28  ;;  %v2733_v28 = vld [vmem:[%s4442_s6 + $0x2] ss:$0 sm:$0xff] }
 0x755   :  { %v1257_v60 = vsel %vm623_vm0, %v1256_v48, 0.0 }
 0x756   :  { %1258 = vadd.xlane.f32.xlu0 %v1257_v60  ;;  %v2734_v60 = vld [vmem:[%s4443_s7 + $0x2] ss:$0 sm:$0xff] }
 0x7e1   :  { %v1255_v58 = vpop.xlane.xlu1 %1254 }
 0x7e2   :  { %v1260_v55 = vmul.f32 0.015625, %v1255_v58 }
 0x7e3   :  { %v1259_v16 = vpop.xlane.xlu0 %1258 }
 0x7e4   :  { %v1262_v59 = vmul.f32 %v1260_v55, %v1260_v55  ;;  %v1261_v22 = vmul.f32 0.015625, %v1259_v16  ;;  %v1264_v26 = vsub.f32 %v3922_v52, %v1260_v55  ;;  %v2735_v55 = vld [vmem:[%s4445_s9 + $0x2] ss:$0 sm:$0xff] }
 0x7e6   :  { %v1263_v51 = vsub.f32 %v1261_v22, %v1262_v59 }
 0x7e8   :  { %v1265_v61 = vadd.f32 1e-05, %v1263_v51 }
 0x7ea   :  { %3181 = vrsqrt.f32 %v1265_v61 }
 0x7f4   :  { %v3182_v0 = vpop.eup %3181 }
 0x7f5   :  { %v1267_v48 = vmul.f32 %v3182_v0, %v1264_v26 }
 0x7f7   :  { %v1274_v46 = vmul.f32 %v2733_v28, %v1267_v48 }
 0x7f9   :  { %v1281_v30 = vadd.f32 %v2734_v60, %v1274_v46  ;;  %v3145_v46 = vld [vmem:[#allocation10 + $0x40] sm:$0xff]  }
 0x7fa   :  { %2939 = vmatpush3.bf16.msra.mxu1 %v3145_v46  ;;  %v2741_v46 = vld [vmem:[%s4448_s12 + $0x2] ss:$0 sm:$0xff] }
 0x7fb   :  { %v1282_v53 = vmul.f32 0.5, %v1281_v30  ;;  %v3146_v30 = vld [vmem:[#allocation10 + $0x48] sm:$0xff]   ;;  %2940 = vmatprep.subr.bf16.mxu1 %v4512_v32 }
 0x7fd   :  { %3183 = vtanh.f32 %v1282_v53 }
 0x7fe   :  { %2941 = vmatpush3.bf16.msra.mxu1 %v3146_v30 }
 0x7ff   :  { %2942 = vmatprep.subr.bf16.mxu1 %v4512_v32 }
 0x807   :  { %v3184_v25 = vpop.eup %3183 }
 0x808   :  { %v1284_v58 = vadd.f32 1.0, %v3184_v25  ;;  %v3950_v25 = vld [vmem:[#allocation10 + $0x58] sm:$0xff]  }
 0x809   :  { %4513 = vst [vmem:[#allocation26_spill] sm:$0xff] %v3950_v25 }
 0x80a   :  { %v1285_v16 = vmul.f32 %v1284_v58, %v1282_v53  ;;  %v3147_v53 = vld [vmem:[#allocation10 + $0x50] sm:$0xff]  }
 0x80b   :  { %2943 = vmatpush3.bf16.msra.mxu1 %v3147_v53 }
 0x80c   :  { %v1286_v59 = vpack.c.bf16 %v1285_v16, %v1285_v16  ;;  %2944 = vmatprep.subr.bf16.mxu1 %v4512_v32 }
 0x80e   :  { %2935 = vmatmul.mubr.msk.bf16.vlgmr.msra.gmra.mrb[16].mxu0 %vm623_vm0, %v1286_v59 }
 0x80f   :  { %2958 = vmatprep.mubr.msk.bf16.mxu0 %vm3435_vm14, %v4512_v32  ;;  %2945 = vmatpush3.bf16.msra.mxu1 %v3950_v25 }
 0x810   :  { %2962 = vmatprep.subr.bf16.mxu1 %v4512_v32 }
 0x8e1   :  { %v1354_v22 = vpop.f32.mrb[16].mxu0 }
 0x8e2   :  { %v1355_v51 = vadd.f32 %v2735_v55, %v1354_v22  ;;  %v2936_v61 = vpop.f32.mrb[17].mxu0 }
 0x8e3   :  { %v1357_v26 = vpop.f32.mrb[18].mxu0 }
 0x8e4   :  { %v2937_v0 = vpop.f32.mrb[19].mxu0  ;;  %v1360_v28 = vsel %vm623_vm0, %v1355_v51, 0.0  ;;  %v1363_v48 = vmul.f32 %v1355_v51, %v1355_v51 }
 0x8e5   :  { %1361 = vadd.xlane.f32.xlu1 %v1360_v28  ;;  %v441_v0 = vsub.s32 4, %v3684_v45  ;;  %v445_v28 = vsub.s32 5, %v3684_v45 }
 0x8e6   :  { %v1364_v60 = vsel %vm623_vm0, %v1363_v48, 0.0 }
 0x8e7   :  { %1365 = vadd.xlane.f32.xlu0 %v1364_v60  ;;  %v3961_v30 = vrot.slane %v3828_v4, %v441_v0 }
 0x8e9   :  { %4514 = vst [vmem:[#allocation27_spill] sm:$0xff] %v3961_v30 }
 0x972   :  { %v1362_v58 = vpop.xlane.xlu1 %1361 }
 0x973   :  { %v1367_v16 = vmul.f32 0.015625, %v1362_v58  ;;  %v2742_v58 = vld [vmem:[%s4449_s13 + $0x2] ss:$0 sm:$0xff] }
 0x974   :  { %v1366_v59 = vpop.xlane.xlu0 %1365 }
 0x975   :  { %v1369_v55 = vmul.f32 %v1367_v16, %v1367_v16  ;;  %v1368_v22 = vmul.f32 0.015625, %v1366_v59  ;;  %v1371_v48 = vsub.f32 %v1355_v51, %v1367_v16  ;;  %v3967_v59 = vrot.slane %v3828_v4, %v445_v28 }
 0x976   :  { %v744_v51 = vadd.f32 %v3808_v5, %v3961_v30  ;;  %v2743_v5 = vld [vmem:[%s4451_s15 + $0x2] ss:$0 sm:$0xff]  ;;  %v4527_v30 = vmov 2475754826  }
 0x977   :  { %v1370_v61 = vsub.f32 %v1368_v22, %v1369_v55  ;;  %4515 = vst [vmem:[#allocation28_spill] sm:$0xff] %v3967_v59  ;;  %v746_v22 = vadd.f32 %v3812_v8, %v3967_v59 }
 0x979   :  { %v1372_v26 = vadd.f32 1e-05, %v1370_v61 }
 0x97b   :  { %3185 = vrsqrt.f32 %v1372_v26 }
 0x985   :  { %v3186_v60 = vpop.eup %3185 }
 0x986   :  { %v1374_v53 = vmul.f32 %v3186_v60, %v1371_v48 }
 0x988   :  { %v1381_v55 = vmul.f32 %v2741_v46, %v1374_v53 }
 0x98a   :  { %v1388_v16 = vadd.f32 %v2742_v58, %v1381_v55 }
 0x98c   :  { %v1389_v61 = vmul.f32 %v1388_v16, %v744_v51  ;;  %v295_v16 = vld [vmem:[%s4500_s5 + $0x8] sm:$0xff] }
 0x98e   :  { %v1390_v26 = vadd.f32 %v1389_v61, %v746_v22  ;;  %v3993_v22 = vld [vmem:[#allocation7 + $0x60] sm:$0xff]   ;;  %v3997_v61 = vld [vmem:[#allocation7 + $0x68] sm:$0xff]  }
 0x98f   :  { %4516 = vst [vmem:[#allocation29_spill] sm:$0xff] %v3993_v22  ;;  %2951 = vmatpush3.bf16.msra.mxu0 %v3993_v22  ;;  %4517 = vst [vmem:[#allocation30_spill] sm:$0xff] %v3997_v61  ;;  %v4529_v22 = vmov 683565275  }
 0x990   :  { %v1391_v0 = vmul.f32 0.5, %v1390_v26  ;;  %2952 = vmatprep.subr.bf16.mxu0 %v4512_v32  ;;  %v4001_v26 = vld [vmem:[#allocation7 + $0x70] sm:$0xff]  }
 0x991   :  { %4518 = vst [vmem:[#allocation31_spill] sm:$0xff] %v4001_v26 }
 0x992   :  { %3187 = vtanh.f32 %v1391_v0 }
 0x993   :  { %2953 = vmatpush3.bf16.msra.mxu0 %v3997_v61 }
 0x994   :  { %2954 = vmatprep.subr.bf16.mxu0 %v4512_v32 }
 0x997   :  { %2955 = vmatpush3.bf16.msra.mxu0 %v4001_v26  ;;  %v4528_v26 = vmov 2131351028  }
 0x998   :  { %2956 = vmatprep.subr.bf16.mxu0 %v4512_v32 }
 0x99c   :  { %v3188_v48 = vpop.eup %3187 }
 0x99d   :  { %v1393_v60 = vadd.f32 1.0, %v3188_v48 }
 0x99f   :  { %v1394_v25 = vmul.f32 %v1393_v60, %v1391_v0  ;;  %v4005_v0 = vld [vmem:[#allocation7 + $0x78] sm:$0xff]  }
 0x9a0   :  { %4519 = vst [vmem:[#allocation32_spill] sm:$0xff] %v4005_v0  ;;  %2957 = vmatpush3.bf16.msra.mxu0 %v4005_v0 }
 0x9a1   :  { %v1395_v54 = vpack.c.bf16 %v1394_v25, %v1394_v25  ;;  %2974 = vmatprep.subr.bf16.mxu0 %v4512_v32 }
 0x9a3   :  { %2947 = vmatmul.mubr.msk.bf16.vlgmr.msra.gmra.mrb[16].mxu1 %vm623_vm0, %v1395_v54 }
 0x9a4   :  { %2970 = vmatprep.mubr.msk.bf16.mxu1 %vm3435_vm14, %v4512_v32 }
 0xa76   :  { %v1463_v28 = vpop.f32.mrb[16].mxu1 }
 0xa77   :  { %v1464_v46 = vadd.f32 %v2743_v5, %v1463_v28  ;;  %v2948_v8 = vpop.f32.mrb[17].mxu1 }
 0xa78   :  { %v1466_v53 = vpop.f32.mrb[18].mxu1 }
 0xa79   :  { %v3980_v58 = vadd.f32 %v1464_v46, %v3922_v52  ;;  %v2949_v55 = vpop.f32.mrb[19].mxu1  ;;  %v297_v52 = vld [vmem:[%s4499_s14 + $0x8] sm:$0xff] }
 0xa7b   :  { %v1470_v25 = vsel %vm623_vm0, %v3980_v58, 0.0  ;;  %v1473_v54 = vmul.f32 %v3980_v58, %v3980_v58 }
 0xa7c   :  { %1471 = vadd.xlane.f32.xlu1 %v1470_v25 }
 0xa7d   :  { %v1474_v51 = vsel %vm623_vm0, %v1473_v54, 0.0  ;;  %v2749_v54 = vld [vmem:[%s4442_s6 + $0x3] ss:$0 sm:$0xff] }
 0xa7e   :  { %1475 = vadd.xlane.f32.xlu0 %v1474_v51 }
 0xa8d   :  { %2042 = vperm.xlu1 %3124, %v295_v16  }
 0xa91   :  { %1763 = vperm.xlu1 %3124, %v297_v52   ;;  %v2750_v52 = vld [vmem:[%s4443_s7 + $0x3] ss:$0 sm:$0xff] }
 0xa94   :  { %2048 = vperm.xlu0 %3123, %v295_v16  }
 0xb09   :  { %v1472_v48 = vpop.xlane.xlu1 %1471 }
 0xb0a   :  { %v1477_v60 = vmul.f32 0.015625, %v1472_v48 }
 0xb0b   :  { %v1476_v5 = vpop.xlane.xlu0 %1475 }
 0xb0c   :  { %v1479_v28 = vmul.f32 %v1477_v60, %v1477_v60  ;;  %v1478_v46 = vmul.f32 0.015625, %v1476_v5  ;;  %v1481_v55 = vsub.f32 %v3980_v58, %v1477_v60 }
 0xb0d   :  { %v2043_v60 = vpop.permute.xlu1 %2042 }
 0xb0e   :  { %v1480_v8 = vsub.f32 %v1478_v46, %v1479_v28 }
 0xb10   :  { %v1482_v53 = vadd.f32 1e-05, %v1480_v8 }
 0xb12   :  { %3189 = vrsqrt.f32 %v1482_v53 }
 0xb13   :  { %v2049_v53 = vpop.permute.xlu0 %2048 }
 0xb1c   :  { %v3190_v25 = vpop.eup %3189 }
 0xb1d   :  { %v1484_v51 = vmul.f32 %v3190_v25, %v1481_v55  ;;  %v2045_v55 = vmul.f32 %v2043_v60, %v3692_v49  ;;  %v2051_v25 = vmul.f32 %v2049_v53, %v3698_v56 }
 0xb1f   :  { %v1491_v16 = vmul.f32 %v2749_v54, %v1484_v51  ;;  %v3233_v54 = vld [vmem:[#allocation6] ss:$0 sm:$0xff] }
 0xb20   :  { %v2046_v51 = vadd.f32 %v3233_v54, %v2045_v55  ;;  %v3234_v54 = vld [vmem:[%s4501_s20] ss:$0 sm:$0xff] }
 0xb21   :  { %v1498_v48 = vadd.f32 %v2750_v52, %v1491_v16  ;;  %v2751_v16 = vld [vmem:[%s4445_s9 + $0x3] ss:$0 sm:$0xff] }
 0xb22   :  { %v4024_v52 = vadd.f32 %v2051_v25, %v2046_v51  ;;  %v1764_v25 = vpop.permute.xlu1 %1763 }
 0xb23   :  { %v1499_v59 = vmul.f32 0.5, %v1498_v48  ;;  %v1766_v51 = vmul.f32 %v3234_v54, %v1764_v25 }
 0xb24   :  { %v2056_v56 = vmul.f32 %v4024_v52, %v4024_v52  ;;  %v2053_v55 = vsel %vm623_vm0, %v4024_v52, 0.0 }
 0xb25   :  { %3191 = vtanh.f32 %v1499_v59 }
 0xb26   :  { %v2057_v53 = vsel %vm623_vm0, %v2056_v56, 0.0 }
 0xb2f   :  { %v3192_v5 = vpop.eup %3191 }
 0xb30   :  { %v1501_v28 = vadd.f32 1.0, %v3192_v5 }
 0xb32   :  { %v1502_v46 = vmul.f32 %v1501_v28, %v1499_v59 }
 0xb34   :  { %v1503_v8 = vpack.c.bf16 %v1502_v46, %v1502_v46 }
 0xb36   :  { %2959 = vmatmul.mubr.msk.bf16.vlgmr.msra.gmra.mrb[20].mxu0 %vm623_vm0, %v1503_v8 }
 0xb37   :  { %2982 = vmatprep.mubr.msk.bf16.mxu0 %vm3435_vm14, %v4512_v32 }
 0xc09   :  { %v1571_v59 = vpop.f32.mrb[20].mxu0 }
 0xc0a   :  { %v4026_v48 = vadd.f32 %v2751_v16, %v1571_v59  ;;  %v2960_v5 = vpop.f32.mrb[21].mxu0  ;;  %v3235_v16 = vld [vmem:[#allocation2] ss:$0 sm:$0xff] }
 0xc0b   :  { %v1574_v28 = vpop.f32.mrb[22].mxu0  ;;  %v4041_v59 = vadd.f32 %v3235_v16, %v1766_v51  ;;  %v4524_v51 = vmov 920167782  }
 0xc0c   :  { %v2961_v46 = vpop.f32.mrb[23].mxu0  ;;  %v1577_v8 = vsel %vm623_vm0, %v4026_v48, 0.0  ;;  %v1580_v49 = vmul.f32 %v4026_v48, %v4026_v48 }
 0xc0d   :  { %1578 = vadd.xlane.f32.xlu1 %v1577_v8  ;;  %v1771_v5 = vand.u32 2139095040, %v4041_v59  ;;  %v4044_v46 = vld [vmem:[#allocation10 + $0x60] sm:$0xff]   ;;  %vm1770_vm7 = vcmp.lt.s32.totalorder %v4041_v59, 0  ;;  %vm1860_vm12 = vweird.f32 %v4041_v59 }
 0xc0e   :  { %v1581_v60 = vsel %vm623_vm0, %v1580_v49, 0.0  ;;  %4520 = vst [vmem:[#allocation33_spill] sm:$0xff] %v4044_v46  ;;  %2963 = vmatpush3.bf16.msra.mxu1 %v4044_v46  ;;  %v4048_v49 = vld [vmem:[#allocation10 + $0x68] sm:$0xff]  }
 0xc0f   :  { %1582 = vadd.xlane.f32.xlu0 %v1581_v60  ;;  %v1772_v28 = vshrl.u32 %v1771_v5, 23  ;;  %2964 = vmatprep.subr.bf16.mxu1 %v4512_v32  ;;  %4521 = vst [vmem:[#allocation34_spill] sm:$0xff] %v4048_v49  ;;  %v4052_v60 = vld [vmem:[#allocation10 + $0x70] sm:$0xff]   ;;  %v4525_v5 = vmov 1326507024  }
 0xc10   :  { %4522 = vst [vmem:[#allocation35_spill] sm:$0xff] %v4052_v60 }
 0xc11   :  { %2058 = vadd.xlane.f32.xlu1 %v2057_v53  ;;  %v2771_v8 = vadd.s32 4294967169, %v1772_v28  ;;  %v4056_v53 = vld [vmem:[#allocation10 + $0x78] sm:$0xff]  }
 0xc12   :  { %2965 = vmatpush3.bf16.msra.mxu1 %v4048_v49  ;;  %4523 = vst [vmem:[#allocation36_spill] sm:$0xff] %v4056_v53 }
 0xc13   :  { %2054 = vadd.xlane.f32.xlu0 %v2053_v55  ;;  %v1778_v56 = vadd.s32 1, %v2771_v8  ;;  %2966 = vmatprep.subr.bf16.mxu1 %v4512_v32  ;;  %v4494_v8 = vand.u32 2147483647, %v4041_v59 }
 0xc15   :  { %vm1779_vm15 = vcmp.gt.s32.totalorder %v1778_v56, 0 }
 0xc16   :  { %2967 = vmatpush3.bf16.msra.mxu1 %v4052_v60  ;;  %v1780_v55 = vsel %vm1779_vm15, %v1778_v56, 0  ;;  %v4526_v60 = vmov 2102212464  }
 0xc17   :  { %2968 = vmatprep.subr.bf16.mxu1 %v4512_v32  ;;  %v1782_v25 = vand.u32 31, %v1780_v55  ;;  %v1781_v49 = vshrl.u32 %v1780_v55, 5  ;;  %v1775_v55 = vand.u32 8388607, %v4494_v8 }
 0xc19   :  { %v1783_v54 = vsub.s32 32, %v1782_v25  ;;  %v1794_v46 = vshll.u32 %v4526_v60, %v1782_v25  ;;  %v1785_v50 = vshll.u32 %v4529_v22, %v1782_v25  ;;  %v1788_v47 = vshll.u32 %v4527_v30, %v1782_v25 }
 0xc1a   :  { %2969 = vmatpush3.bf16.msra.mxu1 %v4056_v53  ;;  %v1797_v53 = vshll.u32 %v4524_v51, %v1782_v25  ;;  %vm1803_vm1 = vcmp.lt.s32.totalorder %v1781_v49, 4  ;;  %vm1800_vm2 = vcmp.lt.s32.totalorder %v1781_v49, 1  ;;  %vm1802_vm3 = vcmp.lt.s32.totalorder %v1781_v49, 3 }
 0xc1b   :  { %1876 = vmatprep.subr.bf16.mxu1 %v3626_v7  ;;  %v1795_v16 = vshrl.u32 %v4524_v51, %v1783_v54  ;;  %v1798_v28 = vshrl.u32 %v4525_v5, %v1783_v54  ;;  %v1786_v0 = vshrl.u32 %v4527_v30, %v1783_v54  ;;  %v1789_v61 = vshrl.u32 %v4528_v26, %v1783_v54 }
 0xc1c   :  { %v1792_v56 = vshrl.u32 %v4526_v60, %v1783_v54  ;;  %v1791_v5 = vshll.u32 %v4528_v26, %v1782_v25  ;;  %vm1801_vm4 = vcmp.lt.s32.totalorder %v1781_v49, 2 }
 0xc1d   :  { %v1796_v7 = vor.u32 %v1795_v16, %v1794_v46  ;;  %v1799_v17 = vor.u32 %v1798_v28, %v1797_v53  ;;  %v1787_v31 = vor.u32 %v1786_v0, %v1785_v50  ;;  %v1790_v14 = vor.u32 %v1789_v61, %v1788_v47 }
 0xc1e   :  { %v1793_v12 = vor.u32 %v1792_v56, %v1791_v5  ;;  %v1776_v46 = vor.u32 8388608, %v1775_v55  ;;  %v1784_v56 = vshrl.u32 %v4529_v22, %v1783_v54  ;;  %v4111_v22 = vld [vmem:[%s4452_s16 + $0x10] sm:$0xff]  }
 0xc1f   :  { %v1809_v3 = vsel %vm1803_vm1, %v1796_v7, 920167782  ;;  %v1813_v60 = vsel %vm1803_vm1, %v1799_v17, 1326507024  ;;  %v1808_v51 = vsel %vm1800_vm2, %v1787_v31, %v1790_v14  ;;  %4530 = vst [vmem:[#allocation37_spill] sm:$0xff] %v4111_v22 }
 0xc20   :  { %v1810_v30 = vsel %vm1802_vm3, %v1793_v12, %v1809_v3  ;;  %v1812_v26 = vsel %vm1800_vm2, %v1790_v14, %v1793_v12  ;;  %v1814_v53 = vsel %vm1802_vm3, %v1796_v7, %v1813_v60  ;;  %v1816_v61 = vshll.u32 %v1776_v46, 8 }
 0xc21   :  { %v1811_v50 = vsel %vm1801_vm4, %v1808_v51, %v1810_v30  ;;  %v1815_v47 = vsel %vm1801_vm4, %v1812_v26, %v1814_v53  ;;  %v1805_v28 = vsel %vm1803_vm1, %v1793_v12, 2102212464  ;;  %v1804_v3 = vsel %vm1800_vm2, %v1784_v56, %v1787_v31  ;;  %v4097_v12 = vld [vmem:[%s4452_s16] sm:$0xff]  }
 0xc22   :  { %v4079_v0 = vmul.u32.u64.low %v1816_v61, %v1811_v50  ;;  %v4080_v25 = vmul.u32.u64.high %v1816_v61, %v1811_v50, %v4079_v0  ;;  %v4082_v16 = vmul.u32.u64.low %v1816_v61, %v1815_v47  ;;  %v4083_v17 = vmul.u32.u64.high %v1816_v61, %v1815_v47, %v4082_v16  ;;  %2975 = vmatpush3.bf16.msra.mxu0 %v4097_v12 }
 0xc23   :  { %v1806_v5 = vsel %vm1802_vm3, %v1790_v14, %v1805_v28  ;;  %v4103_v14 = vld [vmem:[%s4452_s16 + $0x8] sm:$0xff]   ;;  %2976 = vmatprep.subr.bf16.mxu0 %v4512_v32 }
 0xc24   :  { %v1826_v7 = vadd.s32 1, %v4080_v25  ;;  %vm1825_vm5 = vc.u32 %v4083_v17, %v4079_v0  ;;  %v1807_v55 = vsel %vm1801_vm4, %v1804_v3, %v1806_v5 }
 0xc25   :  { %v1823_v46 = vmul.u32 %v1816_v61, %v1807_v55 }
 0xc26   :  { %v1827_v60 = vsel %vm1825_vm5, %v1826_v7, %v4080_v25  ;;  %2977 = vmatpush3.bf16.msra.mxu0 %v4103_v14 }
 0xc27   :  { %v1828_v51 = vadd.s32 %v1827_v60, %v1823_v46  ;;  %2978 = vmatprep.subr.bf16.mxu0 %v4512_v32 }
 0xc29   :  { %v1829_v30 = vadd.s32 536870912, %v1828_v51 }
 0xc2a   :  { %2979 = vmatpush3.bf16.msra.mxu0 %v4111_v22 }
 0xc2b   :  { %v4092_v26 = vshrl.u32 %v1829_v30, 30  ;;  %2980 = vmatprep.subr.bf16.mxu0 %v4512_v32 }
 0xc2d   :  { %v1831_v31 = vshll.u32 %v4092_v26, 30 }
 0xc2f   :  { %v1832_v49 = vsub.s32 %v1828_v51, %v1831_v31  ;;  %v1824_v51 = vadd.s32 %v4079_v0, %v4083_v17 }
 0xc31   :  { %v1834_v54 = vsub.s32 0, %v1832_v49 }
 0xc33   :  { %v2772_v53 = vmin.u32 %v1834_v54, %v1832_v49 }
 0xc35   :  { %v1836_v50 = vclz %v2772_v53 }
 0xc37   :  { %v2773_v47 = vadd.s32 4294967294, %v1836_v50  ;;  %v449_v50 = vsub.s32 6, %v3684_v45 }
 0xc39   :  { %vm2774_vm6 = vcmp.lt.s32.totalorder %v2773_v47, 0  ;;  %v4126_v0 = vrot.slane %v3828_v4, %v449_v50 }
 0xc3a   :  { %v1839_v61 = vsel %vm2774_vm6, 0, %v2773_v47 }
 0xc3b   :  { %v1844_v28 = vsub.s32 4294967266, %v1839_v61  ;;  %v1840_v46 = vsub.s32 32, %v1839_v61  ;;  %v1841_v54 = vshll.u32 %v1832_v49, %v1839_v61  ;;  %v4131_v61 = vld [vmem:[%s4449_s13 + $0x3] ss:$0 sm:$0xff] }
 0xc3d   :  { %v1845_v55 = vadd.s32 127, %v1844_v28  ;;  %v1842_v31 = vshrl.u32 %v1824_v51, %v1840_v46  ;;  %v4123_v28 = vld [vmem:[%s4448_s12 + $0x3] ss:$0 sm:$0xff] }
 0xc3f   :  { %v1846_v30 = vshll.u32 %v1845_v55, 23  ;;  %v1843_v47 = vor.u32 %v1842_v31, %v1841_v54 }
 0xc41   :  { %v1847_v53 = vor.u32 4788187, %v1846_v30  ;;  %v1850_v17 = vcvt.s32.f32 %v1843_v47 }
 0xc43   :  { %v1848_v8 = vand.u32 2147483647, %v1847_v53  ;;  %v1854_v53 = vsub.s32 4, %v4092_v26 }
 0xc45   :  { %v1855_v47 = vsel %vm1770_vm7, %v1854_v53, %v4092_v26 }
 0xc9a   :  { %v1579_v25 = vpop.xlane.xlu1 %1578 }
 0xc9b   :  { %v1584_v16 = vmul.f32 0.015625, %v1579_v25  ;;  %v453_v25 = vsub.s32 7, %v3684_v45 }
 0xc9c   :  { %v1583_v56 = vpop.xlane.xlu0 %1582 }
 0xc9d   :  { %v1586_v3 = vmul.f32 %v1584_v16, %v1584_v16  ;;  %v1585_v5 = vmul.f32 0.015625, %v1583_v56  ;;  %v1588_v22 = vsub.f32 %v4026_v48, %v1584_v16  ;;  %v4134_v45 = vrot.slane %v3828_v4, %v453_v25 }
 0xc9e   :  { %v1851_v48 = vmul.f32 %v1850_v17, %v1848_v8  ;;  %v4531_v8 = vand.u32 2147483647, %v4041_v59  ;;  %v2059_v31 = vpop.xlane.xlu1 %2058 }
 0xc9f   :  { %v1587_v7 = vsub.f32 %v1585_v5, %v1586_v3  ;;  %v785_v3 = vadd.f32 %v3810_v6, %v4126_v0 }
 0xca0   :  { %v2055_v55 = vpop.xlane.xlu0 %2054  ;;  %vm1769_vm8 = vcmp.le.f32.partialorder %v4531_v8, 0.7853982 }
 0xca1   :  { %v1589_v60 = vadd.f32 1e-05, %v1587_v7  ;;  %v787_v7 = vadd.f32 %v3814_v18, %v4134_v45  ;;  %v2060_v51 = vmul.f32 0.015625, %v2055_v55  ;;  %v2061_v18 = vmul.f32 0.015625, %v2059_v31 }
 0xca2   :  { %v1857_v17 = vsel %vm1769_vm8, 0, %v1855_v47  ;;  %v4532_v55 = vmov 0  }
 0xca3   :  { %3193 = vrsqrt.f32 %v1589_v60  ;;  %v2062_v54 = vmul.f32 %v2060_v51, %v2060_v51  ;;  %v2064_v8 = vsub.f32 %v4024_v52, %v2060_v51 }
 0xca5   :  { %v2063_v50 = vsub.f32 %v2061_v18, %v2062_v54 }
 0xca7   :  { %v2065_v25 = vadd.f32 1e-05, %v2063_v50 }
 0xcad   :  { %v3194_v56 = vpop.eup %3193 }
 0xcae   :  { %v1591_v49 = vmul.f32 %v3194_v56, %v1588_v22  ;;  %v1852_v22 = vxor.u32 2147483648, %v1851_v48 }
 0xcb0   :  { %v1598_v16 = vmul.f32 %v4123_v28, %v1591_v49  ;;  %v1853_v4 = vsel %vm1770_vm7, %v1852_v22, %v1851_v48  ;;  %v1861_v48 = vadd.s32 3, %v1857_v17  ;;  %v3243_v17 = vld [vmem:[#allocation10 + $0x8] sm:$0xff]  }
 0xcb1   :  { %v1856_v6 = vsel %vm1769_vm8, %v4041_v59, %v1853_v4 }
 0xcb2   :  { %v1605_v5 = vadd.f32 %v4131_v61, %v1598_v16  ;;  %v1862_v22 = vand.u32 3, %v1861_v48  ;;  %v3244_v48 = vld [vmem:[#allocation10 + $0x10] sm:$0xff]  }
 0xcb4   :  { %v1606_v60 = vmul.f32 %v1605_v5, %v785_v3  ;;  %vm1864_vm9 = vcmp.eq.s32.totalorder %v1862_v22, 0  ;;  %vm1867_vm10 = vcmp.eq.s32.totalorder %v1862_v22, 2  ;;  %vm1863_vm11 = vcmp.lt.s32.totalorder %v1862_v22, 2 }
 0xcb6   :  { %v1607_v46 = vadd.f32 %v1606_v60, %v787_v7 }
 0xcb8   :  { %v1608_v30 = vmul.f32 0.5, %v1607_v46 }
 0xcba   :  { %3195 = vtanh.f32 %v1608_v30 }
 0xcbb   :  { %3197 = vcosq.f32 %v1856_v6 }
 0xcbc   :  { %3199 = vsinq.f32 %v1856_v6 }
 0xcbd   :  { %3201 = vrsqrt.f32 %v2065_v25 }
 0xcc4   :  { %v3196_v56 = vpop.eup %3195 }
 0xcc5   :  { %v1610_v49 = vadd.f32 1.0, %v3196_v56  ;;  %v3198_v3 = vpop.eup %3197  ;;  %v4538_v56 = vld [vmem:[#allocation21_spill] sm:$0xff] }
 0xcc6   :  { %v3200_v5 = vpop.eup %3199  ;;  %v1868_v46 = vxor.u32 2147483648, %v3198_v3 }
 0xcc7   :  { %v1611_v16 = vmul.f32 %v1610_v49, %v1608_v30  ;;  %v1865_v60 = vxor.u32 2147483648, %v3200_v5  ;;  %v3202_v30 = vpop.eup %3201 }
 0xcc8   :  { %v1869_v4 = vsel %vm1867_vm10, %v1868_v46, %v3200_v5  ;;  %v3246_v46 = vld [vmem:[#allocation10 + $0x18] sm:$0xff]  }
 0xcc9   :  { %v1612_v7 = vpack.c.bf16 %v1611_v16, %v1611_v16  ;;  %v1866_v26 = vsel %vm1864_vm9, %v3198_v3, %v1865_v60  ;;  %v3245_v16 = vld [vmem:[%s4445_s9] ss:$0 sm:$0xff] }
 0xcca   :  { %v1870_v31 = vsel %vm1863_vm11, %v1866_v26, %v1869_v4 }
 0xccb   :  { %2971 = vmatmul.mubr.msk.bf16.vlgmr.msra.gmra.mrb[20].mxu1 %vm623_vm0, %v1612_v7 }
 0xccc   :  { %1877 = vmatpush1.bf16.msra.mxu1 %v3630_v10  ;;  %1908 = vmatprep.mubr.bf16.mxu1 %v4532_v55  ;;  %v2067_v10 = vmul.f32 %v3202_v30, %v2064_v8 }
 0xccd   :  { %1878 = vmatprep.subr.bf16.mxu1 %v3635_v15  ;;  %v1871_v15 = vsel %vm1860_vm12, nan, %v1870_v31 }
 0xcd0   :  { %1879 = vmatpush1.bf16.msra.mxu1 %v3641_v20  ;;  %v3236_v20 = vld [vmem:[%s4442_s6] ss:$0 sm:$0xff] }
 0xcd1   :  { %1880 = vmatprep.subr.bf16.mxu1 %v3647_v24  ;;  %v2068_v6 = vmul.f32 %v3236_v20, %v2067_v10  ;;  %v4162_v24 = vpack.c.bf16 %v1871_v15, %v1871_v15 }
 0xcd4   :  { %1881 = vmatpush1.bf16.msra.mxu1 %v3655_v35  ;;  %v3237_v35 = vld [vmem:[%s4443_s7] ss:$0 sm:$0xff] }
 0xcd5   :  { %1882 = vmatprep.subr.bf16.mxu1 %v3663_v38  ;;  %v2069_v38 = vadd.f32 %v3237_v35, %v2068_v6 }
 0xcd7   :  { %v2070_v59 = vmul.f32 0.5, %v2069_v38  ;;  %v3247_v38 = vld [vmem:[%s4448_s12] ss:$0 sm:$0xff] }
 0xcd8   :  { %1883 = vmatpush1.bf16.msra.mxu1 %v3669_v40 }
 0xcd9   :  { %1958 = vmatprep.subr.bf16.mxu1 %v3675_v42  ;;  %3203 = vtanh.f32 %v2070_v59  ;;  %v3239_v42 = vld [vmem:[#allocation7 + $0x8] sm:$0xff]  }
 0xcdb   :  { %2775 = vmatmul.mubr.msk.bf16.vlgmr.msra.gmra.mrb[24].mxu1 %vm623_vm0, %v4162_v24 }
 0xcdc   :  { %1959 = vmatpush1.bf16.msra.mxu1 %v3652_v33  ;;  %1990 = vmatprep.mubr.bf16.mxu1 %v4532_v55  ;;  %v3238_v33 = vld [vmem:[#allocation7] sm:$0xff]  }
 0xcdd   :  { %1960 = vmatprep.subr.bf16.mxu1 %v3740_v63 }
 0xce0   :  { %1961 = vmatpush1.bf16.msra.mxu1 %v3748_v57  ;;  %v3240_v57 = vld [vmem:[#allocation7 + $0x10] sm:$0xff]  }
 0xce1   :  { %1962 = vmatprep.subr.bf16.mxu1 %v3754_v13 }
 0xce3   :  { %v3204_v40 = vpop.eup %3203 }
 0xce4   :  { %1963 = vmatpush1.bf16.msra.mxu1 %v3762_v29  ;;  %v2072_v63 = vadd.f32 1.0, %v3204_v40  ;;  %v3241_v29 = vld [vmem:[#allocation7 + $0x18] sm:$0xff]   ;;  %v4539_v40 = vld [vmem:[#allocation22_spill] sm:$0xff] }
 0xce5   :  { %1964 = vmatprep.subr.bf16.mxu1 %v3768_v34 }
 0xce6   :  { %v2073_v13 = vmul.f32 %v2072_v63, %v2070_v59  ;;  %v3248_v63 = vld [vmem:[%s4449_s13] ss:$0 sm:$0xff] }
 0xce8   :  { %1965 = vmatpush1.bf16.msra.mxu1 %v3774_v44  ;;  %v2074_v34 = vpack.c.bf16 %v2073_v13, %v2073_v13  ;;  %v4201_v44 = vld [vmem:[%s4452_s16 + $0x18] sm:$0xff]  }
 0xce9   :  { %2986 = vmatprep.subr.bf16.mxu1 %v4512_v32  ;;  %2981 = vmatpush3.bf16.msra.mxu0 %v4201_v44 }
 0xcea   :  { %1917 = vmatprep.subr.bf16.mxu0 %v3628_v9 }
 0xceb   :  { %2777 = vmatmul.mubr.msk.bf16.vlgmr.msra.gmra.mrb[28].mxu1 %vm623_vm0, %v4162_v24 }
 0xcec   :  { %2987 = vmatpush3.bf16.msra.mxu1 %v3238_v33  ;;  %2994 = vmatprep.mubr.msk.bf16.mxu1 %vm3435_vm14, %v4512_v32  ;;  %v4258_v33 = vld [vmem:[%s4453_s17] ss:$0 sm:$0xff] }
 0xced   :  { %2988 = vmatprep.subr.bf16.mxu1 %v4512_v32 }
 0xcf0   :  { %2989 = vmatpush3.bf16.msra.mxu1 %v3239_v42 }
 0xcf1   :  { %2990 = vmatprep.subr.bf16.mxu1 %v4512_v32 }
 0xcf4   :  { %2991 = vmatpush3.bf16.msra.mxu1 %v3240_v57 }
 0xcf5   :  { %2992 = vmatprep.subr.bf16.mxu1 %v4512_v32 }
 0xcf8   :  { %2993 = vmatpush3.bf16.msra.mxu1 %v3241_v29  ;;  %v4540_v29 = vld [vmem:[#allocation23_spill] sm:$0xff] }
 0xcf9   :  { %3010 = vmatprep.subr.bf16.mxu1 %v4512_v32 }
 0xcfb   :  { %2995 = vmatmul.mubr.msk.bf16.vlgmr.msra.gmra.mrb[32].mxu1 %vm623_vm0, %v2074_v34 }
 0xcfc   :  { %3011 = vmatpush3.bf16.msra.mxu1 %v3862_v1  ;;  %3018 = vmatprep.mubr.msk.bf16.mxu1 %vm3435_vm14, %v4512_v32  ;;  %v4208_v1 = vld [vmem:[%s4451_s15 + $0x3] ss:$0 sm:$0xff] }
 0xcfd   :  { %3012 = vmatprep.subr.bf16.mxu1 %v4512_v32 }
 0xd00   :  { %3013 = vmatpush3.bf16.msra.mxu1 %v3865_v62 }
 0xd01   :  { %3014 = vmatprep.subr.bf16.mxu1 %v4512_v32 }
 0xd04   :  { %3015 = vmatpush3.bf16.msra.mxu1 %v3869_v2 }
 0xd05   :  { %3016 = vmatprep.subr.bf16.mxu1 %v4512_v32 }
 0xd08   :  { %3017 = vmatpush3.bf16.msra.mxu1 %v3873_v21 }
 0xd09   :  { %3034 = vmatprep.subr.bf16.mxu1 %v4512_v32 }
 0xd9e   :  { %v1680_v62 = vpop.f32.mrb[20].mxu1 }
 0xd9f   :  { %v1681_v2 = vadd.f32 %v4208_v1, %v1680_v62  ;;  %v2972_v21 = vpop.f32.mrb[21].mxu1 }
 0xda0   :  { %v1683_v51 = vpop.f32.mrb[22].mxu1 }
 0xda1   :  { %v1686_v54 = vadd.f32 %v1681_v2, %v3980_v58  ;;  %v2973_v53 = vpop.f32.mrb[23].mxu1 }
 0xda3   :  { %v1687_v18 = vpack.c.bf16 %v1686_v54, %v1686_v54 }
 0xda5   :  { %2983 = vmatmul.mubr.msk.bf16.vlgmr.msra.gmra.mrb[24].mxu0 %vm623_vm0, %v1687_v18 }
 0xda6   :  { %1918 = vmatpush1.bf16.msra.mxu0 %v3632_v11  ;;  %1949 = vmatprep.mubr.bf16.mxu0 %v4532_v55  ;;  %v4533_v11 = vld [vmem:[#allocation16_spill] sm:$0xff] }
 0xda7   :  { %1919 = vmatprep.subr.bf16.mxu0 %v3639_v19  ;;  %v4534_v19 = vld [vmem:[#allocation17_spill] sm:$0xff] }
 0xdaa   :  { %1920 = vmatpush1.bf16.msra.mxu0 %v3645_v23  ;;  %v4535_v23 = vld [vmem:[#allocation18_spill] sm:$0xff] }
 0xdab   :  { %1921 = vmatprep.subr.bf16.mxu0 %v3650_v27 }
 0xdae   :  { %v1910_v9 = vpop.f32.mrb[24].mxu1  ;;  %1922 = vmatpush1.bf16.msra.mxu0 %v3661_v37  ;;  %v4536_v37 = vld [vmem:[#allocation19_spill] sm:$0xff] }
 0xdaf   :  { %v4219_v50 = vpop.f32.mrb[25].mxu1  ;;  %1923 = vmatprep.subr.bf16.mxu0 %v3666_v39  ;;  %v1911_v42 = vadd.f32 %v1910_v9, %v4539_v40  ;;  %v3255_v40 = vld [vmem:[%s4443_s7 + $0x1] ss:$0 sm:$0xff] }
 0xdb0   :  { %v1914_v58 = vpop.f32.mrb[26].mxu1  ;;  %v1913_v34 = vadd.f32 %v4219_v50, %v4540_v29 }
 0xdb1   :  { %v1915_v47 = vpop.f32.mrb[27].mxu1 }
 0xdb2   :  { %1924 = vmatpush1.bf16.msra.mxu0 %v3673_v41  ;;  %v4537_v41 = vld [vmem:[#allocation20_spill] sm:$0xff] }
 0xdb3   :  { %1999 = vmatprep.subr.bf16.mxu0 %v3678_v43 }
 0xdb5   :  { %2776 = vmatmul.mubr.msk.bf16.vlgmr.msra.gmra.mrb[28].mxu0 %vm623_vm0, %v4162_v24 }
 0xdb6   :  { %2000 = vmatpush1.bf16.msra.mxu0 %v3657_v36  ;;  %2031 = vmatprep.mubr.bf16.mxu0 %v4532_v55  ;;  %v3242_v36 = vld [vmem:[#allocation10] sm:$0xff]  }
 0xdb7   :  { %2001 = vmatprep.subr.bf16.mxu0 %v4533_v11 }
 0xdba   :  { %2002 = vmatpush1.bf16.msra.mxu0 %v4534_v19 }
 0xdbb   :  { %2003 = vmatprep.subr.bf16.mxu0 %v4535_v23 }
 0xdbe   :  { %v4231_v27 = vpop.f32.mrb[28].mxu1  ;;  %2004 = vmatpush1.bf16.msra.mxu0 %v4536_v37 }
 0xdbf   :  { %v4234_v39 = vpop.f32.mrb[29].mxu1  ;;  %2005 = vmatprep.subr.bf16.mxu0 %v4537_v41  ;;  %v3249_v41 = vld [vmem:[#allocation10 + $0x20] sm:$0xff]  }
 0xdc0   :  { %v1996_v43 = vpop.f32.mrb[30].mxu1 }
 0xdc1   :  { %v1997_v25 = vpop.f32.mrb[31].mxu1  ;;  %v3250_v43 = vld [vmem:[#allocation10 + $0x28] sm:$0xff]  }
 0xdc2   :  { %2006 = vmatpush1.bf16.msra.mxu0 %v4538_v56 }
 0xdc3   :  { %2998 = vmatprep.subr.bf16.mxu0 %v4512_v32 }
 0xdc5   :  { %2778 = vmatmul.mubr.msk.bf16.vlgmr.msra.gmra.mrb[32].mxu0 %vm623_vm0, %v4162_v24 }
 0xdc6   :  { %2999 = vmatpush3.bf16.msra.mxu0 %v3242_v36  ;;  %3006 = vmatprep.mubr.msk.bf16.mxu0 %vm3435_vm14, %v4512_v32  ;;  %v3251_v36 = vld [vmem:[#allocation10 + $0x30] sm:$0xff]  }
 0xdc7   :  { %3000 = vmatprep.subr.bf16.mxu0 %v4512_v32 }
 0xdca   :  { %3001 = vmatpush3.bf16.msra.mxu0 %v3243_v17 }
 0xdcb   :  { %3002 = vmatprep.subr.bf16.mxu0 %v4512_v32 }
 0xdce   :  { %v2112_v49 = vpop.f32.mrb[32].mxu1  ;;  %3003 = vmatpush3.bf16.msra.mxu0 %v3244_v48  ;;  %v3252_v48 = vld [vmem:[#allocation10 + $0x38] sm:$0xff]  }
 0xdcf   :  { %v2113_v3 = vadd.f32 %v3245_v16, %v2112_v49  ;;  %v2996_v5 = vpop.f32.mrb[33].mxu1  ;;  %3004 = vmatprep.subr.bf16.mxu0 %v4512_v32 }
 0xdd0   :  { %v2115_v7 = vpop.f32.mrb[34].mxu1 }
 0xdd1   :  { %v2997_v22 = vpop.f32.mrb[35].mxu1  ;;  %v2118_v55 = vsel %vm623_vm0, %v2113_v3, 0.0  ;;  %v2121_v60 = vmul.f32 %v2113_v3, %v2113_v3 }
 0xdd2   :  { %2119 = vadd.xlane.f32.xlu0 %v2118_v55  ;;  %3005 = vmatpush3.bf16.msra.mxu0 %v3246_v46 }
 0xdd3   :  { %v2122_v26 = vsel %vm623_vm0, %v2121_v60, 0.0  ;;  %3022 = vmatprep.subr.bf16.mxu0 %v4512_v32 }
 0xdd4   :  { %2123 = vadd.xlane.f32.xlu1 %v2122_v26 }
 0xe5f   :  { %v2120_v4 = vpop.xlane.xlu0 %2119 }
 0xe60   :  { %v2125_v30 = vmul.f32 0.015625, %v2120_v4 }
 0xe61   :  { %v2124_v8 = vpop.xlane.xlu1 %2123 }
 0xe62   :  { %v2127_v31 = vmul.f32 %v2125_v30, %v2125_v30  ;;  %v2126_v10 = vmul.f32 0.015625, %v2124_v8  ;;  %v2129_v6 = vsub.f32 %v2113_v3, %v2125_v30  ;;  %v3253_v3 = vld [vmem:[%s4451_s15] ss:$0 sm:$0xff] }
 0xe64   :  { %v2128_v15 = vsub.f32 %v2126_v10, %v2127_v31 }
 0xe66   :  { %v2130_v20 = vadd.f32 1e-05, %v2128_v15 }
 0xe68   :  { %3205 = vrsqrt.f32 %v2130_v20 }
 0xe72   :  { %v3206_v24 = vpop.eup %3205 }
 0xe73   :  { %v2132_v35 = vmul.f32 %v3206_v24, %v2129_v6 }
 0xe75   :  { %v2133_v59 = vmul.f32 %v3247_v38, %v2132_v35  ;;  %v3254_v38 = vld [vmem:[%s4442_s6 + $0x1] ss:$0 sm:$0xff] }
 0xe77   :  { %v2134_v57 = vadd.f32 %v3248_v63, %v2133_v59 }
 0xe78   :  { %v1755_v13 = vpop.f32.mrb[24].mxu0 }
 0xe79   :  { %v1756_v62 = vadd.f32 %v4258_v33, %v1755_v13  ;;  %v2984_v2 = vpop.f32.mrb[25].mxu0  ;;  %v2135_v21 = vmul.f32 %v2134_v57, %v1911_v42 }
 0xe7a   :  { %v1758_v51 = vpop.f32.mrb[26].mxu0  ;;  %v3257_v2 = vld [vmem:[#allocation7 + $0x48] sm:$0xff]  }
 0xe7b   :  { %2630 = vst.msk [vmem:[%s4454_s18] sm:$0xff] %vm2629_vm13, %v1756_v62  ;;  %v2985_v54 = vpop.f32.mrb[27].mxu0  ;;  %v2136_v53 = vadd.f32 %v2135_v21, %v1913_v34  ;;  %v3256_v62 = vld [vmem:[#allocation7 + $0x40] sm:$0xff]   ;;  %v3258_v21 = vld [vmem:[#allocation7 + $0x50] sm:$0xff]   ;;  %v3259_v51 = vld [vmem:[#allocation7 + $0x58] sm:$0xff]  }
 0xe7d   :  { %v2137_v18 = vmul.f32 0.5, %v2136_v53  ;;  %v3260_v53 = vld [vmem:[%s4445_s9 + $0x1] ss:$0 sm:$0xff] }
 0xe7f   :  { %3207 = vtanh.f32 %v2137_v18 }
 0xe88   :  { %v4271_v9 = vpop.f32.mrb[28].mxu0 }
 0xe89   :  { %v3208_v58 = vpop.eup %3207  ;;  %v4273_v47 = vpop.f32.mrb[29].mxu0 }
 0xe8a   :  { %v1955_v50 = vpop.f32.mrb[30].mxu0  ;;  %v2139_v11 = vadd.f32 1.0, %v3208_v58 }
 0xe8b   :  { %v1956_v19 = vpop.f32.mrb[31].mxu0 }
 0xe8c   :  { %v2140_v23 = vmul.f32 %v2139_v11, %v2137_v18 }
 0xe8e   :  { %v2141_v37 = vpack.c.bf16 %v2140_v23, %v2140_v23 }
 0xe90   :  { %3007 = vmatmul.mubr.msk.bf16.vlgmr.msra.gmra.mrb[36].mxu0 %vm623_vm0, %v2141_v37 }
 0xe91   :  { %3023 = vmatpush3.bf16.msra.mxu0 %v3249_v41  ;;  %3030 = vmatprep.mubr.msk.bf16.mxu0 %vm3435_vm14, %v4512_v32 }
 0xe92   :  { %3024 = vmatprep.subr.bf16.mxu0 %v4512_v32 }
 0xe95   :  { %3025 = vmatpush3.bf16.msra.mxu0 %v3250_v43 }
 0xe96   :  { %3026 = vmatprep.subr.bf16.mxu0 %v4512_v32 }
 0xe98   :  { %v4280_v25 = vpop.f32.mrb[32].mxu0 }
 0xe99   :  { %v4282_v56 = vpop.f32.mrb[33].mxu0  ;;  %3027 = vmatpush3.bf16.msra.mxu0 %v3251_v36 }
 0xe9a   :  { %v2037_v17 = vpop.f32.mrb[34].mxu0  ;;  %3028 = vmatprep.subr.bf16.mxu0 %v4512_v32 }
 0xe9b   :  { %v2038_v49 = vpop.f32.mrb[35].mxu0 }
 0xe9d   :  { %3029 = vmatpush3.bf16.msra.mxu0 %v3252_v48 }
 0xe9e   :  { %3046 = vmatprep.subr.bf16.mxu0 %v4512_v32 }
 0xf63   :  { %v2179_v16 = vpop.f32.mrb[36].mxu0 }
 0xf64   :  { %v2180_v5 = vadd.f32 %v3253_v3, %v2179_v16  ;;  %v3008_v7 = vpop.f32.mrb[37].mxu0 }
 0xf65   :  { %v2182_v22 = vpop.f32.mrb[38].mxu0 }
 0xf66   :  { %v4290_v55 = vadd.f32 %v2180_v5, %v4024_v52  ;;  %v3009_v60 = vpop.f32.mrb[39].mxu0  ;;  %v3261_v22 = vld [vmem:[%s4448_s12 + $0x1] ss:$0 sm:$0xff] }
 0xf68   :  { %v2186_v46 = vsel %vm623_vm0, %v4290_v55, 0.0  ;;  %v2189_v26 = vmul.f32 %v4290_v55, %v4290_v55 }
 0xf69   :  { %2187 = vadd.xlane.f32.xlu0 %v2186_v46  ;;  %v4541_v46 = vld [vmem:[#allocation24_spill] sm:$0xff] }
 0xf6a   :  { %v2190_v4 = vsel %vm623_vm0, %v2189_v26, 0.0  ;;  %v1952_v26 = vadd.f32 %v4271_v9, %v4541_v46  ;;  %v3264_v9 = vld [vmem:[#allocation10 + $0x48] sm:$0xff]  }
 0xf6b   :  { %2191 = vadd.xlane.f32.xlu1 %v2190_v4  ;;  %v3262_v4 = vld [vmem:[%s4449_s13 + $0x1] ss:$0 sm:$0xff] }
 0xff6   :  { %v2188_v30 = vpop.xlane.xlu0 %2187 }
 0xff7   :  { %v2193_v8 = vmul.f32 0.015625, %v2188_v30 }
 0xff8   :  { %v2192_v31 = vpop.xlane.xlu1 %2191 }
 0xff9   :  { %v2195_v10 = vmul.f32 %v2193_v8, %v2193_v8  ;;  %v2194_v15 = vmul.f32 0.015625, %v2192_v31  ;;  %v2197_v52 = vsub.f32 %v4290_v55, %v2193_v8  ;;  %v4542_v8 = vld [vmem:[#allocation25_spill] sm:$0xff] }
 0xffa   :  { %v1954_v31 = vadd.f32 %v4273_v47, %v4542_v8  ;;  %v3265_v47 = vld [vmem:[#allocation10 + $0x50] sm:$0xff]  }
 0xffb   :  { %v2196_v20 = vsub.f32 %v2194_v15, %v2195_v10 }
 0xffd   :  { %v2198_v6 = vadd.f32 1e-05, %v2196_v20 }
 0xfff   :  { %3209 = vrsqrt.f32 %v2198_v6 }
0x1009   :  { %v3210_v24 = vpop.eup %3209 }
0x100a   :  { %v2200_v35 = vmul.f32 %v3210_v24, %v2197_v52 }
0x100c   :  { %v2201_v59 = vmul.f32 %v3254_v38, %v2200_v35  ;;  %v3263_v38 = vld [vmem:[#allocation10 + $0x40] sm:$0xff]  }
0x100e   :  { %v2202_v42 = vadd.f32 %v3255_v40, %v2201_v59  ;;  %v4543_v59 = vld [vmem:[#allocation26_spill] sm:$0xff] }
0x1010   :  { %v2203_v63 = vmul.f32 0.5, %v2202_v42  ;;  %v3266_v42 = vld [vmem:[%s4451_s15 + $0x1] ss:$0 sm:$0xff] }
0x1012   :  { %3211 = vtanh.f32 %v2203_v63 }
0x101c   :  { %v3212_v57 = vpop.eup %3211 }
0x101d   :  { %v2205_v13 = vadd.f32 1.0, %v3212_v57 }
0x101f   :  { %v2206_v29 = vmul.f32 %v2205_v13, %v2203_v63 }
0x1021   :  { %v2207_v34 = vpack.c.bf16 %v2206_v29, %v2206_v29 }
0x1023   :  { %3019 = vmatmul.mubr.msk.bf16.vlgmr.msra.gmra.mrb[36].mxu1 %vm623_vm0, %v2207_v34 }
0x1024   :  { %3035 = vmatpush3.bf16.msra.mxu1 %v3256_v62  ;;  %3042 = vmatprep.mubr.msk.bf16.mxu1 %vm3435_vm14, %v4512_v32 }
0x1025   :  { %3036 = vmatprep.subr.bf16.mxu1 %v4512_v32 }
0x1028   :  { %3037 = vmatpush3.bf16.msra.mxu1 %v3257_v2 }
0x1029   :  { %3038 = vmatprep.subr.bf16.mxu1 %v4512_v32 }
0x102c   :  { %3039 = vmatpush3.bf16.msra.mxu1 %v3258_v21 }
0x102d   :  { %3040 = vmatprep.subr.bf16.mxu1 %v4512_v32 }
0x1030   :  { %3041 = vmatpush3.bf16.msra.mxu1 %v3259_v51 }
0x1031   :  { %3058 = vmatprep.subr.bf16.mxu1 %v4512_v32 }
0x10f6   :  { %v2245_v54 = vpop.f32.mrb[36].mxu1 }
0x10f7   :  { %v2246_v18 = vadd.f32 %v3260_v53, %v2245_v54  ;;  %v3020_v58 = vpop.f32.mrb[37].mxu1 }
0x10f8   :  { %v2248_v50 = vpop.f32.mrb[38].mxu1 }
0x10f9   :  { %v3021_v11 = vpop.f32.mrb[39].mxu1  ;;  %v2251_v19 = vsel %vm623_vm0, %v2246_v18, 0.0  ;;  %v2254_v23 = vmul.f32 %v2246_v18, %v2246_v18 }
0x10fa   :  { %2252 = vadd.xlane.f32.xlu0 %v2251_v19 }
0x10fb   :  { %v2255_v37 = vsel %vm623_vm0, %v2254_v23, 0.0 }
0x10fc   :  { %2256 = vadd.xlane.f32.xlu1 %v2255_v37  ;;  %v3267_v37 = vld [vmem:[%s4442_s6 + $0x2] ss:$0 sm:$0xff] }
0x1187   :  { %v2253_v41 = vpop.xlane.xlu0 %2252 }
0x1188   :  { %v2258_v43 = vmul.f32 0.015625, %v2253_v41 }
0x1189   :  { %v2257_v36 = vpop.xlane.xlu1 %2256 }
0x118a   :  { %v2260_v17 = vmul.f32 %v2258_v43, %v2258_v43  ;;  %v2259_v49 = vmul.f32 0.015625, %v2257_v36  ;;  %v2262_v3 = vsub.f32 %v2246_v18, %v2258_v43  ;;  %v3268_v43 = vld [vmem:[%s4443_s7 + $0x2] ss:$0 sm:$0xff] }
0x118c   :  { %v2261_v48 = vsub.f32 %v2259_v49, %v2260_v17 }
0x118e   :  { %v2263_v16 = vadd.f32 1e-05, %v2261_v48 }
0x1190   :  { %3213 = vrsqrt.f32 %v2263_v16 }
0x119a   :  { %v3214_v5 = vpop.eup %3213 }
0x119b   :  { %v2265_v7 = vmul.f32 %v3214_v5, %v2262_v3  ;;  %v4544_v5 = vld [vmem:[#allocation29_spill] sm:$0xff] }
0x119d   :  { %v2266_v60 = vmul.f32 %v3261_v22, %v2265_v7  ;;  %v4545_v7 = vld [vmem:[#allocation30_spill] sm:$0xff]  ;;  %v4546_v22 = vld [vmem:[#allocation31_spill] sm:$0xff] }
0x119f   :  { %v2267_v30 = vadd.f32 %v3262_v4, %v2266_v60  ;;  %v4547_v60 = vld [vmem:[#allocation32_spill] sm:$0xff] }
0x11a1   :  { %v2268_v10 = vmul.f32 %v2267_v30, %v1952_v26  ;;  %v3269_v26 = vld [vmem:[%s4445_s9 + $0x2] ss:$0 sm:$0xff] }
0x11a3   :  { %v2269_v15 = vadd.f32 %v2268_v10, %v1954_v31 }
0x11a5   :  { %v2270_v20 = vmul.f32 0.5, %v2269_v15 }
0x11a7   :  { %3215 = vtanh.f32 %v2270_v20 }
0x11b1   :  { %v3216_v6 = vpop.eup %3215 }
0x11b2   :  { %v2272_v52 = vadd.f32 1.0, %v3216_v6 }
0x11b4   :  { %v2273_v24 = vmul.f32 %v2272_v52, %v2270_v20 }
0x11b6   :  { %v2274_v35 = vpack.c.bf16 %v2273_v24, %v2273_v24 }
0x11b8   :  { %3031 = vmatmul.mubr.msk.bf16.vlgmr.msra.gmra.mrb[40].mxu0 %vm623_vm0, %v2274_v35 }
0x11b9   :  { %3047 = vmatpush3.bf16.msra.mxu0 %v3263_v38  ;;  %3054 = vmatprep.mubr.msk.bf16.mxu0 %vm3435_vm14, %v4512_v32 }
0x11ba   :  { %3048 = vmatprep.subr.bf16.mxu0 %v4512_v32 }
0x11bd   :  { %3049 = vmatpush3.bf16.msra.mxu0 %v3264_v9 }
0x11be   :  { %3050 = vmatprep.subr.bf16.mxu0 %v4512_v32 }
0x11c1   :  { %3051 = vmatpush3.bf16.msra.mxu0 %v3265_v47 }
0x11c2   :  { %3052 = vmatprep.subr.bf16.mxu0 %v4512_v32 }
0x11c5   :  { %3053 = vmatpush3.bf16.msra.mxu0 %v4543_v59 }
0x11c6   :  { %3070 = vmatprep.subr.bf16.mxu0 %v4512_v32 }
0x128b   :  { %v2312_v40 = vpop.f32.mrb[40].mxu0 }
0x128c   :  { %v2313_v63 = vadd.f32 %v3266_v42, %v2312_v40  ;;  %v3032_v57 = vpop.f32.mrb[41].mxu0 }
0x128d   :  { %v2315_v13 = vpop.f32.mrb[42].mxu0 }
0x128e   :  { %v4338_v29 = vadd.f32 %v2313_v63, %v4290_v55  ;;  %v3033_v34 = vpop.f32.mrb[43].mxu0  ;;  %v3270_v63 = vld [vmem:[%s4448_s12 + $0x2] ss:$0 sm:$0xff]  ;;  %v4548_v13 = vld [vmem:[#allocation27_spill] sm:$0xff] }
0x128f   :  { %v1993_v34 = vadd.f32 %v4231_v27, %v4548_v13  ;;  %v4551_v27 = vld [vmem:[#allocation34_spill] sm:$0xff] }
0x1290   :  { %v2319_v62 = vsel %vm623_vm0, %v4338_v29, 0.0  ;;  %v2322_v2 = vmul.f32 %v4338_v29, %v4338_v29 }
0x1291   :  { %2320 = vadd.xlane.f32.xlu0 %v2319_v62  ;;  %v3271_v62 = vld [vmem:[%s4449_s13 + $0x2] ss:$0 sm:$0xff] }
0x1292   :  { %v2323_v21 = vsel %vm623_vm0, %v2322_v2, 0.0 }
0x1293   :  { %2324 = vadd.xlane.f32.xlu1 %v2323_v21  ;;  %v4549_v21 = vld [vmem:[#allocation28_spill] sm:$0xff] }
0x131e   :  { %v2321_v51 = vpop.xlane.xlu0 %2320 }
0x131f   :  { %v2326_v54 = vmul.f32 0.015625, %v2321_v51  ;;  %v1995_v51 = vadd.f32 %v4234_v39, %v4549_v21  ;;  %v4552_v39 = vld [vmem:[#allocation35_spill] sm:$0xff] }
0x1320   :  { %v2325_v53 = vpop.xlane.xlu1 %2324 }
0x1321   :  { %v2328_v18 = vmul.f32 %v2326_v54, %v2326_v54  ;;  %v2327_v58 = vmul.f32 0.015625, %v2325_v53  ;;  %v2330_v55 = vsub.f32 %v4338_v29, %v2326_v54 }
0x1323   :  { %v2329_v50 = vsub.f32 %v2327_v58, %v2328_v18 }
0x1325   :  { %v2331_v11 = vadd.f32 1e-05, %v2329_v50 }
0x1327   :  { %3217 = vrsqrt.f32 %v2331_v11 }
0x1331   :  { %v3218_v19 = vpop.eup %3217 }
0x1332   :  { %v2333_v23 = vmul.f32 %v3218_v19, %v2330_v55  ;;  %v4550_v19 = vld [vmem:[#allocation33_spill] sm:$0xff] }
0x1334   :  { %v2334_v41 = vmul.f32 %v3267_v37, %v2333_v23  ;;  %v4553_v23 = vld [vmem:[#allocation36_spill] sm:$0xff] }
0x1336   :  { %v2335_v36 = vadd.f32 %v3268_v43, %v2334_v41  ;;  %v3272_v41 = vld [vmem:[%s4451_s15 + $0x2] ss:$0 sm:$0xff] }
0x1338   :  { %v2336_v17 = vmul.f32 0.5, %v2335_v36 }
0x133a   :  { %3219 = vtanh.f32 %v2336_v17 }
0x1344   :  { %v3220_v49 = vpop.eup %3219 }
0x1345   :  { %v2338_v48 = vadd.f32 1.0, %v3220_v49 }
0x1347   :  { %v2339_v16 = vmul.f32 %v2338_v48, %v2336_v17 }
0x1349   :  { %v2340_v3 = vpack.c.bf16 %v2339_v16, %v2339_v16 }
0x134b   :  { %3043 = vmatmul.mubr.msk.bf16.vlgmr.msra.gmra.mrb[40].mxu1 %vm623_vm0, %v2340_v3 }
0x134c   :  { %3059 = vmatpush3.bf16.msra.mxu1 %v4544_v5  ;;  %3066 = vmatprep.mubr.msk.bf16.mxu1 %vm3435_vm14, %v4512_v32 }
0x134d   :  { %3060 = vmatprep.subr.bf16.mxu1 %v4512_v32 }
0x1350   :  { %3061 = vmatpush3.bf16.msra.mxu1 %v4545_v7 }
0x1351   :  { %3062 = vmatprep.subr.bf16.mxu1 %v4512_v32 }
0x1354   :  { %3063 = vmatpush3.bf16.msra.mxu1 %v4546_v22 }
0x1355   :  { %3064 = vmatprep.subr.bf16.mxu1 %v4512_v32 }
0x1358   :  { %3065 = vmatpush3.bf16.msra.mxu1 %v4547_v60 }
0x1359   :  { %3082 = vmatprep.subr.bf16.mxu1 %v4512_v32 }
0x141e   :  { %v2378_v46 = vpop.f32.mrb[40].mxu1 }
0x141f   :  { %v2379_v4 = vadd.f32 %v3269_v26, %v2378_v46  ;;  %v3044_v30 = vpop.f32.mrb[41].mxu1 }
0x1420   :  { %v2381_v8 = vpop.f32.mrb[42].mxu1 }
0x1421   :  { %v3045_v31 = vpop.f32.mrb[43].mxu1  ;;  %v2384_v10 = vsel %vm623_vm0, %v2379_v4, 0.0  ;;  %v2387_v15 = vmul.f32 %v2379_v4, %v2379_v4 }
0x1422   :  { %2385 = vadd.xlane.f32.xlu0 %v2384_v10  ;;  %v3273_v10 = vld [vmem:[%s4442_s6 + $0x3] ss:$0 sm:$0xff] }
0x1423   :  { %v2388_v20 = vsel %vm623_vm0, %v2387_v15, 0.0 }
0x1424   :  { %2389 = vadd.xlane.f32.xlu1 %v2388_v20  ;;  %v3274_v20 = vld [vmem:[%s4443_s7 + $0x3] ss:$0 sm:$0xff] }
0x14af   :  { %v2386_v6 = vpop.xlane.xlu0 %2385 }
0x14b0   :  { %v2391_v52 = vmul.f32 0.015625, %v2386_v6 }
0x14b1   :  { %v2390_v24 = vpop.xlane.xlu1 %2389 }
0x14b2   :  { %v2393_v35 = vmul.f32 %v2391_v52, %v2391_v52  ;;  %v2392_v38 = vmul.f32 0.015625, %v2390_v24  ;;  %v2395_v59 = vsub.f32 %v2379_v4, %v2391_v52 }
0x14b4   :  { %v2394_v9 = vsub.f32 %v2392_v38, %v2393_v35 }
0x14b6   :  { %v2396_v47 = vadd.f32 1e-05, %v2394_v9 }
0x14b8   :  { %3221 = vrsqrt.f32 %v2396_v47  ;;  %v4554_v47 = vld [vmem:[#allocation37_spill] sm:$0xff] }
0x14c2   :  { %v3222_v40 = vpop.eup %3221 }
0x14c3   :  { %v2398_v42 = vmul.f32 %v3222_v40, %v2395_v59 }
0x14c5   :  { %v2399_v57 = vmul.f32 %v3270_v63, %v2398_v42 }
0x14c7   :  { %v2400_v2 = vadd.f32 %v3271_v62, %v2399_v57 }
0x14c9   :  { %v2401_v54 = vmul.f32 %v2400_v2, %v1993_v34 }
0x14cb   :  { %v2402_v53 = vadd.f32 %v2401_v54, %v1995_v51 }
0x14cd   :  { %v2403_v18 = vmul.f32 0.5, %v2402_v53 }
0x14cf   :  { %3223 = vtanh.f32 %v2403_v18 }
0x14d9   :  { %v3224_v58 = vpop.eup %3223 }
0x14da   :  { %v2405_v50 = vadd.f32 1.0, %v3224_v58 }
0x14dc   :  { %v2406_v11 = vmul.f32 %v2405_v50, %v2403_v18 }
0x14de   :  { %v2407_v55 = vpack.c.bf16 %v2406_v11, %v2406_v11  ;;  %v2034_v11 = vadd.f32 %v4280_v25, %v4126_v0 }
0x14e0   :  { %3055 = vmatmul.mubr.msk.bf16.vlgmr.msra.gmra.mrb[44].mxu0 %vm623_vm0, %v2407_v55 }
0x14e1   :  { %3071 = vmatpush3.bf16.msra.mxu0 %v4550_v19  ;;  %3078 = vmatprep.mubr.msk.bf16.mxu0 %vm3435_vm14, %v4512_v32  ;;  %v2036_v19 = vadd.f32 %v4282_v56, %v4134_v45 }
0x14e2   :  { %3072 = vmatprep.subr.bf16.mxu0 %v4512_v32 }
0x14e5   :  { %3073 = vmatpush3.bf16.msra.mxu0 %v4551_v27 }
0x14e6   :  { %3074 = vmatprep.subr.bf16.mxu0 %v4512_v32 }
0x14e9   :  { %3075 = vmatpush3.bf16.msra.mxu0 %v4552_v39 }
0x14ea   :  { %3076 = vmatprep.subr.bf16.mxu0 %v4512_v32 }
0x14ed   :  { %3077 = vmatpush3.bf16.msra.mxu0 %v4553_v23 }
0x15b3   :  { %v2445_v37 = vpop.f32.mrb[44].mxu0 }
0x15b4   :  { %v2446_v43 = vadd.f32 %v3272_v41, %v2445_v37  ;;  %v3056_v36 = vpop.f32.mrb[45].mxu0 }
0x15b5   :  { %v2448_v17 = vpop.f32.mrb[46].mxu0 }
0x15b6   :  { %v4392_v49 = vadd.f32 %v2446_v43, %v4338_v29  ;;  %v3057_v48 = vpop.f32.mrb[47].mxu0 }
0x15b8   :  { %v2452_v16 = vsel %vm623_vm0, %v4392_v49, 0.0  ;;  %v2455_v3 = vmul.f32 %v4392_v49, %v4392_v49 }
0x15b9   :  { %2453 = vadd.xlane.f32.xlu0 %v2452_v16 }
0x15ba   :  { %v2456_v5 = vsel %vm623_vm0, %v2455_v3, 0.0 }
0x15bb   :  { %2457 = vadd.xlane.f32.xlu1 %v2456_v5 }
0x1646   :  { %v2454_v7 = vpop.xlane.xlu0 %2453 }
0x1647   :  { %v2459_v22 = vmul.f32 0.015625, %v2454_v7 }
0x1648   :  { %v2458_v60 = vpop.xlane.xlu1 %2457 }
0x1649   :  { %v2461_v46 = vmul.f32 %v2459_v22, %v2459_v22  ;;  %v2460_v26 = vmul.f32 0.015625, %v2458_v60  ;;  %v2463_v29 = vsub.f32 %v4392_v49, %v2459_v22 }
0x164b   :  { %v2462_v4 = vsub.f32 %v2460_v26, %v2461_v46 }
0x164d   :  { %v2464_v30 = vadd.f32 1e-05, %v2462_v4 }
0x164f   :  { %3225 = vrsqrt.f32 %v2464_v30 }
0x1659   :  { %v3226_v8 = vpop.eup %3225 }
0x165a   :  { %v2466_v31 = vmul.f32 %v3226_v8, %v2463_v29 }
0x165c   :  { %v2467_v15 = vmul.f32 %v3273_v10, %v2466_v31 }
0x165e   :  { %v2468_v6 = vadd.f32 %v3274_v20, %v2467_v15 }
0x1660   :  { %v2469_v52 = vmul.f32 0.5, %v2468_v6 }
0x1662   :  { %3227 = vtanh.f32 %v2469_v52 }
0x166c   :  { %v3228_v24 = vpop.eup %3227 }
0x166d   :  { %v2471_v35 = vadd.f32 1.0, %v3228_v24 }
0x166f   :  { %v2472_v38 = vmul.f32 %v2471_v35, %v2469_v52 }
0x1671   :  { %v2473_v9 = vpack.c.bf16 %v2472_v38, %v2472_v38 }
0x1673   :  { %3067 = vmatmul.mubr.msk.bf16.vlgmr.msra.gmra.mrb[44].mxu1 %vm623_vm0, %v2473_v9 }
0x1674   :  { %3083 = vmatpush3.bf16.msra.mxu1 %v4097_v12  ;;  %3090 = vmatprep.mubr.msk.bf16.mxu1 %vm3435_vm14, %v4512_v32  ;;  %v3275_v12 = vld [vmem:[%s4445_s9 + $0x3] ss:$0 sm:$0xff] }
0x1675   :  { %3084 = vmatprep.subr.bf16.mxu1 %v4512_v32 }
0x1678   :  { %3085 = vmatpush3.bf16.msra.mxu1 %v4103_v14 }
0x1679   :  { %3086 = vmatprep.subr.bf16.mxu1 %v4512_v32 }
0x167c   :  { %3087 = vmatpush3.bf16.msra.mxu1 %v4554_v47 }
0x167d   :  { %3088 = vmatprep.subr.bf16.mxu1 %v4512_v32 }
0x1680   :  { %3089 = vmatpush3.bf16.msra.mxu1 %v4201_v44 }
0x1746   :  { %v2511_v59 = vpop.f32.mrb[44].mxu1 }
0x1747   :  { %v2512_v40 = vadd.f32 %v3275_v12, %v2511_v59  ;;  %v3068_v42 = vpop.f32.mrb[45].mxu1 }
0x1748   :  { %v2514_v63 = vpop.f32.mrb[46].mxu1 }
0x1749   :  { %v3069_v57 = vpop.f32.mrb[47].mxu1  ;;  %v2517_v13 = vsel %vm623_vm0, %v2512_v40, 0.0  ;;  %v2520_v14 = vmul.f32 %v2512_v40, %v2512_v40 }
0x174a   :  { %2518 = vadd.xlane.f32.xlu0 %v2517_v13 }
0x174b   :  { %v2521_v34 = vsel %vm623_vm0, %v2520_v14, 0.0 }
0x174c   :  { %2522 = vadd.xlane.f32.xlu1 %v2521_v34 }
0x17d7   :  { %v2519_v62 = vpop.xlane.xlu0 %2518 }
0x17d8   :  { %v2524_v32 = vmul.f32 0.015625, %v2519_v62 }
0x17d9   :  { %v2523_v2 = vpop.xlane.xlu1 %2522 }
0x17da   :  { %v2526_v44 = vmul.f32 %v2524_v32, %v2524_v32  ;;  %v2525_v21 = vmul.f32 0.015625, %v2523_v2  ;;  %v2528_v53 = vsub.f32 %v2512_v40, %v2524_v32 }
0x17dc   :  { %v2527_v51 = vsub.f32 %v2525_v21, %v2526_v44 }
0x17de   :  { %v2529_v54 = vadd.f32 1e-05, %v2527_v51 }
0x17e0   :  { %3229 = vrsqrt.f32 %v2529_v54 }
0x17ea   :  { %v3230_v18 = vpop.eup %3229 }
0x17eb   :  { %v2531_v58 = vmul.f32 %v3230_v18, %v2528_v53 }
0x17ed   :  { %v2532_v50 = vmul.f32 %v4123_v28, %v2531_v58 }
0x17ef   :  { %v2533_v55 = vadd.f32 %v4131_v61, %v2532_v50 }
0x17f1   :  { %v2534_v27 = vmul.f32 %v2533_v55, %v2034_v11 }
0x17f3   :  { %v2535_v39 = vadd.f32 %v2534_v27, %v2036_v19 }
0x17f5   :  { %v2536_v23 = vmul.f32 0.5, %v2535_v39 }
0x17f7   :  { %3231 = vtanh.f32 %v2536_v23 }
0x1801   :  { %v3232_v37 = vpop.eup %3231 }
0x1802   :  { %v2538_v41 = vadd.f32 1.0, %v3232_v37 }
0x1804   :  { %v2539_v43 = vmul.f32 %v2538_v41, %v2536_v23 }
0x1806   :  { %v2540_v36 = vpack.c.bf16 %v2539_v43, %v2539_v43 }
0x1808   :  { %3079 = vmatmul.mubr.msk.bf16.vlgmr.msra.gmra.mrb[48].mxu0 %vm623_vm0, %v2540_v36 }
0x18db   :  { %v2578_v17 = vpop.f32.mrb[48].mxu0 }
0x18dc   :  { %v2579_v28 = vadd.f32 %v4208_v1, %v2578_v17  ;;  %v3080_v48 = vpop.f32.mrb[49].mxu0 }
0x18dd   :  { %v2581_v0 = vpop.f32.mrb[50].mxu0 }
0x18de   :  { %v2584_v61 = vadd.f32 %v2579_v28, %v4392_v49  ;;  %v3081_v25 = vpop.f32.mrb[51].mxu0 }
0x18e0   :  { %v2585_v16 = vpack.c.bf16 %v2584_v61, %v2584_v61 }
0x18e2   :  { %3091 = vmatmul.mubr.msk.bf16.vlgmr.msra.gmra.mrb[48].mxu1 %vm623_vm0, %v2585_v16 }
0x19b5   :  { %v2623_v45 = vpop.f32.mrb[48].mxu1 }
0x19b6   :  { %v2624_v56 = vadd.f32 %v4258_v33, %v2623_v45  ;;  %v3092_v3 = vpop.f32.mrb[49].mxu1 }
0x19b7   :  { %v2626_v5 = vpop.f32.mrb[50].mxu1 }
0x19b8   :  { %2631 = vst.msk [vmem:[%s4454_s18 + $0x8] sm:$0xff] %vm2629_vm13, %v2624_v56  ;;  %v3093_v7 = vpop.f32.mrb[51].mxu1 }
0x19b9   :  { %2636 = vsyncpa [#allocation3], 1 }
0x19ba   :  { %2637 = vsyncpa [#allocation5], 1 }
0x19bb   :  { %2638 = vsyncpa [#allocation8], 1 }
0x19bc   :  { %2639 = vsyncpa [#allocation11], 1 }

</bundles_post_ra>
